<compile_context>
chip_gen: v7x
topology: tpu7x:2x2x1
jax: 0.10.0
libtpu: 0.0.40
codegen_flags: <defaults>
</compile_context>

<pallas_src>
import jax
import jax.numpy as jnp
from jax import lax
from jax.experimental import pallas as pl
from jax.experimental.pallas import tpu as pltpu

B = 2               # batch
H = W = 28          # spatial (implied by fc = Linear(8*28*28, 10))
HW = H * W          # 784  -> lane axis everywhere in the kernel
CIN = 1
COUT = 8
KS = 3
NTAP = KS * KS      # 9
FC_IN = COUT * HW   # 6272
FC_OUT = 10


def tiny_cnn_kernel(p_ref, cw_ref, cb_ref, fcb_ref, fcw_hbm,   # inputs
                    o_ref,                                      # output
                    act_ref, fcw_vmem, fcw_sem):                # scratch
    """Fused conv3x3(Cin=1)+bias+ReLU -> NCHW flatten -> Linear.

    p_ref   : (NTAP, B, HW)        f32 VMEM  im2col taps, lane-dense (784 lanes)
    cw_ref  : (COUT*NTAP,)         f32 SMEM  conv weights, row-major [co, kh, kw]
    cb_ref  : (COUT,)              f32 SMEM  conv bias
    fcb_ref : (1, FC_OUT)          f32 VMEM  fc bias
    fcw_hbm : (FC_OUT, COUT, HW)   f32 HBM   fc weight (PyTorch layout, no transpose)
    o_ref   : (B, FC_OUT)          f32 VMEM  logits
    act_ref : (B, COUT, HW)        f32 VMEM  activations (~50 KB, never hits HBM)
    fcw_vmem: (FC_OUT, COUT, HW)   f32 VMEM  fc weight landing buffer (~250 KB)
    fcw_sem : DMA semaphore
    """
    xb = o_ref.shape[0]

    # Kick off the 250 KB fc-weight DMA first so it overlaps the conv phase
    # (hides the dominant HBM read on v5e/v6e; harmless on v7x).
    fcw_copy = pltpu.make_async_copy(fcw_hbm, fcw_vmem, fcw_sem)
    fcw_copy.start()

    # --- conv 3x3 + bias + ReLU, accumulated lane-dense over HW=784 ----------
    # 9 taps x 8 channels of full-width VPU FMAs; activation stored per channel
    # into the VMEM scratch in exactly the NCHW-flatten order the FC needs.
    for co in range(COUT):
        acc = jnp.zeros((xb, HW), jnp.float32)
        for t in range(NTAP):
            acc = acc + p_ref[t] * cw_ref[co * NTAP + t]
        act_ref[:, co, :] = jnp.maximum(acc + cb_ref[co], 0.0)

    # --- FC on the MXU:  logits[b, n] = sum_co  act[b, co, :] . fcw[n, co, :] --
    fcw_copy.wait()
    logits = jnp.zeros((xb, FC_OUT), jnp.float32)
    for co in range(COUT):
        logits = logits + lax.dot_general(
            act_ref[:, co, :],            # (B, 784)
            fcw_vmem[:, co, :],           # (10, 784)
            dimension_numbers=(((1,), (1,)), ((), ())),   # minor-minor (A @ B.T)
            preferred_element_type=jnp.float32)
    o_ref[...] = logits + fcb_ref[...]


def tiny_cnn_forward(x, conv_w, conv_b, fc_w, fc_b):
    """x: (B, 1, 28, 28) f32 NCHW. Returns logits (B, 10) f32."""
    xb = x.shape[0]

    # Cheap XLA-side layout prep (largest intermediate is the 56 KB tap stack;
    # no weight transposes / no large copies).
    xp = jnp.pad(x[:, 0, :, :], ((0, 0), (1, 1), (1, 1)))            # (B, 30, 30)
    patches = jnp.stack(                                             # (9, B, 784)
        [xp[:, kh:kh + H, kw:kw + W].reshape(xb, HW)
         for kh in range(KS) for kw in range(KS)], axis=0)
    cw_flat = conv_w.reshape(COUT * NTAP)                            # (72,)
    fcw3 = fc_w.reshape(FC_OUT, COUT, HW)    # layout-preserving view, NOT a transpose
    fcb2 = fc_b.reshape(1, FC_OUT)

    return pl.pallas_call(
        tiny_cnn_kernel,
        out_shape=jax.ShapeDtypeStruct((xb, FC_OUT), jnp.float32),
        grid=(1,),
        in_specs=[
            pl.BlockSpec((NTAP, xb, HW), lambda i: (0, 0, 0)),           # taps
            pl.BlockSpec(memory_space=pltpu.MemorySpace.SMEM),           # conv w
            pl.BlockSpec(memory_space=pltpu.MemorySpace.SMEM),           # conv b
            pl.BlockSpec((1, FC_OUT), lambda i: (0, 0)),                 # fc b
            pl.BlockSpec(memory_space=pl.ANY),                           # fc w (HBM)
        ],
        out_specs=pl.BlockSpec((xb, FC_OUT), lambda i: (0, 0)),
        scratch_shapes=[
            pltpu.VMEM((xb, COUT, HW), jnp.float32),       # activations (~50 KB)
            pltpu.VMEM((FC_OUT, COUT, HW), jnp.float32),   # fc weight   (~250 KB)
            pltpu.SemaphoreType.DMA,
        ],
        compiler_params=pltpu.CompilerParams(
            dimension_semantics=("arbitrary",)),
    )(patches, cw_flat, conv_b, fcb2, fcw3)


def reference_forward(x, conv_w, conv_b, fc_w, fc_b):
    """Pure-JAX reference matching the PyTorch module."""
    y = lax.conv_general_dilated(
        x, conv_w, window_strides=(1, 1), padding=((1, 1), (1, 1)),
        dimension_numbers=("NCHW", "OIHW", "NCHW"))
    y = jnp.maximum(y + conv_b[None, :, None, None], 0.0)
    y = y.reshape(x.shape[0], -1)
    return y @ fc_w.T + fc_b


if __name__ == "__main__":
    key = jax.random.PRNGKey(0)
    kx, kw1, kb1, kw2, kb2 = jax.random.split(key, 5)

    # deterministic synthetic parameters (shapes from TinyCNN.__init__)
    x = jax.random.normal(kx, (B, CIN, H, W), jnp.float32)
    conv_w = 0.1 * jax.random.normal(kw1, (COUT, CIN, KS, KS), jnp.float32)
    conv_b = 0.1 * jax.random.normal(kb1, (COUT,), jnp.float32)
    fc_w = 0.02 * jax.random.normal(kw2, (FC_OUT, FC_IN), jnp.float32)
    fc_b = 0.02 * jax.random.normal(kb2, (FC_OUT,), jnp.float32)

    out = jax.jit(tiny_cnn_forward)(x, conv_w, conv_b, fc_w, fc_b)
    out = jax.block_until_ready(out)

    ref = reference_forward(x, conv_w, conv_b, fc_w, fc_b)
    assert out.shape == (B, FC_OUT)
    assert jnp.allclose(out, ref, atol=1e-2, rtol=1e-2)
    print("KERNEL_OK")
</pallas_src>

<mosaic_0001>
module attributes {stable_mosaic.version = 11 : i64} {
  func.func @tiny_cnn_kernel(%arg0: i32, %arg1: memref<9x2x784xf32, #tpu.memory_space<vmem>>, %arg2: memref<72xf32, #tpu.memory_space<smem>>, %arg3: memref<8xf32, #tpu.memory_space<smem>>, %arg4: memref<1x10xf32, #tpu.memory_space<vmem>>, %arg5: memref<10x8x784xf32, #tpu.memory_space<any>>, %arg6: memref<2x10xf32, #tpu.memory_space<vmem>>, %arg7: memref<2x8x784xf32, #tpu.memory_space<vmem>>, %arg8: memref<10x8x784xf32, #tpu.memory_space<vmem>>, %arg9: memref<!tpu.dma_semaphore, #tpu.memory_space<semaphore_mem>>) attributes {dimension_semantics = [#tpu.dimension_semantics<arbitrary>], iteration_bounds = array<i64: 1>, scalar_prefetch = 0 : i64, scratch_operands = 3 : i64, tpu.core_type = #tpu.core_type<tc>, window_params = [{pipeline_mode = #tpu.pipeline_mode<synchronous>, transform_indices = @transform_0, window_bounds = array<i64: 9, 2, 784>}, {transform_indices = @transform_1, window_bounds = array<i64: 72>}, {transform_indices = @transform_2, window_bounds = array<i64: 8>}, {pipeline_mode = #tpu.pipeline_mode<synchronous>, transform_indices = @transform_3, window_bounds = array<i64: 1, 10>}, {}, {pipeline_mode = #tpu.pipeline_mode<synchronous>, transform_indices = @transform_5, window_bounds = array<i64: 2, 10>}]} {
    tpu.enqueue_dma source(%arg5 : memref<10x8x784xf32, #tpu.memory_space<any>>) target(%arg8 : memref<10x8x784xf32, #tpu.memory_space<vmem>>) target_semaphore(%arg9 : memref<!tpu.dma_semaphore, #tpu.memory_space<semaphore_mem>>)
    %cst = arith.constant 0.000000e+00 : f32
    %0 = vector.broadcast %cst : f32 to vector<2x784xf32>
    %c0 = arith.constant 0 : index
    %c0_0 = arith.constant 0 : index
    %c0_1 = arith.constant 0 : index
    %1 = vector.load %arg1[%c0, %c0_0, %c0_1] : memref<9x2x784xf32, #tpu.memory_space<vmem>>, vector<1x2x784xf32>
    %2 = vector.shape_cast %1 : vector<1x2x784xf32> to vector<2x784xf32>
    %c0_2 = arith.constant 0 : index
    %3 = memref.load %arg2[%c0_2] : memref<72xf32, #tpu.memory_space<smem>>
    %4 = vector.broadcast %3 : f32 to vector<2x784xf32>
    %5 = arith.mulf %2, %4 : vector<2x784xf32>
    %6 = arith.addf %0, %5 : vector<2x784xf32>
    %c1 = arith.constant 1 : index
    %c0_3 = arith.constant 0 : index
    %c0_4 = arith.constant 0 : index
    %7 = vector.load %arg1[%c1, %c0_3, %c0_4] : memref<9x2x784xf32, #tpu.memory_space<vmem>>, vector<1x2x784xf32>
    %8 = vector.shape_cast %7 : vector<1x2x784xf32> to vector<2x784xf32>
    %c1_5 = arith.constant 1 : index
    %9 = memref.load %arg2[%c1_5] : memref<72xf32, #tpu.memory_space<smem>>
    %10 = vector.broadcast %9 : f32 to vector<2x784xf32>
    %11 = arith.mulf %8, %10 : vector<2x784xf32>
    %12 = arith.addf %6, %11 : vector<2x784xf32>
    %c2 = arith.constant 2 : index
    %c0_6 = arith.constant 0 : index
    %c0_7 = arith.constant 0 : index
    %13 = vector.load %arg1[%c2, %c0_6, %c0_7] : memref<9x2x784xf32, #tpu.memory_space<vmem>>, vector<1x2x784xf32>
    %14 = vector.shape_cast %13 : vector<1x2x784xf32> to vector<2x784xf32>
    %c2_8 = arith.constant 2 : index
    %15 = memref.load %arg2[%c2_8] : memref<72xf32, #tpu.memory_space<smem>>
    %16 = vector.broadcast %15 : f32 to vector<2x784xf32>
    %17 = arith.mulf %14, %16 : vector<2x784xf32>
    %18 = arith.addf %12, %17 : vector<2x784xf32>
    %c3 = arith.constant 3 : index
    %c0_9 = arith.constant 0 : index
    %c0_10 = arith.constant 0 : index
    %19 = vector.load %arg1[%c3, %c0_9, %c0_10] : memref<9x2x784xf32, #tpu.memory_space<vmem>>, vector<1x2x784xf32>
    %20 = vector.shape_cast %19 : vector<1x2x784xf32> to vector<2x784xf32>
    %c3_11 = arith.constant 3 : index
    %21 = memref.load %arg2[%c3_11] : memref<72xf32, #tpu.memory_space<smem>>
    %22 = vector.broadcast %21 : f32 to vector<2x784xf32>
    %23 = arith.mulf %20, %22 : vector<2x784xf32>
    %24 = arith.addf %18, %23 : vector<2x784xf32>
    %c4 = arith.constant 4 : index
    %c0_12 = arith.constant 0 : index
    %c0_13 = arith.constant 0 : index
    %25 = vector.load %arg1[%c4, %c0_12, %c0_13] : memref<9x2x784xf32, #tpu.memory_space<vmem>>, vector<1x2x784xf32>
    %26 = vector.shape_cast %25 : vector<1x2x784xf32> to vector<2x784xf32>
    %c4_14 = arith.constant 4 : index
    %27 = memref.load %arg2[%c4_14] : memref<72xf32, #tpu.memory_space<smem>>
    %28 = vector.broadcast %27 : f32 to vector<2x784xf32>
    %29 = arith.mulf %26, %28 : vector<2x784xf32>
    %30 = arith.addf %24, %29 : vector<2x784xf32>
    %c5 = arith.constant 5 : index
    %c0_15 = arith.constant 0 : index
    %c0_16 = arith.constant 0 : index
    %31 = vector.load %arg1[%c5, %c0_15, %c0_16] : memref<9x2x784xf32, #tpu.memory_space<vmem>>, vector<1x2x784xf32>
    %32 = vector.shape_cast %31 : vector<1x2x784xf32> to vector<2x784xf32>
    %c5_17 = arith.constant 5 : index
    %33 = memref.load %arg2[%c5_17] : memref<72xf32, #tpu.memory_space<smem>>
    %34 = vector.broadcast %33 : f32 to vector<2x784xf32>
    %35 = arith.mulf %32, %34 : vector<2x784xf32>
    %36 = arith.addf %30, %35 : vector<2x784xf32>
    %c6 = arith.constant 6 : index
    %c0_18 = arith.constant 0 : index
    %c0_19 = arith.constant 0 : index
    %37 = vector.load %arg1[%c6, %c0_18, %c0_19] : memref<9x2x784xf32, #tpu.memory_space<vmem>>, vector<1x2x784xf32>
    %38 = vector.shape_cast %37 : vector<1x2x784xf32> to vector<2x784xf32>
    %c6_20 = arith.constant 6 : index
    %39 = memref.load %arg2[%c6_20] : memref<72xf32, #tpu.memory_space<smem>>
    %40 = vector.broadcast %39 : f32 to vector<2x784xf32>
    %41 = arith.mulf %38, %40 : vector<2x784xf32>
    %42 = arith.addf %36, %41 : vector<2x784xf32>
    %c7 = arith.constant 7 : index
    %c0_21 = arith.constant 0 : index
    %c0_22 = arith.constant 0 : index
    %43 = vector.load %arg1[%c7, %c0_21, %c0_22] : memref<9x2x784xf32, #tpu.memory_space<vmem>>, vector<1x2x784xf32>
    %44 = vector.shape_cast %43 : vector<1x2x784xf32> to vector<2x784xf32>
    %c7_23 = arith.constant 7 : index
    %45 = memref.load %arg2[%c7_23] : memref<72xf32, #tpu.memory_space<smem>>
    %46 = vector.broadcast %45 : f32 to vector<2x784xf32>
    %47 = arith.mulf %44, %46 : vector<2x784xf32>
    %48 = arith.addf %42, %47 : vector<2x784xf32>
    %c8 = arith.constant 8 : index
    %c0_24 = arith.constant 0 : index
    %c0_25 = arith.constant 0 : index
    %49 = vector.load %arg1[%c8, %c0_24, %c0_25] : memref<9x2x784xf32, #tpu.memory_space<vmem>>, vector<1x2x784xf32>
    %50 = vector.shape_cast %49 : vector<1x2x784xf32> to vector<2x784xf32>
    %c8_26 = arith.constant 8 : index
    %51 = memref.load %arg2[%c8_26] : memref<72xf32, #tpu.memory_space<smem>>
    %52 = vector.broadcast %51 : f32 to vector<2x784xf32>
    %53 = arith.mulf %50, %52 : vector<2x784xf32>
    %54 = arith.addf %48, %53 : vector<2x784xf32>
    %c0_27 = arith.constant 0 : index
    %55 = memref.load %arg3[%c0_27] : memref<8xf32, #tpu.memory_space<smem>>
    %56 = vector.broadcast %55 : f32 to vector<2x784xf32>
    %57 = arith.addf %54, %56 : vector<2x784xf32>
    %cst_28 = arith.constant 0.000000e+00 : f32
    %58 = vector.broadcast %cst_28 : f32 to vector<2x784xf32>
    %59 = arith.maximumf %57, %58 : vector<2x784xf32>
    %c0_29 = arith.constant 0 : index
    %c0_30 = arith.constant 0 : index
    %c0_31 = arith.constant 0 : index
    %60 = vector.load %arg7[%c0_29, %c0_30, %c0_31] : memref<2x8x784xf32, #tpu.memory_space<vmem>>, vector<2x1x784xf32>
    %61 = vector.shape_cast %60 : vector<2x1x784xf32> to vector<2x784xf32>
    %62 = vector.shape_cast %59 : vector<2x784xf32> to vector<2x1x784xf32>
    tpu.vector_store %arg7[%c0_29, %c0_30, %c0_31], %62 {strides = array<i32>} : memref<2x8x784xf32, #tpu.memory_space<vmem>>, vector<2x1x784xf32>,
    %cst_32 = arith.constant 0.000000e+00 : f32
    %63 = vector.broadcast %cst_32 : f32 to vector<2x784xf32>
    %c0_33 = arith.constant 0 : index
    %c0_34 = arith.constant 0 : index
    %c0_35 = arith.constant 0 : index
    %64 = vector.load %arg1[%c0_33, %c0_34, %c0_35] : memref<9x2x784xf32, #tpu.memory_space<vmem>>, vector<1x2x784xf32>
    %65 = vector.shape_cast %64 : vector<1x2x784xf32> to vector<2x784xf32>
    %c9 = arith.constant 9 : index
    %66 = memref.load %arg2[%c9] : memref<72xf32, #tpu.memory_space<smem>>
    %67 = vector.broadcast %66 : f32 to vector<2x784xf32>
    %68 = arith.mulf %65, %67 : vector<2x784xf32>
    %69 = arith.addf %63, %68 : vector<2x784xf32>
    %c1_36 = arith.constant 1 : index
    %c0_37 = arith.constant 0 : index
    %c0_38 = arith.constant 0 : index
    %70 = vector.load %arg1[%c1_36, %c0_37, %c0_38] : memref<9x2x784xf32, #tpu.memory_space<vmem>>, vector<1x2x784xf32>
    %71 = vector.shape_cast %70 : vector<1x2x784xf32> to vector<2x784xf32>
    %c10 = arith.constant 10 : index
    %72 = memref.load %arg2[%c10] : memref<72xf32, #tpu.memory_space<smem>>
    %73 = vector.broadcast %72 : f32 to vector<2x784xf32>
    %74 = arith.mulf %71, %73 : vector<2x784xf32>
    %75 = arith.addf %69, %74 : vector<2x784xf32>
    %c2_39 = arith.constant 2 : index
    %c0_40 = arith.constant 0 : index
    %c0_41 = arith.constant 0 : index
    %76 = vector.load %arg1[%c2_39, %c0_40, %c0_41] : memref<9x2x784xf32, #tpu.memory_space<vmem>>, vector<1x2x784xf32>
    %77 = vector.shape_cast %76 : vector<1x2x784xf32> to vector<2x784xf32>
    %c11 = arith.constant 11 : index
    %78 = memref.load %arg2[%c11] : memref<72xf32, #tpu.memory_space<smem>>
    %79 = vector.broadcast %78 : f32 to vector<2x784xf32>
    %80 = arith.mulf %77, %79 : vector<2x784xf32>
    %81 = arith.addf %75, %80 : vector<2x784xf32>
    %c3_42 = arith.constant 3 : index
    %c0_43 = arith.constant 0 : index
    %c0_44 = arith.constant 0 : index
    %82 = vector.load %arg1[%c3_42, %c0_43, %c0_44] : memref<9x2x784xf32, #tpu.memory_space<vmem>>, vector<1x2x784xf32>
    %83 = vector.shape_cast %82 : vector<1x2x784xf32> to vector<2x784xf32>
    %c12 = arith.constant 12 : index
    %84 = memref.load %arg2[%c12] : memref<72xf32, #tpu.memory_space<smem>>
    %85 = vector.broadcast %84 : f32 to vector<2x784xf32>
    %86 = arith.mulf %83, %85 : vector<2x784xf32>
    %87 = arith.addf %81, %86 : vector<2x784xf32>
    %c4_45 = arith.constant 4 : index
    %c0_46 = arith.constant 0 : index
    %c0_47 = arith.constant 0 : index
    %88 = vector.load %arg1[%c4_45, %c0_46, %c0_47] : memref<9x2x784xf32, #tpu.memory_space<vmem>>, vector<1x2x784xf32>
    %89 = vector.shape_cast %88 : vector<1x2x784xf32> to vector<2x784xf32>
    %c13 = arith.constant 13 : index
    %90 = memref.load %arg2[%c13] : memref<72xf32, #tpu.memory_space<smem>>
    %91 = vector.broadcast %90 : f32 to vector<2x784xf32>
    %92 = arith.mulf %89, %91 : vector<2x784xf32>
    %93 = arith.addf %87, %92 : vector<2x784xf32>
    %c5_48 = arith.constant 5 : index
    %c0_49 = arith.constant 0 : index
    %c0_50 = arith.constant 0 : index
    %94 = vector.load %arg1[%c5_48, %c0_49, %c0_50] : memref<9x2x784xf32, #tpu.memory_space<vmem>>, vector<1x2x784xf32>
    %95 = vector.shape_cast %94 : vector<1x2x784xf32> to vector<2x784xf32>
    %c14 = arith.constant 14 : index
    %96 = memref.load %arg2[%c14] : memref<72xf32, #tpu.memory_space<smem>>
    %97 = vector.broadcast %96 : f32 to vector<2x784xf32>
    %98 = arith.mulf %95, %97 : vector<2x784xf32>
    %99 = arith.addf %93, %98 : vector<2x784xf32>
    %c6_51 = arith.constant 6 : index
    %c0_52 = arith.constant 0 : index
    %c0_53 = arith.constant 0 : index
    %100 = vector.load %arg1[%c6_51, %c0_52, %c0_53] : memref<9x2x784xf32, #tpu.memory_space<vmem>>, vector<1x2x784xf32>
    %101 = vector.shape_cast %100 : vector<1x2x784xf32> to vector<2x784xf32>
    %c15 = arith.constant 15 : index
    %102 = memref.load %arg2[%c15] : memref<72xf32, #tpu.memory_space<smem>>
    %103 = vector.broadcast %102 : f32 to vector<2x784xf32>
    %104 = arith.mulf %101, %103 : vector<2x784xf32>
    %105 = arith.addf %99, %104 : vector<2x784xf32>
    %c7_54 = arith.constant 7 : index
    %c0_55 = arith.constant 0 : index
    %c0_56 = arith.constant 0 : index
    %106 = vector.load %arg1[%c7_54, %c0_55, %c0_56] : memref<9x2x784xf32, #tpu.memory_space<vmem>>, vector<1x2x784xf32>
    %107 = vector.shape_cast %106 : vector<1x2x784xf32> to vector<2x784xf32>
    %c16 = arith.constant 16 : index
    %108 = memref.load %arg2[%c16] : memref<72xf32, #tpu.memory_space<smem>>
    %109 = vector.broadcast %108 : f32 to vector<2x784xf32>
    %110 = arith.mulf %107, %109 : vector<2x784xf32>
    %111 = arith.addf %105, %110 : vector<2x784xf32>
    %c8_57 = arith.constant 8 : index
    %c0_58 = arith.constant 0 : index
    %c0_59 = arith.constant 0 : index
    %112 = vector.load %arg1[%c8_57, %c0_58, %c0_59] : memref<9x2x784xf32, #tpu.memory_space<vmem>>, vector<1x2x784xf32>
    %113 = vector.shape_cast %112 : vector<1x2x784xf32> to vector<2x784xf32>
    %c17 = arith.constant 17 : index
    %114 = memref.load %arg2[%c17] : memref<72xf32, #tpu.memory_space<smem>>
    %115 = vector.broadcast %114 : f32 to vector<2x784xf32>
    %116 = arith.mulf %113, %115 : vector<2x784xf32>
    %117 = arith.addf %111, %116 : vector<2x784xf32>
    %c1_60 = arith.constant 1 : index
    %118 = memref.load %arg3[%c1_60] : memref<8xf32, #tpu.memory_space<smem>>
    %119 = vector.broadcast %118 : f32 to vector<2x784xf32>
    %120 = arith.addf %117, %119 : vector<2x784xf32>
    %cst_61 = arith.constant 0.000000e+00 : f32
    %121 = vector.broadcast %cst_61 : f32 to vector<2x784xf32>
    %122 = arith.maximumf %120, %121 : vector<2x784xf32>
    %c0_62 = arith.constant 0 : index
    %c1_63 = arith.constant 1 : index
    %c0_64 = arith.constant 0 : index
    %123 = vector.load %arg7[%c0_62, %c1_63, %c0_64] : memref<2x8x784xf32, #tpu.memory_space<vmem>>, vector<2x1x784xf32>
    %124 = vector.shape_cast %123 : vector<2x1x784xf32> to vector<2x784xf32>
    %125 = vector.shape_cast %122 : vector<2x784xf32> to vector<2x1x784xf32>
    tpu.vector_store %arg7[%c0_62, %c1_63, %c0_64], %125 {strides = array<i32>} : memref<2x8x784xf32, #tpu.memory_space<vmem>>, vector<2x1x784xf32>,
    %cst_65 = arith.constant 0.000000e+00 : f32
    %126 = vector.broadcast %cst_65 : f32 to vector<2x784xf32>
    %c0_66 = arith.constant 0 : index
    %c0_67 = arith.constant 0 : index
    %c0_68 = arith.constant 0 : index
    %127 = vector.load %arg1[%c0_66, %c0_67, %c0_68] : memref<9x2x784xf32, #tpu.memory_space<vmem>>, vector<1x2x784xf32>
    %128 = vector.shape_cast %127 : vector<1x2x784xf32> to vector<2x784xf32>
    %c18 = arith.constant 18 : index
    %129 = memref.load %arg2[%c18] : memref<72xf32, #tpu.memory_space<smem>>
    %130 = vector.broadcast %129 : f32 to vector<2x784xf32>
    %131 = arith.mulf %128, %130 : vector<2x784xf32>
    %132 = arith.addf %126, %131 : vector<2x784xf32>
    %c1_69 = arith.constant 1 : index
    %c0_70 = arith.constant 0 : index
    %c0_71 = arith.constant 0 : index
    %133 = vector.load %arg1[%c1_69, %c0_70, %c0_71] : memref<9x2x784xf32, #tpu.memory_space<vmem>>, vector<1x2x784xf32>
    %134 = vector.shape_cast %133 : vector<1x2x784xf32> to vector<2x784xf32>
    %c19 = arith.constant 19 : index
    %135 = memref.load %arg2[%c19] : memref<72xf32, #tpu.memory_space<smem>>
    %136 = vector.broadcast %135 : f32 to vector<2x784xf32>
    %137 = arith.mulf %134, %136 : vector<2x784xf32>
    %138 = arith.addf %132, %137 : vector<2x784xf32>
    %c2_72 = arith.constant 2 : index
    %c0_73 = arith.constant 0 : index
    %c0_74 = arith.constant 0 : index
    %139 = vector.load %arg1[%c2_72, %c0_73, %c0_74] : memref<9x2x784xf32, #tpu.memory_space<vmem>>, vector<1x2x784xf32>
    %140 = vector.shape_cast %139 : vector<1x2x784xf32> to vector<2x784xf32>
    %c20 = arith.constant 20 : index
    %141 = memref.load %arg2[%c20] : memref<72xf32, #tpu.memory_space<smem>>
    %142 = vector.broadcast %141 : f32 to vector<2x784xf32>
    %143 = arith.mulf %140, %142 : vector<2x784xf32>
    %144 = arith.addf %138, %143 : vector<2x784xf32>
    %c3_75 = arith.constant 3 : index
    %c0_76 = arith.constant 0 : index
    %c0_77 = arith.constant 0 : index
    %145 = vector.load %arg1[%c3_75, %c0_76, %c0_77] : memref<9x2x784xf32, #tpu.memory_space<vmem>>, vector<1x2x784xf32>
    %146 = vector.shape_cast %145 : vector<1x2x784xf32> to vector<2x784xf32>
    %c21 = arith.constant 21 : index
    %147 = memref.load %arg2[%c21] : memref<72xf32, #tpu.memory_space<smem>>
    %148 = vector.broadcast %147 : f32 to vector<2x784xf32>
    %149 = arith.mulf %146, %148 : vector<2x784xf32>
    %150 = arith.addf %144, %149 : vector<2x784xf32>
    %c4_78 = arith.constant 4 : index
    %c0_79 = arith.constant 0 : index
    %c0_80 = arith.constant 0 : index
    %151 = vector.load %arg1[%c4_78, %c0_79, %c0_80] : memref<9x2x784xf32, #tpu.memory_space<vmem>>, vector<1x2x784xf32>
    %152 = vector.shape_cast %151 : vector<1x2x784xf32> to vector<2x784xf32>
    %c22 = arith.constant 22 : index
    %153 = memref.load %arg2[%c22] : memref<72xf32, #tpu.memory_space<smem>>
    %154 = vector.broadcast %153 : f32 to vector<2x784xf32>
    %155 = arith.mulf %152, %154 : vector<2x784xf32>
    %156 = arith.addf %150, %155 : vector<2x784xf32>
    %c5_81 = arith.constant 5 : index
    %c0_82 = arith.constant 0 : index
    %c0_83 = arith.constant 0 : index
    %157 = vector.load %arg1[%c5_81, %c0_82, %c0_83] : memref<9x2x784xf32, #tpu.memory_space<vmem>>, vector<1x2x784xf32>
    %158 = vector.shape_cast %157 : vector<1x2x784xf32> to vector<2x784xf32>
    %c23 = arith.constant 23 : index
    %159 = memref.load %arg2[%c23] : memref<72xf32, #tpu.memory_space<smem>>
    %160 = vector.broadcast %159 : f32 to vector<2x784xf32>
    %161 = arith.mulf %158, %160 : vector<2x784xf32>
    %162 = arith.addf %156, %161 : vector<2x784xf32>
    %c6_84 = arith.constant 6 : index
    %c0_85 = arith.constant 0 : index
    %c0_86 = arith.constant 0 : index
    %163 = vector.load %arg1[%c6_84, %c0_85, %c0_86] : memref<9x2x784xf32, #tpu.memory_space<vmem>>, vector<1x2x784xf32>
    %164 = vector.shape_cast %163 : vector<1x2x784xf32> to vector<2x784xf32>
    %c24 = arith.constant 24 : index
    %165 = memref.load %arg2[%c24] : memref<72xf32, #tpu.memory_space<smem>>
    %166 = vector.broadcast %165 : f32 to vector<2x784xf32>
    %167 = arith.mulf %164, %166 : vector<2x784xf32>
    %168 = arith.addf %162, %167 : vector<2x784xf32>
    %c7_87 = arith.constant 7 : index
    %c0_88 = arith.constant 0 : index
    %c0_89 = arith.constant 0 : index
    %169 = vector.load %arg1[%c7_87, %c0_88, %c0_89] : memref<9x2x784xf32, #tpu.memory_space<vmem>>, vector<1x2x784xf32>
    %170 = vector.shape_cast %169 : vector<1x2x784xf32> to vector<2x784xf32>
    %c25 = arith.constant 25 : index
    %171 = memref.load %arg2[%c25] : memref<72xf32, #tpu.memory_space<smem>>
    %172 = vector.broadcast %171 : f32 to vector<2x784xf32>
    %173 = arith.mulf %170, %172 : vector<2x784xf32>
    %174 = arith.addf %168, %173 : vector<2x784xf32>
    %c8_90 = arith.constant 8 : index
    %c0_91 = arith.constant 0 : index
    %c0_92 = arith.constant 0 : index
    %175 = vector.load %arg1[%c8_90, %c0_91, %c0_92] : memref<9x2x784xf32, #tpu.memory_space<vmem>>, vector<1x2x784xf32>
    %176 = vector.shape_cast %175 : vector<1x2x784xf32> to vector<2x784xf32>
    %c26 = arith.constant 26 : index
    %177 = memref.load %arg2[%c26] : memref<72xf32, #tpu.memory_space<smem>>
    %178 = vector.broadcast %177 : f32 to vector<2x784xf32>
    %179 = arith.mulf %176, %178 : vector<2x784xf32>
    %180 = arith.addf %174, %179 : vector<2x784xf32>
    %c2_93 = arith.constant 2 : index
    %181 = memref.load %arg3[%c2_93] : memref<8xf32, #tpu.memory_space<smem>>
    %182 = vector.broadcast %181 : f32 to vector<2x784xf32>
    %183 = arith.addf %180, %182 : vector<2x784xf32>
    %cst_94 = arith.constant 0.000000e+00 : f32
    %184 = vector.broadcast %cst_94 : f32 to vector<2x784xf32>
    %185 = arith.maximumf %183, %184 : vector<2x784xf32>
    %c0_95 = arith.constant 0 : index
    %c2_96 = arith.constant 2 : index
    %c0_97 = arith.constant 0 : index
    %186 = vector.load %arg7[%c0_95, %c2_96, %c0_97] : memref<2x8x784xf32, #tpu.memory_space<vmem>>, vector<2x1x784xf32>
    %187 = vector.shape_cast %186 : vector<2x1x784xf32> to vector<2x784xf32>
    %188 = vector.shape_cast %185 : vector<2x784xf32> to vector<2x1x784xf32>
    tpu.vector_store %arg7[%c0_95, %c2_96, %c0_97], %188 {strides = array<i32>} : memref<2x8x784xf32, #tpu.memory_space<vmem>>, vector<2x1x784xf32>,
    %cst_98 = arith.constant 0.000000e+00 : f32
    %189 = vector.broadcast %cst_98 : f32 to vector<2x784xf32>
    %c0_99 = arith.constant 0 : index
    %c0_100 = arith.constant 0 : index
    %c0_101 = arith.constant 0 : index
    %190 = vector.load %arg1[%c0_99, %c0_100, %c0_101] : memref<9x2x784xf32, #tpu.memory_space<vmem>>, vector<1x2x784xf32>
    %191 = vector.shape_cast %190 : vector<1x2x784xf32> to vector<2x784xf32>
    %c27 = arith.constant 27 : index
    %192 = memref.load %arg2[%c27] : memref<72xf32, #tpu.memory_space<smem>>
    %193 = vector.broadcast %192 : f32 to vector<2x784xf32>
    %194 = arith.mulf %191, %193 : vector<2x784xf32>
    %195 = arith.addf %189, %194 : vector<2x784xf32>
    %c1_102 = arith.constant 1 : index
    %c0_103 = arith.constant 0 : index
    %c0_104 = arith.constant 0 : index
    %196 = vector.load %arg1[%c1_102, %c0_103, %c0_104] : memref<9x2x784xf32, #tpu.memory_space<vmem>>, vector<1x2x784xf32>
    %197 = vector.shape_cast %196 : vector<1x2x784xf32> to vector<2x784xf32>
    %c28 = arith.constant 28 : index
    %198 = memref.load %arg2[%c28] : memref<72xf32, #tpu.memory_space<smem>>
    %199 = vector.broadcast %198 : f32 to vector<2x784xf32>
    %200 = arith.mulf %197, %199 : vector<2x784xf32>
    %201 = arith.addf %195, %200 : vector<2x784xf32>
    %c2_105 = arith.constant 2 : index
    %c0_106 = arith.constant 0 : index
    %c0_107 = arith.constant 0 : index
    %202 = vector.load %arg1[%c2_105, %c0_106, %c0_107] : memref<9x2x784xf32, #tpu.memory_space<vmem>>, vector<1x2x784xf32>
    %203 = vector.shape_cast %202 : vector<1x2x784xf32> to vector<2x784xf32>
    %c29 = arith.constant 29 : index
    %204 = memref.load %arg2[%c29] : memref<72xf32, #tpu.memory_space<smem>>
    %205 = vector.broadcast %204 : f32 to vector<2x784xf32>
    %206 = arith.mulf %203, %205 : vector<2x784xf32>
    %207 = arith.addf %201, %206 : vector<2x784xf32>
    %c3_108 = arith.constant 3 : index
    %c0_109 = arith.constant 0 : index
    %c0_110 = arith.constant 0 : index
    %208 = vector.load %arg1[%c3_108, %c0_109, %c0_110] : memref<9x2x784xf32, #tpu.memory_space<vmem>>, vector<1x2x784xf32>
    %209 = vector.shape_cast %208 : vector<1x2x784xf32> to vector<2x784xf32>
    %c30 = arith.constant 30 : index
    %210 = memref.load %arg2[%c30] : memref<72xf32, #tpu.memory_space<smem>>
    %211 = vector.broadcast %210 : f32 to vector<2x784xf32>
    %212 = arith.mulf %209, %211 : vector<2x784xf32>
    %213 = arith.addf %207, %212 : vector<2x784xf32>
    %c4_111 = arith.constant 4 : index
    %c0_112 = arith.constant 0 : index
    %c0_113 = arith.constant 0 : index
    %214 = vector.load %arg1[%c4_111, %c0_112, %c0_113] : memref<9x2x784xf32, #tpu.memory_space<vmem>>, vector<1x2x784xf32>
    %215 = vector.shape_cast %214 : vector<1x2x784xf32> to vector<2x784xf32>
    %c31 = arith.constant 31 : index
    %216 = memref.load %arg2[%c31] : memref<72xf32, #tpu.memory_space<smem>>
    %217 = vector.broadcast %216 : f32 to vector<2x784xf32>
    %218 = arith.mulf %215, %217 : vector<2x784xf32>
    %219 = arith.addf %213, %218 : vector<2x784xf32>
    %c5_114 = arith.constant 5 : index
    %c0_115 = arith.constant 0 : index
    %c0_116 = arith.constant 0 : index
    %220 = vector.load %arg1[%c5_114, %c0_115, %c0_116] : memref<9x2x784xf32, #tpu.memory_space<vmem>>, vector<1x2x784xf32>
    %221 = vector.shape_cast %220 : vector<1x2x784xf32> to vector<2x784xf32>
    %c32 = arith.constant 32 : index
    %222 = memref.load %arg2[%c32] : memref<72xf32, #tpu.memory_space<smem>>
    %223 = vector.broadcast %222 : f32 to vector<2x784xf32>
    %224 = arith.mulf %221, %223 : vector<2x784xf32>
    %225 = arith.addf %219, %224 : vector<2x784xf32>
    %c6_117 = arith.constant 6 : index
    %c0_118 = arith.constant 0 : index
    %c0_119 = arith.constant 0 : index
    %226 = vector.load %arg1[%c6_117, %c0_118, %c0_119] : memref<9x2x784xf32, #tpu.memory_space<vmem>>, vector<1x2x784xf32>
    %227 = vector.shape_cast %226 : vector<1x2x784xf32> to vector<2x784xf32>
    %c33 = arith.constant 33 : index
    %228 = memref.load %arg2[%c33] : memref<72xf32, #tpu.memory_space<smem>>
    %229 = vector.broadcast %228 : f32 to vector<2x784xf32>
    %230 = arith.mulf %227, %229 : vector<2x784xf32>
    %231 = arith.addf %225, %230 : vector<2x784xf32>
    %c7_120 = arith.constant 7 : index
    %c0_121 = arith.constant 0 : index
    %c0_122 = arith.constant 0 : index
    %232 = vector.load %arg1[%c7_120, %c0_121, %c0_122] : memref<9x2x784xf32, #tpu.memory_space<vmem>>, vector<1x2x784xf32>
    %233 = vector.shape_cast %232 : vector<1x2x784xf32> to vector<2x784xf32>
    %c34 = arith.constant 34 : index
    %234 = memref.load %arg2[%c34] : memref<72xf32, #tpu.memory_space<smem>>
    %235 = vector.broadcast %234 : f32 to vector<2x784xf32>
    %236 = arith.mulf %233, %235 : vector<2x784xf32>
    %237 = arith.addf %231, %236 : vector<2x784xf32>
    %c8_123 = arith.constant 8 : index
    %c0_124 = arith.constant 0 : index
    %c0_125 = arith.constant 0 : index
    %238 = vector.load %arg1[%c8_123, %c0_124, %c0_125] : memref<9x2x784xf32, #tpu.memory_space<vmem>>, vector<1x2x784xf32>
    %239 = vector.shape_cast %238 : vector<1x2x784xf32> to vector<2x784xf32>
    %c35 = arith.constant 35 : index
    %240 = memref.load %arg2[%c35] : memref<72xf32, #tpu.memory_space<smem>>
    %241 = vector.broadcast %240 : f32 to vector<2x784xf32>
    %242 = arith.mulf %239, %241 : vector<2x784xf32>
    %243 = arith.addf %237, %242 : vector<2x784xf32>
    %c3_126 = arith.constant 3 : index
    %244 = memref.load %arg3[%c3_126] : memref<8xf32, #tpu.memory_space<smem>>
    %245 = vector.broadcast %244 : f32 to vector<2x784xf32>
    %246 = arith.addf %243, %245 : vector<2x784xf32>
    %cst_127 = arith.constant 0.000000e+00 : f32
    %247 = vector.broadcast %cst_127 : f32 to vector<2x784xf32>
    %248 = arith.maximumf %246, %247 : vector<2x784xf32>
    %c0_128 = arith.constant 0 : index
    %c3_129 = arith.constant 3 : index
    %c0_130 = arith.constant 0 : index
    %249 = vector.load %arg7[%c0_128, %c3_129, %c0_130] : memref<2x8x784xf32, #tpu.memory_space<vmem>>, vector<2x1x784xf32>
    %250 = vector.shape_cast %249 : vector<2x1x784xf32> to vector<2x784xf32>
    %251 = vector.shape_cast %248 : vector<2x784xf32> to vector<2x1x784xf32>
    tpu.vector_store %arg7[%c0_128, %c3_129, %c0_130], %251 {strides = array<i32>} : memref<2x8x784xf32, #tpu.memory_space<vmem>>, vector<2x1x784xf32>,
    %cst_131 = arith.constant 0.000000e+00 : f32
    %252 = vector.broadcast %cst_131 : f32 to vector<2x784xf32>
    %c0_132 = arith.constant 0 : index
    %c0_133 = arith.constant 0 : index
    %c0_134 = arith.constant 0 : index
    %253 = vector.load %arg1[%c0_132, %c0_133, %c0_134] : memref<9x2x784xf32, #tpu.memory_space<vmem>>, vector<1x2x784xf32>
    %254 = vector.shape_cast %253 : vector<1x2x784xf32> to vector<2x784xf32>
    %c36 = arith.constant 36 : index
    %255 = memref.load %arg2[%c36] : memref<72xf32, #tpu.memory_space<smem>>
    %256 = vector.broadcast %255 : f32 to vector<2x784xf32>
    %257 = arith.mulf %254, %256 : vector<2x784xf32>
    %258 = arith.addf %252, %257 : vector<2x784xf32>
    %c1_135 = arith.constant 1 : index
    %c0_136 = arith.constant 0 : index
    %c0_137 = arith.constant 0 : index
    %259 = vector.load %arg1[%c1_135, %c0_136, %c0_137] : memref<9x2x784xf32, #tpu.memory_space<vmem>>, vector<1x2x784xf32>
    %260 = vector.shape_cast %259 : vector<1x2x784xf32> to vector<2x784xf32>
    %c37 = arith.constant 37 : index
    %261 = memref.load %arg2[%c37] : memref<72xf32, #tpu.memory_space<smem>>
    %262 = vector.broadcast %261 : f32 to vector<2x784xf32>
    %263 = arith.mulf %260, %262 : vector<2x784xf32>
    %264 = arith.addf %258, %263 : vector<2x784xf32>
    %c2_138 = arith.constant 2 : index
    %c0_139 = arith.constant 0 : index
    %c0_140 = arith.constant 0 : index
    %265 = vector.load %arg1[%c2_138, %c0_139, %c0_140] : memref<9x2x784xf32, #tpu.memory_space<vmem>>, vector<1x2x784xf32>
    %266 = vector.shape_cast %265 : vector<1x2x784xf32> to vector<2x784xf32>
    %c38 = arith.constant 38 : index
    %267 = memref.load %arg2[%c38] : memref<72xf32, #tpu.memory_space<smem>>
    %268 = vector.broadcast %267 : f32 to vector<2x784xf32>
    %269 = arith.mulf %266, %268 : vector<2x784xf32>
    %270 = arith.addf %264, %269 : vector<2x784xf32>
    %c3_141 = arith.constant 3 : index
    %c0_142 = arith.constant 0 : index
    %c0_143 = arith.constant 0 : index
    %271 = vector.load %arg1[%c3_141, %c0_142, %c0_143] : memref<9x2x784xf32, #tpu.memory_space<vmem>>, vector<1x2x784xf32>
    %272 = vector.shape_cast %271 : vector<1x2x784xf32> to vector<2x784xf32>
    %c39 = arith.constant 39 : index
    %273 = memref.load %arg2[%c39] : memref<72xf32, #tpu.memory_space<smem>>
    %274 = vector.broadcast %273 : f32 to vector<2x784xf32>
    %275 = arith.mulf %272, %274 : vector<2x784xf32>
    %276 = arith.addf %270, %275 : vector<2x784xf32>
    %c4_144 = arith.constant 4 : index
    %c0_145 = arith.constant 0 : index
    %c0_146 = arith.constant 0 : index
    %277 = vector.load %arg1[%c4_144, %c0_145, %c0_146] : memref<9x2x784xf32, #tpu.memory_space<vmem>>, vector<1x2x784xf32>
    %278 = vector.shape_cast %277 : vector<1x2x784xf32> to vector<2x784xf32>
    %c40 = arith.constant 40 : index
    %279 = memref.load %arg2[%c40] : memref<72xf32, #tpu.memory_space<smem>>
    %280 = vector.broadcast %279 : f32 to vector<2x784xf32>
    %281 = arith.mulf %278, %280 : vector<2x784xf32>
    %282 = arith.addf %276, %281 : vector<2x784xf32>
    %c5_147 = arith.constant 5 : index
    %c0_148 = arith.constant 0 : index
    %c0_149 = arith.constant 0 : index
    %283 = vector.load %arg1[%c5_147, %c0_148, %c0_149] : memref<9x2x784xf32, #tpu.memory_space<vmem>>, vector<1x2x784xf32>
    %284 = vector.shape_cast %283 : vector<1x2x784xf32> to vector<2x784xf32>
    %c41 = arith.constant 41 : index
    %285 = memref.load %arg2[%c41] : memref<72xf32, #tpu.memory_space<smem>>
    %286 = vector.broadcast %285 : f32 to vector<2x784xf32>
    %287 = arith.mulf %284, %286 : vector<2x784xf32>
    %288 = arith.addf %282, %287 : vector<2x784xf32>
    %c6_150 = arith.constant 6 : index
    %c0_151 = arith.constant 0 : index
    %c0_152 = arith.constant 0 : index
    %289 = vector.load %arg1[%c6_150, %c0_151, %c0_152] : memref<9x2x784xf32, #tpu.memory_space<vmem>>, vector<1x2x784xf32>
    %290 = vector.shape_cast %289 : vector<1x2x784xf32> to vector<2x784xf32>
    %c42 = arith.constant 42 : index
    %291 = memref.load %arg2[%c42] : memref<72xf32, #tpu.memory_space<smem>>
    %292 = vector.broadcast %291 : f32 to vector<2x784xf32>
    %293 = arith.mulf %290, %292 : vector<2x784xf32>
    %294 = arith.addf %288, %293 : vector<2x784xf32>
    %c7_153 = arith.constant 7 : index
    %c0_154 = arith.constant 0 : index
    %c0_155 = arith.constant 0 : index
    %295 = vector.load %arg1[%c7_153, %c0_154, %c0_155] : memref<9x2x784xf32, #tpu.memory_space<vmem>>, vector<1x2x784xf32>
    %296 = vector.shape_cast %295 : vector<1x2x784xf32> to vector<2x784xf32>
    %c43 = arith.constant 43 : index
    %297 = memref.load %arg2[%c43] : memref<72xf32, #tpu.memory_space<smem>>
    %298 = vector.broadcast %297 : f32 to vector<2x784xf32>
    %299 = arith.mulf %296, %298 : vector<2x784xf32>
    %300 = arith.addf %294, %299 : vector<2x784xf32>
    %c8_156 = arith.constant 8 : index
    %c0_157 = arith.constant 0 : index
    %c0_158 = arith.constant 0 : index
    %301 = vector.load %arg1[%c8_156, %c0_157, %c0_158] : memref<9x2x784xf32, #tpu.memory_space<vmem>>, vector<1x2x784xf32>
    %302 = vector.shape_cast %301 : vector<1x2x784xf32> to vector<2x784xf32>
    %c44 = arith.constant 44 : index
    %303 = memref.load %arg2[%c44] : memref<72xf32, #tpu.memory_space<smem>>
    %304 = vector.broadcast %303 : f32 to vector<2x784xf32>
    %305 = arith.mulf %302, %304 : vector<2x784xf32>
    %306 = arith.addf %300, %305 : vector<2x784xf32>
    %c4_159 = arith.constant 4 : index
    %307 = memref.load %arg3[%c4_159] : memref<8xf32, #tpu.memory_space<smem>>
    %308 = vector.broadcast %307 : f32 to vector<2x784xf32>
    %309 = arith.addf %306, %308 : vector<2x784xf32>
    %cst_160 = arith.constant 0.000000e+00 : f32
    %310 = vector.broadcast %cst_160 : f32 to vector<2x784xf32>
    %311 = arith.maximumf %309, %310 : vector<2x784xf32>
    %c0_161 = arith.constant 0 : index
    %c4_162 = arith.constant 4 : index
    %c0_163 = arith.constant 0 : index
    %312 = vector.load %arg7[%c0_161, %c4_162, %c0_163] : memref<2x8x784xf32, #tpu.memory_space<vmem>>, vector<2x1x784xf32>
    %313 = vector.shape_cast %312 : vector<2x1x784xf32> to vector<2x784xf32>
    %314 = vector.shape_cast %311 : vector<2x784xf32> to vector<2x1x784xf32>
    tpu.vector_store %arg7[%c0_161, %c4_162, %c0_163], %314 {strides = array<i32>} : memref<2x8x784xf32, #tpu.memory_space<vmem>>, vector<2x1x784xf32>,
    %cst_164 = arith.constant 0.000000e+00 : f32
    %315 = vector.broadcast %cst_164 : f32 to vector<2x784xf32>
    %c0_165 = arith.constant 0 : index
    %c0_166 = arith.constant 0 : index
    %c0_167 = arith.constant 0 : index
    %316 = vector.load %arg1[%c0_165, %c0_166, %c0_167] : memref<9x2x784xf32, #tpu.memory_space<vmem>>, vector<1x2x784xf32>
    %317 = vector.shape_cast %316 : vector<1x2x784xf32> to vector<2x784xf32>
    %c45 = arith.constant 45 : index
    %318 = memref.load %arg2[%c45] : memref<72xf32, #tpu.memory_space<smem>>
    %319 = vector.broadcast %318 : f32 to vector<2x784xf32>
    %320 = arith.mulf %317, %319 : vector<2x784xf32>
    %321 = arith.addf %315, %320 : vector<2x784xf32>
    %c1_168 = arith.constant 1 : index
    %c0_169 = arith.constant 0 : index
    %c0_170 = arith.constant 0 : index
    %322 = vector.load %arg1[%c1_168, %c0_169, %c0_170] : memref<9x2x784xf32, #tpu.memory_space<vmem>>, vector<1x2x784xf32>
    %323 = vector.shape_cast %322 : vector<1x2x784xf32> to vector<2x784xf32>
    %c46 = arith.constant 46 : index
    %324 = memref.load %arg2[%c46] : memref<72xf32, #tpu.memory_space<smem>>
    %325 = vector.broadcast %324 : f32 to vector<2x784xf32>
    %326 = arith.mulf %323, %325 : vector<2x784xf32>
    %327 = arith.addf %321, %326 : vector<2x784xf32>
    %c2_171 = arith.constant 2 : index
    %c0_172 = arith.constant 0 : index
    %c0_173 = arith.constant 0 : index
    %328 = vector.load %arg1[%c2_171, %c0_172, %c0_173] : memref<9x2x784xf32, #tpu.memory_space<vmem>>, vector<1x2x784xf32>
    %329 = vector.shape_cast %328 : vector<1x2x784xf32> to vector<2x784xf32>
    %c47 = arith.constant 47 : index
    %330 = memref.load %arg2[%c47] : memref<72xf32, #tpu.memory_space<smem>>
    %331 = vector.broadcast %330 : f32 to vector<2x784xf32>
    %332 = arith.mulf %329, %331 : vector<2x784xf32>
    %333 = arith.addf %327, %332 : vector<2x784xf32>
    %c3_174 = arith.constant 3 : index
    %c0_175 = arith.constant 0 : index
    %c0_176 = arith.constant 0 : index
    %334 = vector.load %arg1[%c3_174, %c0_175, %c0_176] : memref<9x2x784xf32, #tpu.memory_space<vmem>>, vector<1x2x784xf32>
    %335 = vector.shape_cast %334 : vector<1x2x784xf32> to vector<2x784xf32>
    %c48 = arith.constant 48 : index
    %336 = memref.load %arg2[%c48] : memref<72xf32, #tpu.memory_space<smem>>
    %337 = vector.broadcast %336 : f32 to vector<2x784xf32>
    %338 = arith.mulf %335, %337 : vector<2x784xf32>
    %339 = arith.addf %333, %338 : vector<2x784xf32>
    %c4_177 = arith.constant 4 : index
    %c0_178 = arith.constant 0 : index
    %c0_179 = arith.constant 0 : index
    %340 = vector.load %arg1[%c4_177, %c0_178, %c0_179] : memref<9x2x784xf32, #tpu.memory_space<vmem>>, vector<1x2x784xf32>
    %341 = vector.shape_cast %340 : vector<1x2x784xf32> to vector<2x784xf32>
    %c49 = arith.constant 49 : index
    %342 = memref.load %arg2[%c49] : memref<72xf32, #tpu.memory_space<smem>>
    %343 = vector.broadcast %342 : f32 to vector<2x784xf32>
    %344 = arith.mulf %341, %343 : vector<2x784xf32>
    %345 = arith.addf %339, %344 : vector<2x784xf32>
    %c5_180 = arith.constant 5 : index
    %c0_181 = arith.constant 0 : index
    %c0_182 = arith.constant 0 : index
    %346 = vector.load %arg1[%c5_180, %c0_181, %c0_182] : memref<9x2x784xf32, #tpu.memory_space<vmem>>, vector<1x2x784xf32>
    %347 = vector.shape_cast %346 : vector<1x2x784xf32> to vector<2x784xf32>
    %c50 = arith.constant 50 : index
    %348 = memref.load %arg2[%c50] : memref<72xf32, #tpu.memory_space<smem>>
    %349 = vector.broadcast %348 : f32 to vector<2x784xf32>
    %350 = arith.mulf %347, %349 : vector<2x784xf32>
    %351 = arith.addf %345, %350 : vector<2x784xf32>
    %c6_183 = arith.constant 6 : index
    %c0_184 = arith.constant 0 : index
    %c0_185 = arith.constant 0 : index
    %352 = vector.load %arg1[%c6_183, %c0_184, %c0_185] : memref<9x2x784xf32, #tpu.memory_space<vmem>>, vector<1x2x784xf32>
    %353 = vector.shape_cast %352 : vector<1x2x784xf32> to vector<2x784xf32>
    %c51 = arith.constant 51 : index
    %354 = memref.load %arg2[%c51] : memref<72xf32, #tpu.memory_space<smem>>
    %355 = vector.broadcast %354 : f32 to vector<2x784xf32>
    %356 = arith.mulf %353, %355 : vector<2x784xf32>
    %357 = arith.addf %351, %356 : vector<2x784xf32>
    %c7_186 = arith.constant 7 : index
    %c0_187 = arith.constant 0 : index
    %c0_188 = arith.constant 0 : index
    %358 = vector.load %arg1[%c7_186, %c0_187, %c0_188] : memref<9x2x784xf32, #tpu.memory_space<vmem>>, vector<1x2x784xf32>
    %359 = vector.shape_cast %358 : vector<1x2x784xf32> to vector<2x784xf32>
    %c52 = arith.constant 52 : index
    %360 = memref.load %arg2[%c52] : memref<72xf32, #tpu.memory_space<smem>>
    %361 = vector.broadcast %360 : f32 to vector<2x784xf32>
    %362 = arith.mulf %359, %361 : vector<2x784xf32>
    %363 = arith.addf %357, %362 : vector<2x784xf32>
    %c8_189 = arith.constant 8 : index
    %c0_190 = arith.constant 0 : index
    %c0_191 = arith.constant 0 : index
    %364 = vector.load %arg1[%c8_189, %c0_190, %c0_191] : memref<9x2x784xf32, #tpu.memory_space<vmem>>, vector<1x2x784xf32>
    %365 = vector.shape_cast %364 : vector<1x2x784xf32> to vector<2x784xf32>
    %c53 = arith.constant 53 : index
    %366 = memref.load %arg2[%c53] : memref<72xf32, #tpu.memory_space<smem>>
    %367 = vector.broadcast %366 : f32 to vector<2x784xf32>
    %368 = arith.mulf %365, %367 : vector<2x784xf32>
    %369 = arith.addf %363, %368 : vector<2x784xf32>
    %c5_192 = arith.constant 5 : index
    %370 = memref.load %arg3[%c5_192] : memref<8xf32, #tpu.memory_space<smem>>
    %371 = vector.broadcast %370 : f32 to vector<2x784xf32>
    %372 = arith.addf %369, %371 : vector<2x784xf32>
    %cst_193 = arith.constant 0.000000e+00 : f32
    %373 = vector.broadcast %cst_193 : f32 to vector<2x784xf32>
    %374 = arith.maximumf %372, %373 : vector<2x784xf32>
    %c0_194 = arith.constant 0 : index
    %c5_195 = arith.constant 5 : index
    %c0_196 = arith.constant 0 : index
    %375 = vector.load %arg7[%c0_194, %c5_195, %c0_196] : memref<2x8x784xf32, #tpu.memory_space<vmem>>, vector<2x1x784xf32>
    %376 = vector.shape_cast %375 : vector<2x1x784xf32> to vector<2x784xf32>
    %377 = vector.shape_cast %374 : vector<2x784xf32> to vector<2x1x784xf32>
    tpu.vector_store %arg7[%c0_194, %c5_195, %c0_196], %377 {strides = array<i32>} : memref<2x8x784xf32, #tpu.memory_space<vmem>>, vector<2x1x784xf32>,
    %cst_197 = arith.constant 0.000000e+00 : f32
    %378 = vector.broadcast %cst_197 : f32 to vector<2x784xf32>
    %c0_198 = arith.constant 0 : index
    %c0_199 = arith.constant 0 : index
    %c0_200 = arith.constant 0 : index
    %379 = vector.load %arg1[%c0_198, %c0_199, %c0_200] : memref<9x2x784xf32, #tpu.memory_space<vmem>>, vector<1x2x784xf32>
    %380 = vector.shape_cast %379 : vector<1x2x784xf32> to vector<2x784xf32>
    %c54 = arith.constant 54 : index
    %381 = memref.load %arg2[%c54] : memref<72xf32, #tpu.memory_space<smem>>
    %382 = vector.broadcast %381 : f32 to vector<2x784xf32>
    %383 = arith.mulf %380, %382 : vector<2x784xf32>
    %384 = arith.addf %378, %383 : vector<2x784xf32>
    %c1_201 = arith.constant 1 : index
    %c0_202 = arith.constant 0 : index
    %c0_203 = arith.constant 0 : index
    %385 = vector.load %arg1[%c1_201, %c0_202, %c0_203] : memref<9x2x784xf32, #tpu.memory_space<vmem>>, vector<1x2x784xf32>
    %386 = vector.shape_cast %385 : vector<1x2x784xf32> to vector<2x784xf32>
    %c55 = arith.constant 55 : index
    %387 = memref.load %arg2[%c55] : memref<72xf32, #tpu.memory_space<smem>>
    %388 = vector.broadcast %387 : f32 to vector<2x784xf32>
    %389 = arith.mulf %386, %388 : vector<2x784xf32>
    %390 = arith.addf %384, %389 : vector<2x784xf32>
    %c2_204 = arith.constant 2 : index
    %c0_205 = arith.constant 0 : index
    %c0_206 = arith.constant 0 : index
    %391 = vector.load %arg1[%c2_204, %c0_205, %c0_206] : memref<9x2x784xf32, #tpu.memory_space<vmem>>, vector<1x2x784xf32>
    %392 = vector.shape_cast %391 : vector<1x2x784xf32> to vector<2x784xf32>
    %c56 = arith.constant 56 : index
    %393 = memref.load %arg2[%c56] : memref<72xf32, #tpu.memory_space<smem>>
    %394 = vector.broadcast %393 : f32 to vector<2x784xf32>
    %395 = arith.mulf %392, %394 : vector<2x784xf32>
    %396 = arith.addf %390, %395 : vector<2x784xf32>
    %c3_207 = arith.constant 3 : index
    %c0_208 = arith.constant 0 : index
    %c0_209 = arith.constant 0 : index
    %397 = vector.load %arg1[%c3_207, %c0_208, %c0_209] : memref<9x2x784xf32, #tpu.memory_space<vmem>>, vector<1x2x784xf32>
    %398 = vector.shape_cast %397 : vector<1x2x784xf32> to vector<2x784xf32>
    %c57 = arith.constant 57 : index
    %399 = memref.load %arg2[%c57] : memref<72xf32, #tpu.memory_space<smem>>
    %400 = vector.broadcast %399 : f32 to vector<2x784xf32>
    %401 = arith.mulf %398, %400 : vector<2x784xf32>
    %402 = arith.addf %396, %401 : vector<2x784xf32>
    %c4_210 = arith.constant 4 : index
    %c0_211 = arith.constant 0 : index
    %c0_212 = arith.constant 0 : index
    %403 = vector.load %arg1[%c4_210, %c0_211, %c0_212] : memref<9x2x784xf32, #tpu.memory_space<vmem>>, vector<1x2x784xf32>
    %404 = vector.shape_cast %403 : vector<1x2x784xf32> to vector<2x784xf32>
    %c58 = arith.constant 58 : index
    %405 = memref.load %arg2[%c58] : memref<72xf32, #tpu.memory_space<smem>>
    %406 = vector.broadcast %405 : f32 to vector<2x784xf32>
    %407 = arith.mulf %404, %406 : vector<2x784xf32>
    %408 = arith.addf %402, %407 : vector<2x784xf32>
    %c5_213 = arith.constant 5 : index
    %c0_214 = arith.constant 0 : index
    %c0_215 = arith.constant 0 : index
    %409 = vector.load %arg1[%c5_213, %c0_214, %c0_215] : memref<9x2x784xf32, #tpu.memory_space<vmem>>, vector<1x2x784xf32>
    %410 = vector.shape_cast %409 : vector<1x2x784xf32> to vector<2x784xf32>
    %c59 = arith.constant 59 : index
    %411 = memref.load %arg2[%c59] : memref<72xf32, #tpu.memory_space<smem>>
    %412 = vector.broadcast %411 : f32 to vector<2x784xf32>
    %413 = arith.mulf %410, %412 : vector<2x784xf32>
    %414 = arith.addf %408, %413 : vector<2x784xf32>
    %c6_216 = arith.constant 6 : index
    %c0_217 = arith.constant 0 : index
    %c0_218 = arith.constant 0 : index
    %415 = vector.load %arg1[%c6_216, %c0_217, %c0_218] : memref<9x2x784xf32, #tpu.memory_space<vmem>>, vector<1x2x784xf32>
    %416 = vector.shape_cast %415 : vector<1x2x784xf32> to vector<2x784xf32>
    %c60 = arith.constant 60 : index
    %417 = memref.load %arg2[%c60] : memref<72xf32, #tpu.memory_space<smem>>
    %418 = vector.broadcast %417 : f32 to vector<2x784xf32>
    %419 = arith.mulf %416, %418 : vector<2x784xf32>
    %420 = arith.addf %414, %419 : vector<2x784xf32>
    %c7_219 = arith.constant 7 : index
    %c0_220 = arith.constant 0 : index
    %c0_221 = arith.constant 0 : index
    %421 = vector.load %arg1[%c7_219, %c0_220, %c0_221] : memref<9x2x784xf32, #tpu.memory_space<vmem>>, vector<1x2x784xf32>
    %422 = vector.shape_cast %421 : vector<1x2x784xf32> to vector<2x784xf32>
    %c61 = arith.constant 61 : index
    %423 = memref.load %arg2[%c61] : memref<72xf32, #tpu.memory_space<smem>>
    %424 = vector.broadcast %423 : f32 to vector<2x784xf32>
    %425 = arith.mulf %422, %424 : vector<2x784xf32>
    %426 = arith.addf %420, %425 : vector<2x784xf32>
    %c8_222 = arith.constant 8 : index
    %c0_223 = arith.constant 0 : index
    %c0_224 = arith.constant 0 : index
    %427 = vector.load %arg1[%c8_222, %c0_223, %c0_224] : memref<9x2x784xf32, #tpu.memory_space<vmem>>, vector<1x2x784xf32>
    %428 = vector.shape_cast %427 : vector<1x2x784xf32> to vector<2x784xf32>
    %c62 = arith.constant 62 : index
    %429 = memref.load %arg2[%c62] : memref<72xf32, #tpu.memory_space<smem>>
    %430 = vector.broadcast %429 : f32 to vector<2x784xf32>
    %431 = arith.mulf %428, %430 : vector<2x784xf32>
    %432 = arith.addf %426, %431 : vector<2x784xf32>
    %c6_225 = arith.constant 6 : index
    %433 = memref.load %arg3[%c6_225] : memref<8xf32, #tpu.memory_space<smem>>
    %434 = vector.broadcast %433 : f32 to vector<2x784xf32>
    %435 = arith.addf %432, %434 : vector<2x784xf32>
    %cst_226 = arith.constant 0.000000e+00 : f32
    %436 = vector.broadcast %cst_226 : f32 to vector<2x784xf32>
    %437 = arith.maximumf %435, %436 : vector<2x784xf32>
    %c0_227 = arith.constant 0 : index
    %c6_228 = arith.constant 6 : index
    %c0_229 = arith.constant 0 : index
    %438 = vector.load %arg7[%c0_227, %c6_228, %c0_229] : memref<2x8x784xf32, #tpu.memory_space<vmem>>, vector<2x1x784xf32>
    %439 = vector.shape_cast %438 : vector<2x1x784xf32> to vector<2x784xf32>
    %440 = vector.shape_cast %437 : vector<2x784xf32> to vector<2x1x784xf32>
    tpu.vector_store %arg7[%c0_227, %c6_228, %c0_229], %440 {strides = array<i32>} : memref<2x8x784xf32, #tpu.memory_space<vmem>>, vector<2x1x784xf32>,
    %cst_230 = arith.constant 0.000000e+00 : f32
    %441 = vector.broadcast %cst_230 : f32 to vector<2x784xf32>
    %c0_231 = arith.constant 0 : index
    %c0_232 = arith.constant 0 : index
    %c0_233 = arith.constant 0 : index
    %442 = vector.load %arg1[%c0_231, %c0_232, %c0_233] : memref<9x2x784xf32, #tpu.memory_space<vmem>>, vector<1x2x784xf32>
    %443 = vector.shape_cast %442 : vector<1x2x784xf32> to vector<2x784xf32>
    %c63 = arith.constant 63 : index
    %444 = memref.load %arg2[%c63] : memref<72xf32, #tpu.memory_space<smem>>
    %445 = vector.broadcast %444 : f32 to vector<2x784xf32>
    %446 = arith.mulf %443, %445 : vector<2x784xf32>
    %447 = arith.addf %441, %446 : vector<2x784xf32>
    %c1_234 = arith.constant 1 : index
    %c0_235 = arith.constant 0 : index
    %c0_236 = arith.constant 0 : index
    %448 = vector.load %arg1[%c1_234, %c0_235, %c0_236] : memref<9x2x784xf32, #tpu.memory_space<vmem>>, vector<1x2x784xf32>
    %449 = vector.shape_cast %448 : vector<1x2x784xf32> to vector<2x784xf32>
    %c64 = arith.constant 64 : index
    %450 = memref.load %arg2[%c64] : memref<72xf32, #tpu.memory_space<smem>>
    %451 = vector.broadcast %450 : f32 to vector<2x784xf32>
    %452 = arith.mulf %449, %451 : vector<2x784xf32>
    %453 = arith.addf %447, %452 : vector<2x784xf32>
    %c2_237 = arith.constant 2 : index
    %c0_238 = arith.constant 0 : index
    %c0_239 = arith.constant 0 : index
    %454 = vector.load %arg1[%c2_237, %c0_238, %c0_239] : memref<9x2x784xf32, #tpu.memory_space<vmem>>, vector<1x2x784xf32>
    %455 = vector.shape_cast %454 : vector<1x2x784xf32> to vector<2x784xf32>
    %c65 = arith.constant 65 : index
    %456 = memref.load %arg2[%c65] : memref<72xf32, #tpu.memory_space<smem>>
    %457 = vector.broadcast %456 : f32 to vector<2x784xf32>
    %458 = arith.mulf %455, %457 : vector<2x784xf32>
    %459 = arith.addf %453, %458 : vector<2x784xf32>
    %c3_240 = arith.constant 3 : index
    %c0_241 = arith.constant 0 : index
    %c0_242 = arith.constant 0 : index
    %460 = vector.load %arg1[%c3_240, %c0_241, %c0_242] : memref<9x2x784xf32, #tpu.memory_space<vmem>>, vector<1x2x784xf32>
    %461 = vector.shape_cast %460 : vector<1x2x784xf32> to vector<2x784xf32>
    %c66 = arith.constant 66 : index
    %462 = memref.load %arg2[%c66] : memref<72xf32, #tpu.memory_space<smem>>
    %463 = vector.broadcast %462 : f32 to vector<2x784xf32>
    %464 = arith.mulf %461, %463 : vector<2x784xf32>
    %465 = arith.addf %459, %464 : vector<2x784xf32>
    %c4_243 = arith.constant 4 : index
    %c0_244 = arith.constant 0 : index
    %c0_245 = arith.constant 0 : index
    %466 = vector.load %arg1[%c4_243, %c0_244, %c0_245] : memref<9x2x784xf32, #tpu.memory_space<vmem>>, vector<1x2x784xf32>
    %467 = vector.shape_cast %466 : vector<1x2x784xf32> to vector<2x784xf32>
    %c67 = arith.constant 67 : index
    %468 = memref.load %arg2[%c67] : memref<72xf32, #tpu.memory_space<smem>>
    %469 = vector.broadcast %468 : f32 to vector<2x784xf32>
    %470 = arith.mulf %467, %469 : vector<2x784xf32>
    %471 = arith.addf %465, %470 : vector<2x784xf32>
    %c5_246 = arith.constant 5 : index
    %c0_247 = arith.constant 0 : index
    %c0_248 = arith.constant 0 : index
    %472 = vector.load %arg1[%c5_246, %c0_247, %c0_248] : memref<9x2x784xf32, #tpu.memory_space<vmem>>, vector<1x2x784xf32>
    %473 = vector.shape_cast %472 : vector<1x2x784xf32> to vector<2x784xf32>
    %c68 = arith.constant 68 : index
    %474 = memref.load %arg2[%c68] : memref<72xf32, #tpu.memory_space<smem>>
    %475 = vector.broadcast %474 : f32 to vector<2x784xf32>
    %476 = arith.mulf %473, %475 : vector<2x784xf32>
    %477 = arith.addf %471, %476 : vector<2x784xf32>
    %c6_249 = arith.constant 6 : index
    %c0_250 = arith.constant 0 : index
    %c0_251 = arith.constant 0 : index
    %478 = vector.load %arg1[%c6_249, %c0_250, %c0_251] : memref<9x2x784xf32, #tpu.memory_space<vmem>>, vector<1x2x784xf32>
    %479 = vector.shape_cast %478 : vector<1x2x784xf32> to vector<2x784xf32>
    %c69 = arith.constant 69 : index
    %480 = memref.load %arg2[%c69] : memref<72xf32, #tpu.memory_space<smem>>
    %481 = vector.broadcast %480 : f32 to vector<2x784xf32>
    %482 = arith.mulf %479, %481 : vector<2x784xf32>
    %483 = arith.addf %477, %482 : vector<2x784xf32>
    %c7_252 = arith.constant 7 : index
    %c0_253 = arith.constant 0 : index
    %c0_254 = arith.constant 0 : index
    %484 = vector.load %arg1[%c7_252, %c0_253, %c0_254] : memref<9x2x784xf32, #tpu.memory_space<vmem>>, vector<1x2x784xf32>
    %485 = vector.shape_cast %484 : vector<1x2x784xf32> to vector<2x784xf32>
    %c70 = arith.constant 70 : index
    %486 = memref.load %arg2[%c70] : memref<72xf32, #tpu.memory_space<smem>>
    %487 = vector.broadcast %486 : f32 to vector<2x784xf32>
    %488 = arith.mulf %485, %487 : vector<2x784xf32>
    %489 = arith.addf %483, %488 : vector<2x784xf32>
    %c8_255 = arith.constant 8 : index
    %c0_256 = arith.constant 0 : index
    %c0_257 = arith.constant 0 : index
    %490 = vector.load %arg1[%c8_255, %c0_256, %c0_257] : memref<9x2x784xf32, #tpu.memory_space<vmem>>, vector<1x2x784xf32>
    %491 = vector.shape_cast %490 : vector<1x2x784xf32> to vector<2x784xf32>
    %c71 = arith.constant 71 : index
    %492 = memref.load %arg2[%c71] : memref<72xf32, #tpu.memory_space<smem>>
    %493 = vector.broadcast %492 : f32 to vector<2x784xf32>
    %494 = arith.mulf %491, %493 : vector<2x784xf32>
    %495 = arith.addf %489, %494 : vector<2x784xf32>
    %c7_258 = arith.constant 7 : index
    %496 = memref.load %arg3[%c7_258] : memref<8xf32, #tpu.memory_space<smem>>
    %497 = vector.broadcast %496 : f32 to vector<2x784xf32>
    %498 = arith.addf %495, %497 : vector<2x784xf32>
    %cst_259 = arith.constant 0.000000e+00 : f32
    %499 = vector.broadcast %cst_259 : f32 to vector<2x784xf32>
    %500 = arith.maximumf %498, %499 : vector<2x784xf32>
    %c0_260 = arith.constant 0 : index
    %c7_261 = arith.constant 7 : index
    %c0_262 = arith.constant 0 : index
    %501 = vector.load %arg7[%c0_260, %c7_261, %c0_262] : memref<2x8x784xf32, #tpu.memory_space<vmem>>, vector<2x1x784xf32>
    %502 = vector.shape_cast %501 : vector<2x1x784xf32> to vector<2x784xf32>
    %503 = vector.shape_cast %500 : vector<2x784xf32> to vector<2x1x784xf32>
    tpu.vector_store %arg7[%c0_260, %c7_261, %c0_262], %503 {strides = array<i32>} : memref<2x8x784xf32, #tpu.memory_space<vmem>>, vector<2x1x784xf32>,
    tpu.wait_dma2 semaphore(%arg9 : memref<!tpu.dma_semaphore, #tpu.memory_space<semaphore_mem>>) src(%arg5 : memref<10x8x784xf32, #tpu.memory_space<any>>) dst(%arg8 : memref<10x8x784xf32, #tpu.memory_space<vmem>>)
    %cst_263 = arith.constant 0.000000e+00 : f32
    %504 = vector.broadcast %cst_263 : f32 to vector<2x10xf32>
    %c0_264 = arith.constant 0 : index
    %c0_265 = arith.constant 0 : index
    %c0_266 = arith.constant 0 : index
    %505 = vector.load %arg7[%c0_264, %c0_265, %c0_266] : memref<2x8x784xf32, #tpu.memory_space<vmem>>, vector<2x1x784xf32>
    %506 = vector.shape_cast %505 : vector<2x1x784xf32> to vector<2x784xf32>
    %c0_267 = arith.constant 0 : index
    %c0_268 = arith.constant 0 : index
    %c0_269 = arith.constant 0 : index
    %507 = vector.load %arg8[%c0_267, %c0_268, %c0_269] : memref<10x8x784xf32, #tpu.memory_space<vmem>>, vector<10x1x784xf32>
    %508 = vector.shape_cast %507 : vector<10x1x784xf32> to vector<10x784xf32>
    %cst_270 = arith.constant dense<0.000000e+00> : vector<2x10xf32>
    %509 = tpu.matmul %506, %508, %cst_270 {dimension_numbers = #tpu.dot_dimension_numbers<[1], [1], [0], [0], [0, 0, 1, 0], [], []>} : vector<2x784xf32>, vector<10x784xf32>, vector<2x10xf32> -> vector<2x10xf32>
    %510 = arith.addf %504, %509 : vector<2x10xf32>
    %c0_271 = arith.constant 0 : index
    %c1_272 = arith.constant 1 : index
    %c0_273 = arith.constant 0 : index
    %511 = vector.load %arg7[%c0_271, %c1_272, %c0_273] : memref<2x8x784xf32, #tpu.memory_space<vmem>>, vector<2x1x784xf32>
    %512 = vector.shape_cast %511 : vector<2x1x784xf32> to vector<2x784xf32>
    %c0_274 = arith.constant 0 : index
    %c1_275 = arith.constant 1 : index
    %c0_276 = arith.constant 0 : index
    %513 = vector.load %arg8[%c0_274, %c1_275, %c0_276] : memref<10x8x784xf32, #tpu.memory_space<vmem>>, vector<10x1x784xf32>
    %514 = vector.shape_cast %513 : vector<10x1x784xf32> to vector<10x784xf32>
    %cst_277 = arith.constant dense<0.000000e+00> : vector<2x10xf32>
    %515 = tpu.matmul %512, %514, %cst_277 {dimension_numbers = #tpu.dot_dimension_numbers<[1], [1], [0], [0], [0, 0, 1, 0], [], []>} : vector<2x784xf32>, vector<10x784xf32>, vector<2x10xf32> -> vector<2x10xf32>
    %516 = arith.addf %510, %515 : vector<2x10xf32>
    %c0_278 = arith.constant 0 : index
    %c2_279 = arith.constant 2 : index
    %c0_280 = arith.constant 0 : index
    %517 = vector.load %arg7[%c0_278, %c2_279, %c0_280] : memref<2x8x784xf32, #tpu.memory_space<vmem>>, vector<2x1x784xf32>
    %518 = vector.shape_cast %517 : vector<2x1x784xf32> to vector<2x784xf32>
    %c0_281 = arith.constant 0 : index
    %c2_282 = arith.constant 2 : index
    %c0_283 = arith.constant 0 : index
    %519 = vector.load %arg8[%c0_281, %c2_282, %c0_283] : memref<10x8x784xf32, #tpu.memory_space<vmem>>, vector<10x1x784xf32>
    %520 = vector.shape_cast %519 : vector<10x1x784xf32> to vector<10x784xf32>
    %cst_284 = arith.constant dense<0.000000e+00> : vector<2x10xf32>
    %521 = tpu.matmul %518, %520, %cst_284 {dimension_numbers = #tpu.dot_dimension_numbers<[1], [1], [0], [0], [0, 0, 1, 0], [], []>} : vector<2x784xf32>, vector<10x784xf32>, vector<2x10xf32> -> vector<2x10xf32>
    %522 = arith.addf %516, %521 : vector<2x10xf32>
    %c0_285 = arith.constant 0 : index
    %c3_286 = arith.constant 3 : index
    %c0_287 = arith.constant 0 : index
    %523 = vector.load %arg7[%c0_285, %c3_286, %c0_287] : memref<2x8x784xf32, #tpu.memory_space<vmem>>, vector<2x1x784xf32>
    %524 = vector.shape_cast %523 : vector<2x1x784xf32> to vector<2x784xf32>
    %c0_288 = arith.constant 0 : index
    %c3_289 = arith.constant 3 : index
    %c0_290 = arith.constant 0 : index
    %525 = vector.load %arg8[%c0_288, %c3_289, %c0_290] : memref<10x8x784xf32, #tpu.memory_space<vmem>>, vector<10x1x784xf32>
    %526 = vector.shape_cast %525 : vector<10x1x784xf32> to vector<10x784xf32>
    %cst_291 = arith.constant dense<0.000000e+00> : vector<2x10xf32>
    %527 = tpu.matmul %524, %526, %cst_291 {dimension_numbers = #tpu.dot_dimension_numbers<[1], [1], [0], [0], [0, 0, 1, 0], [], []>} : vector<2x784xf32>, vector<10x784xf32>, vector<2x10xf32> -> vector<2x10xf32>
    %528 = arith.addf %522, %527 : vector<2x10xf32>
    %c0_292 = arith.constant 0 : index
    %c4_293 = arith.constant 4 : index
    %c0_294 = arith.constant 0 : index
    %529 = vector.load %arg7[%c0_292, %c4_293, %c0_294] : memref<2x8x784xf32, #tpu.memory_space<vmem>>, vector<2x1x784xf32>
    %530 = vector.shape_cast %529 : vector<2x1x784xf32> to vector<2x784xf32>
    %c0_295 = arith.constant 0 : index
    %c4_296 = arith.constant 4 : index
    %c0_297 = arith.constant 0 : index
    %531 = vector.load %arg8[%c0_295, %c4_296, %c0_297] : memref<10x8x784xf32, #tpu.memory_space<vmem>>, vector<10x1x784xf32>
    %532 = vector.shape_cast %531 : vector<10x1x784xf32> to vector<10x784xf32>
    %cst_298 = arith.constant dense<0.000000e+00> : vector<2x10xf32>
    %533 = tpu.matmul %530, %532, %cst_298 {dimension_numbers = #tpu.dot_dimension_numbers<[1], [1], [0], [0], [0, 0, 1, 0], [], []>} : vector<2x784xf32>, vector<10x784xf32>, vector<2x10xf32> -> vector<2x10xf32>
    %534 = arith.addf %528, %533 : vector<2x10xf32>
    %c0_299 = arith.constant 0 : index
    %c5_300 = arith.constant 5 : index
    %c0_301 = arith.constant 0 : index
    %535 = vector.load %arg7[%c0_299, %c5_300, %c0_301] : memref<2x8x784xf32, #tpu.memory_space<vmem>>, vector<2x1x784xf32>
    %536 = vector.shape_cast %535 : vector<2x1x784xf32> to vector<2x784xf32>
    %c0_302 = arith.constant 0 : index
    %c5_303 = arith.constant 5 : index
    %c0_304 = arith.constant 0 : index
    %537 = vector.load %arg8[%c0_302, %c5_303, %c0_304] : memref<10x8x784xf32, #tpu.memory_space<vmem>>, vector<10x1x784xf32>
    %538 = vector.shape_cast %537 : vector<10x1x784xf32> to vector<10x784xf32>
    %cst_305 = arith.constant dense<0.000000e+00> : vector<2x10xf32>
    %539 = tpu.matmul %536, %538, %cst_305 {dimension_numbers = #tpu.dot_dimension_numbers<[1], [1], [0], [0], [0, 0, 1, 0], [], []>} : vector<2x784xf32>, vector<10x784xf32>, vector<2x10xf32> -> vector<2x10xf32>
    %540 = arith.addf %534, %539 : vector<2x10xf32>
    %c0_306 = arith.constant 0 : index
    %c6_307 = arith.constant 6 : index
    %c0_308 = arith.constant 0 : index
    %541 = vector.load %arg7[%c0_306, %c6_307, %c0_308] : memref<2x8x784xf32, #tpu.memory_space<vmem>>, vector<2x1x784xf32>
    %542 = vector.shape_cast %541 : vector<2x1x784xf32> to vector<2x784xf32>
    %c0_309 = arith.constant 0 : index
    %c6_310 = arith.constant 6 : index
    %c0_311 = arith.constant 0 : index
    %543 = vector.load %arg8[%c0_309, %c6_310, %c0_311] : memref<10x8x784xf32, #tpu.memory_space<vmem>>, vector<10x1x784xf32>
    %544 = vector.shape_cast %543 : vector<10x1x784xf32> to vector<10x784xf32>
    %cst_312 = arith.constant dense<0.000000e+00> : vector<2x10xf32>
    %545 = tpu.matmul %542, %544, %cst_312 {dimension_numbers = #tpu.dot_dimension_numbers<[1], [1], [0], [0], [0, 0, 1, 0], [], []>} : vector<2x784xf32>, vector<10x784xf32>, vector<2x10xf32> -> vector<2x10xf32>
    %546 = arith.addf %540, %545 : vector<2x10xf32>
    %c0_313 = arith.constant 0 : index
    %c7_314 = arith.constant 7 : index
    %c0_315 = arith.constant 0 : index
    %547 = vector.load %arg7[%c0_313, %c7_314, %c0_315] : memref<2x8x784xf32, #tpu.memory_space<vmem>>, vector<2x1x784xf32>
    %548 = vector.shape_cast %547 : vector<2x1x784xf32> to vector<2x784xf32>
    %c0_316 = arith.constant 0 : index
    %c7_317 = arith.constant 7 : index
    %c0_318 = arith.constant 0 : index
    %549 = vector.load %arg8[%c0_316, %c7_317, %c0_318] : memref<10x8x784xf32, #tpu.memory_space<vmem>>, vector<10x1x784xf32>
    %550 = vector.shape_cast %549 : vector<10x1x784xf32> to vector<10x784xf32>
    %cst_319 = arith.constant dense<0.000000e+00> : vector<2x10xf32>
    %551 = tpu.matmul %548, %550, %cst_319 {dimension_numbers = #tpu.dot_dimension_numbers<[1], [1], [0], [0], [0, 0, 1, 0], [], []>} : vector<2x784xf32>, vector<10x784xf32>, vector<2x10xf32> -> vector<2x10xf32>
    %552 = arith.addf %546, %551 : vector<2x10xf32>
    %c0_320 = arith.constant 0 : index
    %c0_321 = arith.constant 0 : index
    %553 = vector.load %arg4[%c0_320, %c0_321] : memref<1x10xf32, #tpu.memory_space<vmem>>, vector<1x10xf32>
    %554 = vector.broadcast %553 : vector<1x10xf32> to vector<2x10xf32>
    %555 = arith.addf %552, %554 : vector<2x10xf32>
    %c0_322 = arith.constant 0 : index
    %c0_323 = arith.constant 0 : index
    %556 = vector.load %arg6[%c0_322, %c0_323] : memref<2x10xf32, #tpu.memory_space<vmem>>, vector<2x10xf32>
    tpu.vector_store %arg6[%c0_322, %c0_323], %555 {strides = array<i32>} : memref<2x10xf32, #tpu.memory_space<vmem>>, vector<2x10xf32>,
    return
  }
  func.func @transform_0(%arg0: i32) -> (i32, i32, i32) {
    %c0_i32 = arith.constant 0 : i32
    %c0_i32_0 = arith.constant 0 : i32
    %c0_i32_1 = arith.constant 0 : i32
    %c0_i32_2 = arith.constant 0 : i32
    return %c0_i32, %c0_i32_0, %c0_i32_1 : i32, i32, i32
  }
  func.func @transform_1(%arg0: i32) -> i32 {
    %c0_i32 = arith.constant 0 : i32
    %c0_i32_0 = arith.constant 0 : i32
    return %c0_i32 : i32
  }
  func.func @transform_2(%arg0: i32) -> i32 {
    %c0_i32 = arith.constant 0 : i32
    %c0_i32_0 = arith.constant 0 : i32
    return %c0_i32 : i32
  }
  func.func @transform_3(%arg0: i32) -> (i32, i32) {
    %c0_i32 = arith.constant 0 : i32
    %c0_i32_0 = arith.constant 0 : i32
    %c0_i32_1 = arith.constant 0 : i32
    return %c0_i32, %c0_i32_0 : i32, i32
  }
  func.func @transform_5(%arg0: i32) -> (i32, i32) {
    %c0_i32 = arith.constant 0 : i32
    %c0_i32_0 = arith.constant 0 : i32
    %c0_i32_1 = arith.constant 0 : i32
    return %c0_i32, %c0_i32_0 : i32, i32
  }
}

</mosaic_0001>

<bundles_post_ra>
// kernel: tiny_cnn_forward.1
= control target key start
LH: loop header
LB: loop body
LE: loop exit
PB: predicated region body
PF: predicated region fallthrough
CT: control target
= control target key end

     0   :  { %10 = vsyncpa [#allocation7], 0  ;;  %s7915_s0 = inlined_call_operand.vmem [shape: f32[9,2,784], index: 0, kind: input, shape index: {}]   ;;  %s7916_s1 = inlined_call_operand.vmem [shape: f32[72], index: 1, kind: input, shape index: {}]   ;;  %s7917_s2 = inlined_call_operand.vmem [shape: f32[8], index: 2, kind: input, shape index: {}]   ;;  %s7918_s3 = inlined_call_operand.vmem [shape: f32[1,10], index: 3, kind: input, shape index: {}]   ;;  %s7919_s4 = inlined_call_operand.vmem [shape: f32[10,8,784], index: 4, kind: input, shape index: {}]   ;;  %s7920_s5 = inlined_call_operand.hbm [shape: f32[2,10], index: 5, kind: output, shape index: {}]  }
   0x1   :  { %11 = vsyncpa [#allocation9], 0 }
   0x2   :  { %12 = vsyncpa [#allocation6], 0  ;;  %s21_s20 = sshll.u32 %s7916_s1, 4  ;;  %s31_s23 = sshll.u32 %s7917_s2, 4  ;;  %s22_s20 = int_to_ptr.vmem [resolvable:$true] %s21_s20  ;;  %s32_s23 = int_to_ptr.vmem [resolvable:$true] %s31_s23 }
   0x3   :  { %s6325_s24 = scalar_lea.vmem %s22_s20, 16  ;;  %p6330_p1 = scmp.lt.s32.totalorder %s22_s20, %s22_s20 }
   0x4   :  { %p6326_p0 = scmp.ne.s32.totalorder %s22_s20, %s6325_s24  ;;  %p6331_p2 = scmp.lt.s32.totalorder %s6325_s24, %s6325_s24 }
   0x6   :  { %p6332_p3 = por %p6331_p2, %p6330_p1 }
   0x8   :  { %p6333_p4 = pnand %p6332_p3, %p6326_p0 }
   0xa   :  { %6336 = shalt.err (!%p6333_p4)
}
   0xb   :  { %s6379_s25 = smov [#allocation5]   ;;  %s6337_s26 = scalar_lea.vmem %s32_s23, 16 }
   0xc   :  { %24 = dma.vmem_to_smem %s22_s20, 16, %s6379_s25, [#allocation7]  }
   0xd   :  { %p6338_p5 = scmp.ne.s32.totalorder %s32_s23, %s6337_s26  ;;  %p6342_p6 = scmp.lt.s32.totalorder %s32_s23, %s32_s23 }
   0xe   :  { %p6343_p7 = scmp.lt.s32.totalorder %s6337_s26, %s6337_s26 }
  0x10   :  { %p6344_p8 = por %p6343_p7, %p6342_p6 }
  0x12   :  { %p6345_p9 = pnand %p6344_p8, %p6338_p5 }
  0x14   :  { %6348 = shalt.err (!%p6345_p9)
}
  0x15   :  { %s6380_s1 = smov [#allocation8]  }
  0x16   :  { %34 = dma.vmem_to_smem %s32_s23, 16, %s6380_s1, [#allocation9]  }
  0x17   :  { %6371 = dma.done.wait [#allocation7], 16  }
  0x18   :  { %6372 = vsyncadd [#allocation7], 4294967280 }
  0x19   :  { %6373 = dma.done.wait [#allocation9], 16  }
  0x1a   :  { %6374 = vsyncadd [#allocation9], 4294967280 }
  0x1b   :  { %43 = sfence }
  0x1c   :  { %v76_v0 = vld [vmem:[%s7919_s4] sm:$0xff]  ;;  %v78_v1 = vld [vmem:[%s7919_s4 + $0x8] sm:$0xff]  ;;  %v80_v2 = vld [vmem:[%s7919_s4 + $0x10] sm:$0xff] }
  0x1d   :  { %77 = vst [vmem:[#allocation3] sm:$0xff] %v76_v0  ;;  %79 = vst [vmem:[#allocation3 + $0x8] sm:$0xff] %v78_v1  ;;  %v82_v3 = vld [vmem:[%s7919_s4 + $0x18] sm:$0xff]  ;;  %v84_v4 = vld [vmem:[%s7919_s4 + $0x20] sm:$0xff] }
  0x1e   :  { %81 = vst [vmem:[#allocation3 + $0x10] sm:$0xff] %v80_v2  ;;  %v86_v5 = vld [vmem:[%s7919_s4 + $0x28] sm:$0xff]  ;;  %83 = vst [vmem:[#allocation3 + $0x18] sm:$0xff] %v82_v3  ;;  %v88_v6 = vld [vmem:[%s7919_s4 + $0x30] sm:$0xff] }
  0x1f   :  { %85 = vst [vmem:[#allocation3 + $0x20] sm:$0xff] %v84_v4  ;;  %87 = vst [vmem:[#allocation3 + $0x28] sm:$0xff] %v86_v5  ;;  %v90_v7 = vld [vmem:[%s7919_s4 + $0x38] sm:$0xff]  ;;  %v92_v8 = vld [vmem:[%s7919_s4 + $0x40] sm:$0xff] }
  0x20   :  { %89 = vst [vmem:[#allocation3 + $0x30] sm:$0xff] %v88_v6  ;;  %91 = vst [vmem:[#allocation3 + $0x38] sm:$0xff] %v90_v7  ;;  %v94_v9 = vld [vmem:[%s7919_s4 + $0x48] sm:$0xff]  ;;  %v96_v10 = vld [vmem:[%s7919_s4 + $0x50] sm:$0xff] }
  0x21   :  { %93 = vst [vmem:[#allocation3 + $0x40] sm:$0xff] %v92_v8  ;;  %v98_v11 = vld [vmem:[%s7919_s4 + $0x58] sm:$0xff]  ;;  %95 = vst [vmem:[#allocation3 + $0x48] sm:$0xff] %v94_v9  ;;  %v100_v12 = vld [vmem:[%s7919_s4 + $0x60] sm:$0xff] }
  0x22   :  { %97 = vst [vmem:[#allocation3 + $0x50] sm:$0xff] %v96_v10  ;;  %99 = vst [vmem:[#allocation3 + $0x58] sm:$0xff] %v98_v11  ;;  %v102_v13 = vld [vmem:[%s7919_s4 + $0x68] sm:$0xff]  ;;  %v104_v14 = vld [vmem:[%s7919_s4 + $0x70] sm:$0xff] }
  0x23   :  { %101 = vst [vmem:[#allocation3 + $0x60] sm:$0xff] %v100_v12  ;;  %103 = vst [vmem:[#allocation3 + $0x68] sm:$0xff] %v102_v13  ;;  %v106_v15 = vld [vmem:[%s7919_s4 + $0x78] sm:$0xff]  ;;  %v108_v16 = vld [vmem:[%s7919_s4 + $0x80] sm:$0xff] }
  0x24   :  { %105 = vst [vmem:[#allocation3 + $0x70] sm:$0xff] %v104_v14  ;;  %v110_v17 = vld [vmem:[%s7919_s4 + $0x88] sm:$0xff]  ;;  %107 = vst [vmem:[#allocation3 + $0x78] sm:$0xff] %v106_v15  ;;  %v112_v18 = vld [vmem:[%s7919_s4 + $0x90] sm:$0xff] }
  0x25   :  { %109 = vst [vmem:[#allocation3 + $0x80] sm:$0xff] %v108_v16  ;;  %111 = vst [vmem:[#allocation3 + $0x88] sm:$0xff] %v110_v17  ;;  %v114_v19 = vld [vmem:[%s7919_s4 + $0x98] sm:$0xff]  ;;  %v116_v20 = vld [vmem:[%s7919_s4 + $0xa0] sm:$0xff] }
  0x26   :  { %113 = vst [vmem:[#allocation3 + $0x90] sm:$0xff] %v112_v18  ;;  %115 = vst [vmem:[#allocation3 + $0x98] sm:$0xff] %v114_v19  ;;  %v118_v21 = vld [vmem:[%s7919_s4 + $0xa8] sm:$0xff]  ;;  %v120_v22 = vld [vmem:[%s7919_s4 + $0xb0] sm:$0xff] }
  0x27   :  { %117 = vst [vmem:[#allocation3 + $0xa0] sm:$0xff] %v116_v20  ;;  %v122_v23 = vld [vmem:[%s7919_s4 + $0xb8] sm:$0xff]  ;;  %119 = vst [vmem:[#allocation3 + $0xa8] sm:$0xff] %v118_v21  ;;  %v124_v24 = vld [vmem:[%s7919_s4 + $0xc0] sm:$0xff] }
  0x28   :  { %121 = vst [vmem:[#allocation3 + $0xb0] sm:$0xff] %v120_v22  ;;  %123 = vst [vmem:[#allocation3 + $0xb8] sm:$0xff] %v122_v23  ;;  %v126_v25 = vld [vmem:[%s7919_s4 + $0xc8] sm:$0xff]  ;;  %v128_v26 = vld [vmem:[%s7919_s4 + $0xd0] sm:$0xff] }
  0x29   :  { %125 = vst [vmem:[#allocation3 + $0xc0] sm:$0xff] %v124_v24  ;;  %127 = vst [vmem:[#allocation3 + $0xc8] sm:$0xff] %v126_v25  ;;  %v130_v27 = vld [vmem:[%s7919_s4 + $0xd8] sm:$0xff]  ;;  %v132_v28 = vld [vmem:[%s7919_s4 + $0xe0] sm:$0xff] }
  0x2a   :  { %129 = vst [vmem:[#allocation3 + $0xd0] sm:$0xff] %v128_v26  ;;  %v134_v29 = vld [vmem:[%s7919_s4 + $0xe8] sm:$0xff]  ;;  %131 = vst [vmem:[#allocation3 + $0xd8] sm:$0xff] %v130_v27  ;;  %v136_v30 = vld [vmem:[%s7919_s4 + $0xf0] sm:$0xff] }
  0x2b   :  { %133 = vst [vmem:[#allocation3 + $0xe0] sm:$0xff] %v132_v28  ;;  %135 = vst [vmem:[#allocation3 + $0xe8] sm:$0xff] %v134_v29  ;;  %v138_v31 = vld [vmem:[%s7919_s4 + $0xf8] sm:$0xff]  ;;  %v140_v32 = vld [vmem:[%s7919_s4 + $0x100] sm:$0xff] }
  0x2c   :  { %137 = vst [vmem:[#allocation3 + $0xf0] sm:$0xff] %v136_v30  ;;  %139 = vst [vmem:[#allocation3 + $0xf8] sm:$0xff] %v138_v31  ;;  %v142_v33 = vld [vmem:[%s7919_s4 + $0x108] sm:$0xff]  ;;  %v144_v34 = vld [vmem:[%s7919_s4 + $0x110] sm:$0xff] }
  0x2d   :  { %141 = vst [vmem:[#allocation3 + $0x100] sm:$0xff] %v140_v32  ;;  %v146_v35 = vld [vmem:[%s7919_s4 + $0x118] sm:$0xff]  ;;  %143 = vst [vmem:[#allocation3 + $0x108] sm:$0xff] %v142_v33  ;;  %v148_v36 = vld [vmem:[%s7919_s4 + $0x120] sm:$0xff] }
  0x2e   :  { %145 = vst [vmem:[#allocation3 + $0x110] sm:$0xff] %v144_v34  ;;  %147 = vst [vmem:[#allocation3 + $0x118] sm:$0xff] %v146_v35  ;;  %v150_v37 = vld [vmem:[%s7919_s4 + $0x128] sm:$0xff]  ;;  %v152_v38 = vld [vmem:[%s7919_s4 + $0x130] sm:$0xff] }
  0x2f   :  { %149 = vst [vmem:[#allocation3 + $0x120] sm:$0xff] %v148_v36  ;;  %151 = vst [vmem:[#allocation3 + $0x128] sm:$0xff] %v150_v37  ;;  %v154_v39 = vld [vmem:[%s7919_s4 + $0x138] sm:$0xff]  ;;  %v156_v40 = vld [vmem:[%s7919_s4 + $0x140] sm:$0xff] }
  0x30   :  { %153 = vst [vmem:[#allocation3 + $0x130] sm:$0xff] %v152_v38  ;;  %v158_v41 = vld [vmem:[%s7919_s4 + $0x148] sm:$0xff]  ;;  %155 = vst [vmem:[#allocation3 + $0x138] sm:$0xff] %v154_v39  ;;  %v160_v42 = vld [vmem:[%s7919_s4 + $0x150] sm:$0xff] }
  0x31   :  { %157 = vst [vmem:[#allocation3 + $0x140] sm:$0xff] %v156_v40  ;;  %159 = vst [vmem:[#allocation3 + $0x148] sm:$0xff] %v158_v41  ;;  %v162_v43 = vld [vmem:[%s7919_s4 + $0x158] sm:$0xff]  ;;  %v164_v44 = vld [vmem:[%s7919_s4 + $0x160] sm:$0xff] }
  0x32   :  { %161 = vst [vmem:[#allocation3 + $0x150] sm:$0xff] %v160_v42  ;;  %163 = vst [vmem:[#allocation3 + $0x158] sm:$0xff] %v162_v43  ;;  %v166_v45 = vld [vmem:[%s7919_s4 + $0x168] sm:$0xff]  ;;  %v168_v46 = vld [vmem:[%s7919_s4 + $0x170] sm:$0xff] }
  0x33   :  { %165 = vst [vmem:[#allocation3 + $0x160] sm:$0xff] %v164_v44  ;;  %v170_v47 = vld [vmem:[%s7919_s4 + $0x178] sm:$0xff]  ;;  %167 = vst [vmem:[#allocation3 + $0x168] sm:$0xff] %v166_v45  ;;  %v172_v48 = vld [vmem:[%s7919_s4 + $0x180] sm:$0xff] }
  0x34   :  { %169 = vst [vmem:[#allocation3 + $0x170] sm:$0xff] %v168_v46  ;;  %171 = vst [vmem:[#allocation3 + $0x178] sm:$0xff] %v170_v47  ;;  %v174_v49 = vld [vmem:[%s7919_s4 + $0x188] sm:$0xff]  ;;  %v176_v50 = vld [vmem:[%s7919_s4 + $0x190] sm:$0xff] }
  0x35   :  { %173 = vst [vmem:[#allocation3 + $0x180] sm:$0xff] %v172_v48  ;;  %175 = vst [vmem:[#allocation3 + $0x188] sm:$0xff] %v174_v49  ;;  %v178_v51 = vld [vmem:[%s7919_s4 + $0x198] sm:$0xff]  ;;  %v180_v52 = vld [vmem:[%s7919_s4 + $0x1a0] sm:$0xff] }
  0x36   :  { %177 = vst [vmem:[#allocation3 + $0x190] sm:$0xff] %v176_v50  ;;  %v182_v53 = vld [vmem:[%s7919_s4 + $0x1a8] sm:$0xff]  ;;  %179 = vst [vmem:[#allocation3 + $0x198] sm:$0xff] %v178_v51  ;;  %v184_v54 = vld [vmem:[%s7919_s4 + $0x1b0] sm:$0xff] }
  0x37   :  { %181 = vst [vmem:[#allocation3 + $0x1a0] sm:$0xff] %v180_v52  ;;  %183 = vst [vmem:[#allocation3 + $0x1a8] sm:$0xff] %v182_v53  ;;  %v186_v55 = vld [vmem:[%s7919_s4 + $0x1b8] sm:$0xff]  ;;  %v188_v56 = vld [vmem:[%s7919_s4 + $0x1c0] sm:$0xff] }
  0x38   :  { %185 = vst [vmem:[#allocation3 + $0x1b0] sm:$0xff] %v184_v54  ;;  %187 = vst [vmem:[#allocation3 + $0x1b8] sm:$0xff] %v186_v55  ;;  %v190_v57 = vld [vmem:[%s7919_s4 + $0x1c8] sm:$0xff]  ;;  %v192_v58 = vld [vmem:[%s7919_s4 + $0x1d0] sm:$0xff] }
  0x39   :  { %189 = vst [vmem:[#allocation3 + $0x1c0] sm:$0xff] %v188_v56  ;;  %v194_v59 = vld [vmem:[%s7919_s4 + $0x1d8] sm:$0xff]  ;;  %191 = vst [vmem:[#allocation3 + $0x1c8] sm:$0xff] %v190_v57  ;;  %v196_v60 = vld [vmem:[%s7919_s4 + $0x1e0] sm:$0xff] }
  0x3a   :  { %193 = vst [vmem:[#allocation3 + $0x1d0] sm:$0xff] %v192_v58  ;;  %195 = vst [vmem:[#allocation3 + $0x1d8] sm:$0xff] %v194_v59  ;;  %v198_v61 = vld [vmem:[%s7919_s4 + $0x1e8] sm:$0xff]  ;;  %v200_v62 = vld [vmem:[%s7919_s4 + $0x1f0] sm:$0xff] }
  0x3b   :  { %197 = vst [vmem:[#allocation3 + $0x1e0] sm:$0xff] %v196_v60  ;;  %199 = vst [vmem:[#allocation3 + $0x1e8] sm:$0xff] %v198_v61  ;;  %v202_v63 = vld [vmem:[%s7919_s4 + $0x1f8] sm:$0xff]  ;;  %v204_v0 = vld [vmem:[%s7919_s4 + $0x200] sm:$0xff] }
  0x3c   :  { %201 = vst [vmem:[#allocation3 + $0x1f0] sm:$0xff] %v200_v62  ;;  %v206_v1 = vld [vmem:[%s7919_s4 + $0x208] sm:$0xff]  ;;  %203 = vst [vmem:[#allocation3 + $0x1f8] sm:$0xff] %v202_v63  ;;  %v208_v2 = vld [vmem:[%s7919_s4 + $0x210] sm:$0xff] }
  0x3d   :  { %205 = vst [vmem:[#allocation3 + $0x200] sm:$0xff] %v204_v0  ;;  %207 = vst [vmem:[#allocation3 + $0x208] sm:$0xff] %v206_v1  ;;  %v210_v3 = vld [vmem:[%s7919_s4 + $0x218] sm:$0xff]  ;;  %v212_v4 = vld [vmem:[%s7919_s4 + $0x220] sm:$0xff] }
  0x3e   :  { %209 = vst [vmem:[#allocation3 + $0x210] sm:$0xff] %v208_v2  ;;  %211 = vst [vmem:[#allocation3 + $0x218] sm:$0xff] %v210_v3  ;;  %v214_v5 = vld [vmem:[%s7919_s4 + $0x228] sm:$0xff] }
  0x3f   :  { %213 = vst [vmem:[#allocation3 + $0x220] sm:$0xff] %v212_v4  ;;  %215 = vst [vmem:[#allocation3 + $0x228] sm:$0xff] %v214_v5 }
  0x40   :  { %223 = vsyncadd [#allocation4], 8960  ;;  %s226_s6 = sld [smem:[#allocation5]]  ;;  %s5880_s7 = sld [smem:[#allocation5 + $0x1]]  ;;  %v6637_v6 = vld [vmem:[%s7915_s0] sm:$0xff]  ;;  %v6652_v9 = vld [vmem:[%s7915_s0 + $0xe] sm:$0xff]  ;;  %v315_v14 = vlaneseq }
  0x41   :  { %s5883_s8 = sld [smem:[#allocation5 + $0x2]]  ;;  %s6632_s9 = sld [smem:[#allocation5 + $0x3]]  ;;  %v225_v7 = vld [vmem:[%s7915_s0 + $0x8] sm:$0x3f]  ;;  %v5879_v8 = vld [vmem:[%s7915_s0 + $0x16] sm:$0x3f] }
  0x42   :  { %s6639_s12 = sld [smem:[#allocation5 + $0x4]]  ;;  %s6647_s16 = sld [smem:[#allocation5 + $0x5]]  ;;  %v6657_v10 = vld [vmem:[%s7915_s0 + $0x1c] sm:$0xff]  ;;  %v5882_v11 = vld [vmem:[%s7915_s0 + $0x24] sm:$0x3f]  ;;  %v6667_v13 = vld [vmem:[%s7915_s0 + $0x2a] sm:$0xff] }
  0x43   :  { %s6662_s23 = sld [smem:[#allocation5 + $0x6]]  ;;  %s6669_s26 = sld [smem:[#allocation5 + $0x7]]  ;;  %v5885_v19 = vld [vmem:[%s7915_s0 + $0x32] sm:$0x3f]  ;;  %v6680_v20 = vld [vmem:[%s7915_s0 + $0x38] sm:$0xff]  ;;  %v6696_v28 = vld [vmem:[%s7915_s0 + $0x46] sm:$0xff] }
  0x44   :  { %s6671_s1 = sld [smem:[#allocation5 + $0x8]]  ;;  %v5888_v25 = vld [vmem:[%s7915_s0 + $0x40] sm:$0x3f]  ;;  %v6701_v29 = vld [vmem:[%s7915_s0 + $0x54] sm:$0xff]  ;;  %s6703_s15 = sld [smem:[#allocation5 + $0xa]]  ;;  %v316_v40 = vshrl.u32 %v315_v14, 7 }
  0x45   :  { %v5891_v34 = vld [vmem:[%s7915_s0 + $0x4e] sm:$0x3f]  ;;  %v5894_v35 = vld [vmem:[%s7915_s0 + $0x5c] sm:$0x3f]  ;;  %s6712_s18 = sld [smem:[#allocation5 + $0xb]]  ;;  %v6720_v39 = vld [vmem:[%s7915_s0 + $0x62] sm:$0xff] }
  0x46   :  { %v227_v12 = vstv %s226_s6  ;;  %v236_v17 = vstv %s5880_s7  ;;  %s6687_s7 = sld [smem:[#allocation8]]  ;;  %s6723_s21 = sld [smem:[#allocation5 + $0xc]]  ;;  %v5897_v45 = vld [vmem:[%s7915_s0 + $0x6a] sm:$0x3f]  ;;  %v6734_v46 = vld [vmem:[%s7915_s0 + $0x70] sm:$0xff]  ;;  %vm6791_vm0 = vcmp.lt.s32.totalorder %v315_v14, 784 }
  0x47   :  { %v228_v15 = vmul.f32 %v227_v12, %v6637_v6  ;;  %v229_v16 = vmul.f32 %v227_v12, %v225_v7  ;;  %v245_v18 = vstv %s5883_s8  ;;  %v237_v21 = vmul.f32 %v6652_v9, %v236_v17  ;;  %s6689_s8 = sld [smem:[#allocation5 + $0x9]]  ;;  %s6725_s22 = sld [smem:[#allocation5 + $0xd]]  ;;  %v5900_v47 = vld [vmem:[%s7915_s0 + $0x78] sm:$0x3f]  ;;  %v340_v56 = vld [vmem:[%s7915_s0 + $0x8] sm:$0x3f] }
  0x48   :  { %v238_v22 = vmul.f32 %v5879_v8, %v236_v17  ;;  %v246_v23 = vmul.f32 %v6657_v10, %v245_v18  ;;  %v247_v24 = vmul.f32 %v5882_v11, %v245_v18  ;;  %v254_v26 = vstv %s6632_s9  ;;  %v5904_v62 = vld [vmem:[%s7915_s0 + $0x16] sm:$0x3f]  ;;  %s6750_s30 = sld [smem:[#allocation5 + $0xe]]  ;;  %s6752_s6 = sld [smem:[#allocation5 + $0xf]]  ;;  %v5907_v8 = vld [vmem:[%s7915_s0 + $0x24] sm:$0x3f] }
  0x49   :  { %v263_v27 = vstv %s6639_s12  ;;  %v239_v30 = vadd.f32 %v237_v21, %v228_v15  ;;  %v255_v32 = vmul.f32 %v6667_v13, %v254_v26  ;;  %v256_v33 = vmul.f32 %v5885_v19, %v254_v26  ;;  %v5910_v17 = vld [vmem:[%s7915_s0 + $0x32] sm:$0x3f]  ;;  %s6782_s17 = sld [smem:[#allocation8 + $0x1]]  ;;  %v5922_v14 = vld [vmem:[%s7915_s0 + $0x6a] sm:$0x3f]  ;;  %s6811_s2 = sld [smem:[#allocation5 + $0x15]] }
  0x4a   :  { %v240_v31 = vadd.f32 %v238_v22, %v229_v16  ;;  %v264_v36 = vmul.f32 %v6680_v20, %v263_v27  ;;  %v272_v37 = vstv %s6647_s16  ;;  %v281_v38 = vstv %s6662_s23  ;;  %v5913_v22 = vld [vmem:[%s7915_s0 + $0x40] sm:$0x3f]  ;;  %s6813_s27 = sld [smem:[#allocation5 + $0x16]]  ;;  %s6879_s16 = sld [smem:[#allocation5 + $0x1f]] }
  0x4b   :  { %v248_v41 = vadd.f32 %v246_v23, %v239_v30  ;;  %v265_v43 = vmul.f32 %v5888_v25, %v263_v27  ;;  %v273_v44 = vmul.f32 %v6696_v28, %v272_v37  ;;  %v274_v48 = vmul.f32 %v5891_v34, %v272_v37  ;;  %v5916_v34 = vld [vmem:[%s7915_s0 + $0x4e] sm:$0x3f]  ;;  %s6877_s24 = sld [smem:[#allocation5 + $0x1e]]  ;;  %s6932_s4 = sld [smem:[#allocation5 + $0x24]] }
  0x4c   :  { %v249_v42 = vadd.f32 %v247_v24, %v240_v31  ;;  %v282_v49 = vmul.f32 %v6701_v29, %v281_v38  ;;  %v290_v50 = vstv %s6669_s26  ;;  %v299_v51 = vstv %s6671_s1  ;;  %s6897_s26 = sld [smem:[#allocation5 + $0x20]]  ;;  %s6899_s1 = sld [smem:[#allocation5 + $0x21]] }
  0x4d   :  { %v257_v52 = vadd.f32 %v255_v32, %v248_v41  ;;  %v283_v54 = vmul.f32 %v5894_v35, %v281_v38  ;;  %v291_v55 = vmul.f32 %v6720_v39, %v290_v50  ;;  %v292_v57 = vmul.f32 %v5897_v45, %v290_v50  ;;  %s6983_s10 = sld [smem:[#allocation5 + $0x2b]]  ;;  %s6985_s11 = sld [smem:[#allocation5 + $0x2c]] }
  0x4e   :  { %v258_v53 = vadd.f32 %v256_v33, %v249_v42  ;;  %v300_v58 = vmul.f32 %v6734_v46, %v299_v51  ;;  %v301_v59 = vmul.f32 %v5900_v47, %v299_v51  ;;  %v6381_v60 = vmov 1966171168   ;;  %s7011_s9 = sld [smem:[#allocation8 + $0x4]]  ;;  %s7013_s12 = sld [smem:[#allocation5 + $0x2d]] }
  0x4f   :  { %v313_v61 = vunpack.c.l.s4 %v6381_v60  ;;  %v266_v63 = vadd.f32 %v264_v36, %v257_v52  ;;  %v305_v1 = vstv %s6687_s7  ;;  %v342_v2 = vstv %s6689_s8  ;;  %s6765_s7 = sld [smem:[#allocation5 + $0x10]]  ;;  %s6767_s8 = sld [smem:[#allocation5 + $0x11]] }
  0x50   :  { %v267_v0 = vadd.f32 %v265_v43, %v258_v53  ;;  %v343_v4 = vmul.f32 %v342_v2, %v6637_v6  ;;  %v344_v5 = vmul.f32 %v342_v2, %v340_v56  ;;  %v350_v7 = vstv %s6703_s15  ;;  %s6930_s15 = sld [smem:[#allocation8 + $0x3]] }
  0x51   :  { %v314_v3 = vunpack.c.0.s8 %v313_v61  ;;  %v275_v11 = vadd.f32 %v273_v44, %v266_v63  ;;  %v351_v15 = vmul.f32 %v6652_v9, %v350_v7  ;;  %v352_v16 = vmul.f32 %v5904_v62, %v350_v7 }
  0x52   :  { %v276_v12 = vadd.f32 %v274_v48, %v267_v0  ;;  %v358_v19 = vstv %s6712_s18  ;;  %v366_v21 = vstv %s6723_s21  ;;  %v374_v23 = vstv %s6725_s22  ;;  %s6784_s18 = sld [smem:[#allocation5 + $0x12]]  ;;  %s6797_s21 = sld [smem:[#allocation5 + $0x13]]  ;;  %v444_v0 = vld [vmem:[%s7915_s0 + $0x8] sm:$0x3f] }
  0x53   :  { %v6769_v18 = vsub.s32 %v314_v3, %v316_v40  ;;  %v284_v24 = vadd.f32 %v282_v49, %v275_v11  ;;  %v353_v26 = vadd.f32 %v351_v15, %v343_v4  ;;  %v354_v27 = vadd.f32 %v352_v16, %v344_v5  ;;  %v5919_v40 = vld [vmem:[%s7915_s0 + $0x5c] sm:$0x3f]  ;;  %s6799_s22 = sld [smem:[#allocation5 + $0x14]] }
  0x54   :  { %v285_v25 = vadd.f32 %v283_v54, %v276_v12  ;;  %v359_v30 = vmul.f32 %v6657_v10, %v358_v19  ;;  %v360_v31 = vmul.f32 %v5907_v8, %v358_v19  ;;  %v367_v32 = vmul.f32 %v6667_v13, %v366_v21  ;;  %v5930_v12 = vld [vmem:[%s7915_s0 + $0x16] sm:$0x3f] }
  0x55   :  { %v368_v33 = vmul.f32 %v5910_v17, %v366_v21  ;;  %v293_v35 = vadd.f32 %v291_v55, %v284_v24  ;;  %v375_v37 = vmul.f32 %v6680_v20, %v374_v23  ;;  %v376_v38 = vmul.f32 %v5913_v22, %v374_v23  ;;  %v5925_v55 = vld [vmem:[%s7915_s0 + $0x78] sm:$0x3f]  ;;  %v5933_v21 = vld [vmem:[%s7915_s0 + $0x24] sm:$0x3f] }
  0x56   :  { %v294_v36 = vadd.f32 %v292_v57, %v285_v25  ;;  %v361_v42 = vadd.f32 %v359_v30, %v353_v26  ;;  %v362_v43 = vadd.f32 %v360_v31, %v354_v27  ;;  %v382_v44 = vstv %s6750_s30  ;;  %s6825_s30 = sld [smem:[#allocation5 + $0x17]] }
  0x57   :  { %v390_v45 = vstv %s6752_s6  ;;  %v302_v47 = vadd.f32 %v300_v58, %v293_v35  ;;  %v383_v49 = vmul.f32 %v6696_v28, %v382_v44  ;;  %v384_v50 = vmul.f32 %v5916_v34, %v382_v44  ;;  %s6827_s6 = sld [smem:[#allocation5 + $0x18]] }
  0x58   :  { %v303_v48 = vadd.f32 %v301_v59, %v294_v36  ;;  %v369_v51 = vadd.f32 %v367_v32, %v361_v42  ;;  %v370_v52 = vadd.f32 %v368_v33, %v362_v43  ;;  %v391_v53 = vmul.f32 %v6701_v29, %v390_v45  ;;  %v5936_v32 = vld [vmem:[%s7915_s0 + $0x32] sm:$0x3f] }
  0x59   :  { %v392_v54 = vmul.f32 %v5919_v40, %v390_v45  ;;  %v306_v56 = vadd.f32 %v305_v1, %v302_v47  ;;  %v398_v58 = vstv %s6765_s7  ;;  %v406_v59 = vstv %s6767_s8  ;;  %s6841_s7 = sld [smem:[#allocation5 + $0x19]]  ;;  %s6843_s8 = sld [smem:[#allocation5 + $0x1a]] }
  0x5a   :  { %v307_v57 = vadd.f32 %v305_v1, %v303_v48  ;;  %v377_v60 = vadd.f32 %v375_v37, %v369_v51  ;;  %v378_v61 = vadd.f32 %v376_v38, %v370_v52  ;;  %v399_v62 = vmul.f32 %v6720_v39, %v398_v58  ;;  %v5939_v37 = vld [vmem:[%s7915_s0 + $0x40] sm:$0x3f] }
  0x5b   :  { %v400_v63 = vmul.f32 %v5922_v14, %v398_v58  ;;  %v308_v2 = vmax.f32 %v306_v56, 0.0  ;;  %v407_v1 = vmul.f32 %v6734_v46, %v406_v59  ;;  %v408_v4 = vmul.f32 %v5925_v55, %v406_v59 }
  0x5c   :  { %v309_v3 = vmax.f32 %v307_v57, 0.0  ;;  %v385_v5 = vadd.f32 %v383_v49, %v377_v60  ;;  %v386_v7 = vadd.f32 %v384_v50, %v378_v61  ;;  %v412_v8 = vstv %s6782_s17  ;;  %v5942_v49 = vld [vmem:[%s7915_s0 + $0x4e] sm:$0x3f]  ;;  %s6863_s17 = sld [smem:[#allocation8 + $0x2]] }
  0x5d   :  { %v446_v11 = vstv %s6784_s18  ;;  %v318_v15 = vrot.slane %v308_v2, %v6769_v18  ;;  %v454_v24 = vstv %s6797_s21  ;;  %v462_v25 = vstv %s6799_s22  ;;  %s6865_s18 = sld [smem:[#allocation5 + $0x1b]]  ;;  %s6871_s21 = sld [smem:[#allocation5 + $0x1c]] }
  0x5e   :  { %v325_v16 = vrot.slane %v309_v3, %v6769_v18  ;;  %v447_v17 = vmul.f32 %v446_v11, %v6637_v6  ;;  %v448_v19 = vmul.f32 %v446_v11, %v444_v0  ;;  %v393_v22 = vadd.f32 %v391_v53, %v385_v5  ;;  %v5945_v53 = vld [vmem:[%s7915_s0 + $0x5c] sm:$0x3f]  ;;  %s6873_s22 = sld [smem:[#allocation5 + $0x1d]] }
  0x5f   :  { %v394_v23 = vadd.f32 %v392_v54, %v386_v7  ;;  %v455_v30 = vmul.f32 %v6652_v9, %v454_v24  ;;  %v456_v31 = vmul.f32 %v5930_v12, %v454_v24  ;;  %v463_v35 = vmul.f32 %v6657_v10, %v462_v25 }
  0x60   :  { %v326_v26 = vcombine.low %v318_v15, %v325_v16  ;;  %v327_v27 = vcombine.high %v318_v15, %v325_v16  ;;  %v401_v33 = vadd.f32 %v399_v62, %v393_v22  ;;  %v464_v36 = vmul.f32 %v5933_v21, %v462_v25  ;;  %v5948_v62 = vld [vmem:[%s7915_s0 + $0x6a] sm:$0x3f] }
  0x61   :  { %v402_v34 = vadd.f32 %v400_v63, %v394_v23  ;;  %v457_v38 = vadd.f32 %v455_v30, %v447_v17  ;;  %v458_v40 = vadd.f32 %v456_v31, %v448_v19  ;;  %v470_v42 = vstv %s6811_s2  ;;  %v548_v17 = vld [vmem:[%s7915_s0 + $0x8] sm:$0x3f]  ;;  %v5956_v30 = vld [vmem:[%s7915_s0 + $0x16] sm:$0x3f]  ;;  %s7039_s2 = sld [smem:[#allocation5 + $0x30]] }
  0x62   :  { %334 = vst.msk [vmem:[#allocation2] ss:$8 sm:$0xf] %vm6791_vm0, %v326_v26  ;;  %335 = vst.msk [vmem:[#allocation2] ss:$8 sm:$0x70] %vm6791_vm0, %v326_v26  ;;  %v478_v43 = vstv %s6813_s27  ;;  %v409_v44 = vadd.f32 %v407_v1, %v401_v33  ;;  %v471_v47 = vmul.f32 %v6667_v13, %v470_v42  ;;  %v472_v48 = vmul.f32 %v5936_v32, %v470_v42 }
  0x63   :  { %337 = vst.msk [vmem:[#allocation2 + $0x38] ss:$8 sm:$0xf] %vm6791_vm0, %v327_v27  ;;  %338 = vst.msk [vmem:[#allocation2 + $0x38] ss:$8 sm:$0x70] %vm6791_vm0, %v327_v27  ;;  %v410_v45 = vadd.f32 %v408_v4, %v402_v34  ;;  %v465_v50 = vadd.f32 %v463_v35, %v457_v38  ;;  %v466_v14 = vadd.f32 %v464_v36, %v458_v40  ;;  %v486_v56 = vstv %s6825_s30 }
  0x64   :  { %v479_v51 = vmul.f32 %v6680_v20, %v478_v43  ;;  %v480_v52 = vmul.f32 %v5939_v37, %v478_v43  ;;  %v413_v54 = vadd.f32 %v412_v8, %v409_v44  ;;  %v494_v57 = vstv %s6827_s6  ;;  %v5951_v1 = vld [vmem:[%s7915_s0 + $0x78] sm:$0x3f]  ;;  %v5959_v31 = vld [vmem:[%s7915_s0 + $0x24] sm:$0x3f]  ;;  %v5962_v36 = vld [vmem:[%s7915_s0 + $0x32] sm:$0x3f] }
  0x65   :  { %v414_v55 = vadd.f32 %v412_v8, %v410_v45  ;;  %v473_v58 = vadd.f32 %v471_v47, %v465_v50  ;;  %v474_v59 = vadd.f32 %v472_v48, %v466_v14  ;;  %v487_v60 = vmul.f32 %v6696_v28, %v486_v56  ;;  %v5965_v48 = vld [vmem:[%s7915_s0 + $0x40] sm:$0x3f]  ;;  %s7041_s27 = sld [smem:[#allocation5 + $0x31]] }
  0x66   :  { %v488_v61 = vmul.f32 %v5942_v49, %v486_v56  ;;  %v415_v63 = vmax.f32 %v413_v54, 0.0  ;;  %v495_v2 = vmul.f32 %v6701_v29, %v494_v57  ;;  %v496_v3 = vmul.f32 %v5945_v53, %v494_v57  ;;  %v5968_v56 = vld [vmem:[%s7915_s0 + $0x4e] sm:$0x3f]  ;;  %v5971_v57 = vld [vmem:[%s7915_s0 + $0x5c] sm:$0x3f] }
  0x67   :  { %v416_v0 = vmax.f32 %v414_v55, 0.0  ;;  %v481_v4 = vadd.f32 %v479_v51, %v473_v58  ;;  %v482_v5 = vadd.f32 %v480_v52, %v474_v59  ;;  %v502_v7 = vstv %s6841_s7  ;;  %s6914_s7 = sld [smem:[#allocation5 + $0x22]] }
  0x68   :  { %v510_v8 = vstv %s6843_s8  ;;  %v425_v11 = vrot.slane %v415_v63, %v6769_v18  ;;  %v503_v15 = vmul.f32 %v6720_v39, %v502_v7  ;;  %v504_v16 = vmul.f32 %v5948_v62, %v502_v7  ;;  %s6916_s8 = sld [smem:[#allocation5 + $0x23]] }
  0x69   :  { %v432_v12 = vrot.slane %v416_v0, %v6769_v18  ;;  %v489_v19 = vadd.f32 %v487_v60, %v481_v4  ;;  %v490_v21 = vadd.f32 %v488_v61, %v482_v5  ;;  %v511_v22 = vmul.f32 %v6734_v46, %v510_v8 }
  0x6a   :  { %v512_v23 = vmul.f32 %v5951_v1, %v510_v8  ;;  %v516_v26 = vstv %s6863_s17  ;;  %v550_v27 = vstv %s6865_s18  ;;  %v558_v37 = vstv %s6871_s21  ;;  %s6949_s21 = sld [smem:[#allocation5 + $0x25]]  ;;  %s7017_s17 = sld [smem:[#allocation5 + $0x2e]] }
  0x6b   :  { %v433_v24 = vcombine.low %v425_v11, %v432_v12  ;;  %v434_v25 = vcombine.high %v425_v11, %v432_v12  ;;  %v497_v32 = vadd.f32 %v495_v2, %v489_v19  ;;  %v498_v33 = vadd.f32 %v496_v3, %v490_v21  ;;  %s7019_s18 = sld [smem:[#allocation5 + $0x2f]] }
  0x6c   :  { %v551_v34 = vmul.f32 %v550_v27, %v6637_v6  ;;  %v552_v35 = vmul.f32 %v550_v27, %v548_v17  ;;  %v566_v38 = vstv %s6873_s22  ;;  %v574_v40 = vstv %s6877_s24  ;;  %s6951_s22 = sld [smem:[#allocation5 + $0x26]]  ;;  %s6955_s24 = sld [smem:[#allocation5 + $0x27]]  ;;  %v652_v27 = vld [vmem:[%s7915_s0 + $0x8] sm:$0x3f] }
  0x6d   :  { %438 = vst.msk [vmem:[#allocation2 + $0x1] ss:$8 sm:$0xf] %vm6791_vm0, %v433_v24  ;;  %439 = vst.msk [vmem:[#allocation2 + $0x1] ss:$8 sm:$0x70] %vm6791_vm0, %v433_v24  ;;  %v582_v42 = vstv %s6879_s16  ;;  %v505_v43 = vadd.f32 %v503_v15, %v497_v32  ;;  %v506_v44 = vadd.f32 %v504_v16, %v498_v33  ;;  %v559_v45 = vmul.f32 %v6652_v9, %v558_v37 }
  0x6e   :  { %441 = vst.msk [vmem:[#allocation2 + $0x39] ss:$8 sm:$0xf] %vm6791_vm0, %v434_v25  ;;  %442 = vst.msk [vmem:[#allocation2 + $0x39] ss:$8 sm:$0x70] %vm6791_vm0, %v434_v25  ;;  %v560_v47 = vmul.f32 %v5956_v30, %v558_v37  ;;  %v567_v49 = vmul.f32 %v6657_v10, %v566_v38  ;;  %v568_v50 = vmul.f32 %v5959_v31, %v566_v38  ;;  %v590_v60 = vstv %s6897_s26 }
  0x6f   :  { %v575_v14 = vmul.f32 %v6667_v13, %v574_v40  ;;  %v576_v51 = vmul.f32 %v5962_v36, %v574_v40  ;;  %v513_v52 = vadd.f32 %v511_v22, %v505_v43  ;;  %v514_v53 = vadd.f32 %v512_v23, %v506_v44  ;;  %s6957_s16 = sld [smem:[#allocation5 + $0x28]]  ;;  %v5974_v15 = vld [vmem:[%s7915_s0 + $0x6a] sm:$0x3f]  ;;  %v5977_v16 = vld [vmem:[%s7915_s0 + $0x78] sm:$0x3f]  ;;  %s6974_s26 = sld [smem:[#allocation5 + $0x29]] }
  0x70   :  { %v561_v54 = vadd.f32 %v559_v45, %v551_v34  ;;  %v562_v55 = vadd.f32 %v560_v47, %v552_v35  ;;  %v583_v58 = vmul.f32 %v6680_v20, %v582_v42  ;;  %v584_v59 = vmul.f32 %v5965_v48, %v582_v42  ;;  %v5982_v34 = vld [vmem:[%s7915_s0 + $0x16] sm:$0x3f]  ;;  %v5985_v40 = vld [vmem:[%s7915_s0 + $0x24] sm:$0x3f] }
  0x71   :  { %v598_v61 = vstv %s6899_s1  ;;  %v517_v62 = vadd.f32 %v516_v26, %v513_v52  ;;  %v518_v63 = vadd.f32 %v516_v26, %v514_v53  ;;  %v591_v3 = vmul.f32 %v6696_v28, %v590_v60  ;;  %s6976_s1 = sld [smem:[#allocation5 + $0x2a]] }
  0x72   :  { %v569_v0 = vadd.f32 %v567_v49, %v561_v54  ;;  %v570_v2 = vadd.f32 %v568_v50, %v562_v55  ;;  %v592_v1 = vmul.f32 %v5968_v56, %v590_v60  ;;  %v599_v4 = vmul.f32 %v6701_v29, %v598_v61 }
  0x73   :  { %v600_v5 = vmul.f32 %v5971_v57, %v598_v61  ;;  %v519_v7 = vmax.f32 %v517_v62, 0.0  ;;  %v520_v8 = vmax.f32 %v518_v63, 0.0  ;;  %v606_v17 = vstv %s6914_s7  ;;  %s7069_s7 = sld [smem:[#allocation5 + $0x34]] }
  0x74   :  { %v577_v11 = vadd.f32 %v575_v14, %v569_v0  ;;  %v578_v12 = vadd.f32 %v576_v51, %v570_v2  ;;  %v614_v19 = vstv %s6916_s8  ;;  %v620_v21 = vstv %s6930_s15  ;;  %v5988_v14 = vld [vmem:[%s7915_s0 + $0x32] sm:$0x3f]  ;;  %v5991_v51 = vld [vmem:[%s7915_s0 + $0x40] sm:$0x3f]  ;;  %s7071_s8 = sld [smem:[#allocation5 + $0x35]]  ;;  %s7158_s15 = sld [smem:[#allocation8 + $0x6]] }
  0x75   :  { %v654_v22 = vstv %s6932_s4  ;;  %v529_v23 = vrot.slane %v519_v7, %v6769_v18  ;;  %v536_v24 = vrot.slane %v520_v8, %v6769_v18  ;;  %v607_v30 = vmul.f32 %v6720_v39, %v606_v17  ;;  %s7160_s4 = sld [smem:[#allocation5 + $0x3f]] }
  0x76   :  { %v585_v25 = vadd.f32 %v583_v58, %v577_v11  ;;  %v586_v26 = vadd.f32 %v584_v59, %v578_v12  ;;  %v608_v31 = vmul.f32 %v5974_v15, %v606_v17  ;;  %v615_v32 = vmul.f32 %v6734_v46, %v614_v19 }
  0x77   :  { %v616_v33 = vmul.f32 %v5977_v16, %v614_v19  ;;  %v537_v35 = vcombine.low %v529_v23, %v536_v24  ;;  %v538_v36 = vcombine.high %v529_v23, %v536_v24  ;;  %v655_v42 = vmul.f32 %v654_v22, %v6637_v6  ;;  %v6003_v23 = vld [vmem:[%s7915_s0 + $0x78] sm:$0x3f] }
  0x78   :  { %v593_v37 = vadd.f32 %v591_v3, %v585_v25  ;;  %v594_v38 = vadd.f32 %v592_v1, %v586_v26  ;;  %v656_v43 = vmul.f32 %v654_v22, %v652_v27  ;;  %v662_v44 = vstv %s6949_s21  ;;  %v6000_v22 = vld [vmem:[%s7915_s0 + $0x6a] sm:$0x3f]  ;;  %s7099_s21 = sld [smem:[#allocation5 + $0x37]] }
  0x79   :  { %v670_v45 = vstv %s6951_s22  ;;  %542 = vst.msk [vmem:[#allocation2 + $0x2] ss:$8 sm:$0xf] %vm6791_vm0, %v537_v35  ;;  %543 = vst.msk [vmem:[#allocation2 + $0x2] ss:$8 sm:$0x70] %vm6791_vm0, %v537_v35  ;;  %v663_v49 = vmul.f32 %v6652_v9, %v662_v44  ;;  %v664_v50 = vmul.f32 %v5982_v34, %v662_v44  ;;  %v678_v54 = vstv %s6955_s24 }
  0x7a   :  { %545 = vst.msk [vmem:[#allocation2 + $0x3a] ss:$8 sm:$0xf] %vm6791_vm0, %v538_v36  ;;  %546 = vst.msk [vmem:[#allocation2 + $0x3a] ss:$8 sm:$0x70] %vm6791_vm0, %v538_v36  ;;  %v601_v47 = vadd.f32 %v599_v4, %v593_v37  ;;  %v602_v48 = vadd.f32 %v600_v5, %v594_v38  ;;  %v671_v52 = vmul.f32 %v6657_v10, %v670_v45  ;;  %v686_v55 = vstv %s6957_s16 }
  0x7b   :  { %v672_v53 = vmul.f32 %v5985_v40, %v670_v45  ;;  %v665_v58 = vadd.f32 %v663_v49, %v655_v42  ;;  %v666_v59 = vadd.f32 %v664_v50, %v656_v43  ;;  %v679_v60 = vmul.f32 %v6667_v13, %v678_v54  ;;  %v5994_v4 = vld [vmem:[%s7915_s0 + $0x4e] sm:$0x3f]  ;;  %v5997_v5 = vld [vmem:[%s7915_s0 + $0x5c] sm:$0x3f]  ;;  %v756_v37 = vld [vmem:[%s7915_s0 + $0x8] sm:$0x3f] }
  0x7c   :  { %v609_v56 = vadd.f32 %v607_v30, %v601_v47  ;;  %v610_v57 = vadd.f32 %v608_v31, %v602_v48  ;;  %v680_v61 = vmul.f32 %v5988_v14, %v678_v54  ;;  %v687_v62 = vmul.f32 %v6680_v20, %v686_v55  ;;  %v6008_v38 = vld [vmem:[%s7915_s0 + $0x16] sm:$0x3f]  ;;  %v6011_v45 = vld [vmem:[%s7915_s0 + $0x24] sm:$0x3f]  ;;  %s7101_s22 = sld [smem:[#allocation5 + $0x38]]  ;;  %s7105_s24 = sld [smem:[#allocation5 + $0x39]] }
  0x7d   :  { %v688_v63 = vmul.f32 %v5991_v51, %v686_v55  ;;  %v673_v3 = vadd.f32 %v671_v52, %v665_v58  ;;  %v674_v1 = vadd.f32 %v672_v53, %v666_v59  ;;  %v694_v7 = vstv %s6974_s26  ;;  %v6014_v58 = vld [vmem:[%s7915_s0 + $0x32] sm:$0x3f]  ;;  %s7107_s16 = sld [smem:[#allocation5 + $0x3a]]  ;;  %s7125_s26 = sld [smem:[#allocation5 + $0x3b]] }
  0x7e   :  { %v617_v0 = vadd.f32 %v615_v32, %v609_v56  ;;  %v618_v2 = vadd.f32 %v616_v33, %v610_v57  ;;  %v702_v8 = vstv %s6976_s1  ;;  %v710_v11 = vstv %s6983_s10  ;;  %s7056_s10 = sld [smem:[#allocation5 + $0x32]]  ;;  %s7127_s1 = sld [smem:[#allocation5 + $0x3c]] }
  0x7f   :  { %v718_v12 = vstv %s6985_s11  ;;  %v681_v17 = vadd.f32 %v679_v60, %v673_v3  ;;  %v682_v19 = vadd.f32 %v680_v61, %v674_v1  ;;  %v695_v24 = vmul.f32 %v6696_v28, %v694_v7  ;;  %s7058_s11 = sld [smem:[#allocation5 + $0x33]] }
  0x80   :  { %v621_v15 = vadd.f32 %v620_v21, %v617_v0  ;;  %v622_v16 = vadd.f32 %v620_v21, %v618_v2  ;;  %v696_v25 = vmul.f32 %v5994_v4, %v694_v7  ;;  %v703_v26 = vmul.f32 %v6701_v29, %v702_v8 }
  0x81   :  { %v704_v27 = vmul.f32 %v5997_v5, %v702_v8  ;;  %v689_v31 = vadd.f32 %v687_v62, %v681_v17  ;;  %v690_v32 = vadd.f32 %v688_v63, %v682_v19  ;;  %v711_v33 = vmul.f32 %v6720_v39, %v710_v11  ;;  %v6017_v63 = vld [vmem:[%s7915_s0 + $0x40] sm:$0x3f] }
  0x82   :  { %v623_v21 = vmax.f32 %v621_v15, 0.0  ;;  %v624_v30 = vmax.f32 %v622_v16, 0.0  ;;  %v712_v34 = vmul.f32 %v6000_v22, %v710_v11  ;;  %v719_v35 = vmul.f32 %v6734_v46, %v718_v12  ;;  %v6020_v11 = vld [vmem:[%s7915_s0 + $0x4e] sm:$0x3f]  ;;  %v6023_v19 = vld [vmem:[%s7915_s0 + $0x5c] sm:$0x3f] }
  0x83   :  { %v720_v36 = vmul.f32 %v6003_v23, %v718_v12  ;;  %v697_v43 = vadd.f32 %v695_v24, %v689_v31  ;;  %v698_v44 = vadd.f32 %v696_v25, %v690_v32  ;;  %v724_v47 = vstv %s7011_s9  ;;  %v6026_v31 = vld [vmem:[%s7915_s0 + $0x6a] sm:$0x3f] }
  0x84   :  { %v633_v40 = vrot.slane %v623_v21, %v6769_v18  ;;  %v640_v42 = vrot.slane %v624_v30, %v6769_v18  ;;  %v758_v48 = vstv %s7013_s12  ;;  %v766_v49 = vstv %s7017_s17  ;;  %s7091_s17 = sld [smem:[#allocation8 + $0x5]] }
  0x85   :  { %v774_v50 = vstv %s7019_s18  ;;  %v705_v52 = vadd.f32 %v703_v26, %v697_v43  ;;  %v706_v53 = vadd.f32 %v704_v27, %v698_v44  ;;  %v759_v54 = vmul.f32 %v758_v48, %v6637_v6  ;;  %s7093_s18 = sld [smem:[#allocation5 + $0x36]] }
  0x86   :  { %v641_v14 = vcombine.low %v633_v40, %v640_v42  ;;  %v642_v51 = vcombine.high %v633_v40, %v640_v42  ;;  %v760_v55 = vmul.f32 %v758_v48, %v756_v37  ;;  %v767_v56 = vmul.f32 %v6652_v9, %v766_v49  ;;  %v860_v48 = vld [vmem:[%s7915_s0 + $0x8] sm:$0x3f] }
  0x87   :  { %v768_v57 = vmul.f32 %v6008_v38, %v766_v49  ;;  %v713_v59 = vadd.f32 %v711_v33, %v705_v52  ;;  %v714_v60 = vadd.f32 %v712_v34, %v706_v53  ;;  %v775_v61 = vmul.f32 %v6657_v10, %v774_v50 }
  0x88   :  { %646 = vst.msk [vmem:[#allocation2 + $0x3] ss:$8 sm:$0xf] %vm6791_vm0, %v641_v14  ;;  %647 = vst.msk [vmem:[#allocation2 + $0x3] ss:$8 sm:$0x70] %vm6791_vm0, %v641_v14  ;;  %v776_v62 = vmul.f32 %v6011_v45, %v774_v50  ;;  %v769_v0 = vadd.f32 %v767_v56, %v759_v54  ;;  %v782_v3 = vstv %s7039_s2  ;;  %v790_v1 = vstv %s7041_s27 }
  0x89   :  { %649 = vst.msk [vmem:[#allocation2 + $0x3b] ss:$8 sm:$0xf] %vm6791_vm0, %v642_v51  ;;  %650 = vst.msk [vmem:[#allocation2 + $0x3b] ss:$8 sm:$0x70] %vm6791_vm0, %v642_v51  ;;  %v770_v2 = vadd.f32 %v768_v57, %v760_v55  ;;  %v721_v4 = vadd.f32 %v719_v35, %v713_v59  ;;  %v722_v5 = vadd.f32 %v720_v36, %v714_v60  ;;  %v798_v24 = vstv %s7056_s10 }
  0x8a   :  { %v783_v7 = vmul.f32 %v6667_v13, %v782_v3  ;;  %v784_v8 = vmul.f32 %v6014_v58, %v782_v3  ;;  %v777_v12 = vadd.f32 %v775_v61, %v769_v0  ;;  %v791_v16 = vmul.f32 %v6680_v20, %v790_v1  ;;  %v6029_v36 = vld [vmem:[%s7915_s0 + $0x78] sm:$0x3f]  ;;  %v6037_v57 = vld [vmem:[%s7915_s0 + $0x24] sm:$0x3f]  ;;  %s7208_s10 = sld [smem:[#allocation5 + $0x44]] }
  0x8b   :  { %v778_v15 = vadd.f32 %v776_v62, %v770_v2  ;;  %v792_v17 = vmul.f32 %v6017_v63, %v790_v1  ;;  %v725_v22 = vadd.f32 %v724_v47, %v721_v4  ;;  %v726_v23 = vadd.f32 %v724_v47, %v722_v5  ;;  %v6034_v56 = vld [vmem:[%s7915_s0 + $0x16] sm:$0x3f] }
  0x8c   :  { %v806_v25 = vstv %s7058_s11  ;;  %v785_v26 = vadd.f32 %v783_v7, %v777_v12  ;;  %v799_v21 = vmul.f32 %v6696_v28, %v798_v24  ;;  %v800_v30 = vmul.f32 %v6020_v11, %v798_v24  ;;  %v6040_v62 = vld [vmem:[%s7915_s0 + $0x32] sm:$0x3f]  ;;  %v6043_v7 = vld [vmem:[%s7915_s0 + $0x40] sm:$0x3f]  ;;  %s7210_s11 = sld [smem:[#allocation5 + $0x45]] }
  0x8d   :  { %v786_v27 = vadd.f32 %v784_v8, %v778_v15  ;;  %v727_v32 = vmax.f32 %v725_v22, 0.0  ;;  %v728_v33 = vmax.f32 %v726_v23, 0.0  ;;  %v807_v34 = vmul.f32 %v6701_v29, %v806_v25  ;;  %v6049_v23 = vld [vmem:[%s7915_s0 + $0x5c] sm:$0x3f] }
  0x8e   :  { %v808_v35 = vmul.f32 %v6023_v19, %v806_v25  ;;  %v793_v37 = vadd.f32 %v791_v16, %v785_v26  ;;  %v814_v40 = vstv %s7069_s7  ;;  %v822_v42 = vstv %s7071_s8  ;;  %s7142_s7 = sld [smem:[#allocation5 + $0x3d]]  ;;  %s7144_s8 = sld [smem:[#allocation5 + $0x3e]] }
  0x8f   :  { %v794_v38 = vadd.f32 %v792_v17, %v786_v27  ;;  %v737_v43 = vrot.slane %v727_v32, %v6769_v18  ;;  %v744_v44 = vrot.slane %v728_v33, %v6769_v18  ;;  %v815_v45 = vmul.f32 %v6720_v39, %v814_v40 }
  0x90   :  { %v816_v47 = vmul.f32 %v6026_v31, %v814_v40  ;;  %v801_v49 = vadd.f32 %v799_v21, %v793_v37  ;;  %v823_v14 = vmul.f32 %v6734_v46, %v822_v42  ;;  %v824_v51 = vmul.f32 %v6029_v36, %v822_v42 }
  0x91   :  { %v802_v50 = vadd.f32 %v800_v30, %v794_v38  ;;  %v745_v52 = vcombine.low %v737_v43, %v744_v44  ;;  %v746_v53 = vcombine.high %v737_v43, %v744_v44  ;;  %v828_v54 = vstv %s7091_s17  ;;  %v6052_v38 = vld [vmem:[%s7915_s0 + $0x6a] sm:$0x3f] }
  0x92   :  { %v862_v55 = vstv %s7093_s18  ;;  %v809_v58 = vadd.f32 %v807_v34, %v801_v49  ;;  %v878_v63 = vstv %s7101_s22  ;;  %v886_v0 = vstv %s7105_s24  ;;  %s7179_s22 = sld [smem:[#allocation5 + $0x41]]  ;;  %s7183_s24 = sld [smem:[#allocation5 + $0x42]] }
  0x93   :  { %v810_v59 = vadd.f32 %v808_v35, %v802_v50  ;;  %v863_v60 = vmul.f32 %v862_v55, %v6637_v6  ;;  %v864_v61 = vmul.f32 %v862_v55, %v860_v48  ;;  %750 = vst.msk [vmem:[#allocation2 + $0x4] ss:$8 sm:$0xf] %vm6791_vm0, %v745_v52  ;;  %751 = vst.msk [vmem:[#allocation2 + $0x4] ss:$8 sm:$0x70] %vm6791_vm0, %v745_v52  ;;  %v870_v6 = vstv %s7099_s21 }
  0x94   :  { %753 = vst.msk [vmem:[#allocation2 + $0x3c] ss:$8 sm:$0xf] %vm6791_vm0, %v746_v53  ;;  %754 = vst.msk [vmem:[#allocation2 + $0x3c] ss:$8 sm:$0x70] %vm6791_vm0, %v746_v53  ;;  %v894_v2 = vstv %s7107_s16  ;;  %v817_v3 = vadd.f32 %v815_v45, %v809_v58  ;;  %v871_v4 = vmul.f32 %v6652_v9, %v870_v6  ;;  %v872_v5 = vmul.f32 %v6034_v56, %v870_v6 }
  0x95   :  { %v818_v1 = vadd.f32 %v816_v47, %v810_v59  ;;  %v879_v8 = vmul.f32 %v6657_v10, %v878_v63  ;;  %v880_v11 = vmul.f32 %v6037_v57, %v878_v63  ;;  %v887_v12 = vmul.f32 %v6667_v13, %v886_v0  ;;  %v6046_v9 = vld [vmem:[%s7915_s0 + $0x4e] sm:$0x3f]  ;;  %s7177_s21 = sld [smem:[#allocation5 + $0x40]]  ;;  %s7185_s16 = sld [smem:[#allocation5 + $0x43]]  ;;  %v6060_v55 = vld [vmem:[%s7915_s0 + $0x16] sm:$0x3f] }
  0x96   :  { %v888_v15 = vmul.f32 %v6040_v62, %v886_v0  ;;  %v825_v16 = vadd.f32 %v823_v14, %v817_v3  ;;  %v873_v19 = vadd.f32 %v871_v4, %v863_v60  ;;  %v874_v22 = vadd.f32 %v872_v5, %v864_v61  ;;  %v6059_v45 = vld [vmem:[%s7915_s0 + $0xe] sm:$0xff]  ;;  %v964_v14 = vld [vmem:[%s7915_s0 + $0x8] sm:$0x3f]  ;;  %v6068_v5 = vld [vmem:[%s7915_s0 + $0x38] sm:$0xff] }
  0x97   :  { %v826_v17 = vadd.f32 %v824_v51, %v818_v1  ;;  %v895_v24 = vmul.f32 %v6680_v20, %v894_v2  ;;  %v896_v25 = vmul.f32 %v6043_v7, %v894_v2  ;;  %v902_v10 = vstv %s7125_s26  ;;  %v6065_v63 = vld [vmem:[%s7915_s0 + $0x2a] sm:$0xff]  ;;  %v6066_v4 = vld [vmem:[%s7915_s0 + $0x32] sm:$0x3f]  ;;  %v6069_v7 = vld [vmem:[%s7915_s0 + $0x40] sm:$0x3f] }
  0x98   :  { %v910_v26 = vstv %s7127_s1  ;;  %v829_v13 = vadd.f32 %v828_v54, %v825_v16  ;;  %v881_v21 = vadd.f32 %v879_v8, %v873_v19  ;;  %v882_v30 = vadd.f32 %v880_v11, %v874_v22 }
  0x99   :  { %v830_v27 = vadd.f32 %v828_v54, %v826_v17  ;;  %v903_v31 = vmul.f32 %v6696_v28, %v902_v10  ;;  %v904_v32 = vmul.f32 %v6046_v9, %v902_v10  ;;  %v911_v20 = vmul.f32 %v6701_v29, %v910_v26  ;;  %v6055_v28 = vld [vmem:[%s7915_s0 + $0x78] sm:$0x3f]  ;;  %v963_v29 = vld [vmem:[%s7915_s0] sm:$0xff] }
  0x9a   :  { %v912_v33 = vmul.f32 %v6049_v23, %v910_v26  ;;  %v831_v34 = vmax.f32 %v829_v13, 0.0  ;;  %v889_v36 = vadd.f32 %v887_v12, %v881_v21  ;;  %v890_v37 = vadd.f32 %v888_v15, %v882_v30  ;;  %v6071_v10 = vld [vmem:[%s7915_s0 + $0x46] sm:$0xff]  ;;  %v6072_v30 = vld [vmem:[%s7915_s0 + $0x4e] sm:$0x3f] }
  0x9b   :  { %v832_v35 = vmax.f32 %v830_v27, 0.0  ;;  %v918_v40 = vstv %s7142_s7  ;;  %v926_v42 = vstv %s7144_s8  ;;  %v932_v43 = vstv %s7158_s15  ;;  %s7217_s7 = sld [smem:[#allocation5 + $0x46]]  ;;  %s7219_s8 = sld [smem:[#allocation5 + $0x47]] }
  0x9c   :  { %v966_v44 = vstv %s7160_s4  ;;  %v841_v47 = vrot.slane %v831_v34, %v6769_v18  ;;  %v897_v49 = vadd.f32 %v895_v24, %v889_v36  ;;  %v898_v50 = vadd.f32 %v896_v25, %v890_v37 }
  0x9d   :  { %v848_v48 = vrot.slane %v832_v35, %v6769_v18  ;;  %v919_v51 = vmul.f32 %v6720_v39, %v918_v40  ;;  %v920_v52 = vmul.f32 %v6052_v38, %v918_v40  ;;  %v927_v53 = vmul.f32 %v6734_v46, %v926_v42  ;;  %v6062_v39 = vld [vmem:[%s7915_s0 + $0x1c] sm:$0xff]  ;;  %v6063_v46 = vld [vmem:[%s7915_s0 + $0x24] sm:$0x3f]  ;;  %v6078_v40 = vld [vmem:[%s7915_s0 + $0x6a] sm:$0x3f] }
  0x9e   :  { %v928_v54 = vmul.f32 %v6055_v28, %v926_v42  ;;  %v905_v58 = vadd.f32 %v903_v31, %v897_v49  ;;  %v906_v59 = vadd.f32 %v904_v32, %v898_v50  ;;  %v967_v60 = vmul.f32 %v966_v44, %v963_v29  ;;  %v6074_v31 = vld [vmem:[%s7915_s0 + $0x54] sm:$0xff]  ;;  %v6075_v32 = vld [vmem:[%s7915_s0 + $0x5c] sm:$0x3f]  ;;  %v6077_v29 = vld [vmem:[%s7915_s0 + $0x62] sm:$0xff] }
  0x9f   :  { %v849_v56 = vcombine.low %v841_v47, %v848_v48  ;;  %v850_v57 = vcombine.high %v841_v47, %v848_v48  ;;  %v968_v61 = vmul.f32 %v966_v44, %v964_v14  ;;  %v974_v62 = vstv %s7177_s21 }
  0xa0   :  { %v982_v6 = vstv %s7179_s22  ;;  %v913_v0 = vadd.f32 %v911_v20, %v905_v58  ;;  %v914_v2 = vadd.f32 %v912_v33, %v906_v59  ;;  %v975_v3 = vmul.f32 %v6059_v45, %v974_v62 }
  0xa1   :  { %854 = vst.msk [vmem:[#allocation2 + $0x5] ss:$8 sm:$0xf] %vm6791_vm0, %v849_v56  ;;  %855 = vst.msk [vmem:[#allocation2 + $0x5] ss:$8 sm:$0x70] %vm6791_vm0, %v849_v56  ;;  %v976_v1 = vmul.f32 %v6060_v55, %v974_v62  ;;  %v983_v8 = vmul.f32 %v6062_v39, %v982_v6  ;;  %v984_v11 = vmul.f32 %v6063_v46, %v982_v6  ;;  %v990_v12 = vstv %s7183_s24 }
  0xa2   :  { %857 = vst.msk [vmem:[#allocation2 + $0x3d] ss:$8 sm:$0xf] %vm6791_vm0, %v850_v57  ;;  %858 = vst.msk [vmem:[#allocation2 + $0x3d] ss:$8 sm:$0x70] %vm6791_vm0, %v850_v57  ;;  %v998_v15 = vstv %s7185_s16  ;;  %v921_v16 = vadd.f32 %v919_v51, %v913_v0  ;;  %v922_v17 = vadd.f32 %v920_v52, %v914_v2  ;;  %v977_v19 = vadd.f32 %v975_v3, %v967_v60 }
  0xa3   :  { %v978_v22 = vadd.f32 %v976_v1, %v968_v61  ;;  %v991_v9 = vmul.f32 %v6065_v63, %v990_v12  ;;  %v992_v23 = vmul.f32 %v6066_v4, %v990_v12  ;;  %v999_v24 = vmul.f32 %v6068_v5, %v998_v15  ;;  %v6081_v51 = vld [vmem:[%s7915_s0 + $0x78] sm:$0x3f] }
  0xa4   :  { %v1000_v25 = vmul.f32 %v6069_v7, %v998_v15  ;;  %v929_v26 = vadd.f32 %v927_v53, %v921_v16  ;;  %v930_v13 = vadd.f32 %v928_v54, %v922_v17  ;;  %v985_v27 = vadd.f32 %v983_v8, %v977_v19 }
  0xa5   :  { %v986_v21 = vadd.f32 %v984_v11, %v978_v22  ;;  %v1006_v20 = vstv %s7208_s10  ;;  %v1014_v33 = vstv %s7210_s11  ;;  %v1022_v34 = vstv %s7217_s7  ;;  %s6083_s10 = sld [smem:[#allocation8 + $0x7]] }
  0xa6   :  { %v1030_v35 = vstv %s7219_s8  ;;  %v933_v36 = vadd.f32 %v932_v43, %v929_v26  ;;  %v934_v37 = vadd.f32 %v932_v43, %v930_v13  ;;  %v993_v38 = vadd.f32 %v991_v9, %v985_v27  ;;  %v6080_v43 = vld [vmem:[%s7915_s0 + $0x70] sm:$0xff] }
  0xa7   :  { %v994_v28 = vadd.f32 %v992_v23, %v986_v21  ;;  %v1007_v42 = vmul.f32 %v6071_v10, %v1006_v20  ;;  %v1008_v44 = vmul.f32 %v6072_v30, %v1006_v20  ;;  %v1015_v45 = vmul.f32 %v6074_v31, %v1014_v33 }
  0xa8   :  { %v1016_v47 = vmul.f32 %v6075_v32, %v1014_v33  ;;  %v935_v48 = vmax.f32 %v933_v36, 0.0  ;;  %v936_v49 = vmax.f32 %v934_v37, 0.0  ;;  %v1001_v50 = vadd.f32 %v999_v24, %v993_v38 }
  0xa9   :  { %v1002_v14 = vadd.f32 %v1000_v25, %v994_v28  ;;  %v1023_v52 = vmul.f32 %v6077_v29, %v1022_v34  ;;  %v1024_v53 = vmul.f32 %v6078_v40, %v1022_v34  ;;  %v1031_v58 = vmul.f32 %v6080_v43, %v1030_v35 }
  0xaa   :  { %v945_v54 = vrot.slane %v935_v48, %v6769_v18  ;;  %v952_v55 = vrot.slane %v936_v49, %v6769_v18  ;;  %v1009_v56 = vadd.f32 %v1007_v42, %v1001_v50  ;;  %v1032_v59 = vmul.f32 %v6081_v51, %v1030_v35 }
  0xab   :  { %v1010_v57 = vadd.f32 %v1008_v44, %v1002_v14  ;;  %v1036_v63 = vstv %s6083_s10 }
  0xac   :  { %v953_v39 = vcombine.low %v945_v54, %v952_v55  ;;  %v954_v46 = vcombine.high %v945_v54, %v952_v55  ;;  %v1017_v60 = vadd.f32 %v1015_v45, %v1009_v56 }
  0xad   :  { %v1018_v61 = vadd.f32 %v1016_v47, %v1010_v57 }
  0xae   :  { %958 = vst.msk [vmem:[#allocation2 + $0x6] ss:$8 sm:$0xf] %vm6791_vm0, %v953_v39  ;;  %959 = vst.msk [vmem:[#allocation2 + $0x6] ss:$8 sm:$0x70] %vm6791_vm0, %v953_v39  ;;  %v1025_v62 = vadd.f32 %v1023_v52, %v1017_v60 }
  0xaf   :  { %961 = vst.msk [vmem:[#allocation2 + $0x3e] ss:$8 sm:$0xf] %vm6791_vm0, %v954_v46  ;;  %962 = vst.msk [vmem:[#allocation2 + $0x3e] ss:$8 sm:$0x70] %vm6791_vm0, %v954_v46  ;;  %v1026_v6 = vadd.f32 %v1024_v53, %v1018_v61 }
  0xb0   :  { %v1033_v0 = vadd.f32 %v1031_v58, %v1025_v62 }
  0xb1   :  { %v1034_v2 = vadd.f32 %v1032_v59, %v1026_v6 }
  0xb2   :  { %v1037_v3 = vadd.f32 %v1036_v63, %v1033_v0 }
  0xb3   :  { %v1038_v1 = vadd.f32 %v1036_v63, %v1034_v2 }
  0xb4   :  { %v1039_v4 = vmax.f32 %v1037_v3, 0.0 }
  0xb5   :  { %v1040_v5 = vmax.f32 %v1038_v1, 0.0 }
  0xb6   :  { %v1049_v7 = vrot.slane %v1039_v4, %v6769_v18 }
  0xb7   :  { %v1056_v8 = vrot.slane %v1040_v5, %v6769_v18 }
  0xb9   :  { %v1057_v11 = vcombine.low %v1049_v7, %v1056_v8  ;;  %v1058_v12 = vcombine.high %v1049_v7, %v1056_v8 }
  0xbb   :  { %1062 = vst.msk [vmem:[#allocation2 + $0x7] ss:$8 sm:$0xf] %vm6791_vm0, %v1057_v11  ;;  %1063 = vst.msk [vmem:[#allocation2 + $0x7] ss:$8 sm:$0x70] %vm6791_vm0, %v1057_v11 }
  0xbc   :  { %1065 = vst.msk [vmem:[#allocation2 + $0x3f] ss:$8 sm:$0xf] %vm6791_vm0, %v1058_v12  ;;  %1066 = vst.msk [vmem:[#allocation2 + $0x3f] ss:$8 sm:$0x70] %vm6791_vm0, %v1058_v12 }
  0xbd   :  { %6375 = dma.done.wait [#allocation4], 8960 }
  0xbe   :  { %6376 = vsyncadd [#allocation4], 4294958336  ;;  %v1124_v15 = vld [vmem:[#allocation3 + $0x1] ss:$8 sm:$0xf]  ;;  %vm1426_vm1 = vcmask 130048  }
  0xbf   :  { %v1125_v16 = vld [vmem:[#allocation3 + $0x1] ss:$8 sm:$0x70]  ;;  %vm7383_vm2 = vmpackc.low %vm1426_vm1, %vm1426_vm1  ;;  %vm6383_vm3 = vmmov 0   ;;  %s6385_s12 = smov [#allocation10]   ;;  %vm5846_vm4 = vcmask 74752  }
  0xc0   :  { %v1126_v17 = vor.u32 %v1125_v16, %v1124_v15  ;;  %v1128_v19 = vld [vmem:[#allocation3 + $0x39] ss:$8 sm:$0xf]  ;;  %s5854_s17 = sshll.u32 %s6385_s12, 4  ;;  %s5855_s17 = int_to_ptr.vmem [resolvable:$true] %s5854_s17 }
  0xc1   :  { %v1129_v22 = vld [vmem:[#allocation3 + $0x39] ss:$8 sm:$0x70]  ;;  %s6349_s18 = scalar_lea.vmem %s5855_s17, 32  ;;  %p6354_p11 = scmp.lt.s32.totalorder %s5855_s17, %s5855_s17 }
  0xc2   :  { %v1130_v9 = vor.u32 %v1129_v22, %v1128_v19  ;;  %v1132_v23 = vld [vmem:[#allocation3 + $0x71] ss:$8 sm:$0xf]  ;;  %p6350_p10 = scmp.ne.s32.totalorder %s5855_s17, %s6349_s18  ;;  %p6355_p12 = scmp.lt.s32.totalorder %s6349_s18, %s6349_s18 }
  0xc3   :  { %v1133_v24 = vld [vmem:[#allocation3 + $0x71] ss:$8 sm:$0x70] }
  0xc4   :  { %v1134_v25 = vor.u32 %v1133_v24, %v1132_v23  ;;  %v1136_v10 = vld [vmem:[#allocation3 + $0xa9] ss:$8 sm:$0xf]  ;;  %v1230_v30 = vcombine.low %v1126_v17, %v1130_v9  ;;  %v1231_v20 = vcombine.high %v1126_v17, %v1130_v9  ;;  %p6356_p13 = por %p6355_p12, %p6354_p11 }
  0xc5   :  { %v1137_v26 = vld [vmem:[#allocation3 + $0xa9] ss:$8 sm:$0x70] }
  0xc6   :  { %v1138_v13 = vor.u32 %v1137_v26, %v1136_v10  ;;  %v1140_v27 = vld [vmem:[#allocation3 + $0xe1] ss:$8 sm:$0xf]  ;;  %v1244_v37 = vrot.slane %v1230_v30, %v6769_v18  ;;  %v7306_v51 = vrot.slane %v1231_v20, %v6769_v18  ;;  %p6357_p0 = pnand %p6356_p13, %p6350_p10 }
  0xc7   :  { %v1141_v21 = vld [vmem:[#allocation3 + $0xe1] ss:$8 sm:$0x70] }
  0xc8   :  { %v1142_v31 = vor.u32 %v1141_v21, %v1140_v27  ;;  %v1144_v41 = vld [vmem:[#allocation3 + $0x119] ss:$8 sm:$0xf]  ;;  %v1232_v36 = vcombine.low %v1134_v25, %v1138_v13  ;;  %v1233_v38 = vcombine.high %v1134_v25, %v1138_v13 }
  0xc9   :  { %v1145_v32 = vld [vmem:[#allocation3 + $0x119] ss:$8 sm:$0x70] }
  0xca   :  { %v1146_v33 = vor.u32 %v1145_v32, %v1144_v41  ;;  %v1148_v34 = vld [vmem:[#allocation3 + $0x151] ss:$8 sm:$0xf]  ;;  %v1258_v48 = vrot.slane %v1232_v36, %v6769_v18  ;;  %v7309_v52 = vrot.slane %v1233_v38, %v6769_v18 }
  0xcb   :  { %v1149_v35 = vld [vmem:[#allocation3 + $0x151] ss:$8 sm:$0x70] }
  0xcc   :  { %v1150_v28 = vor.u32 %v1149_v35, %v1148_v34  ;;  %v1152_v29 = vld [vmem:[#allocation3 + $0x189] ss:$8 sm:$0xf]  ;;  %v1234_v47 = vcombine.low %v1142_v31, %v1146_v33  ;;  %v1235_v49 = vcombine.high %v1142_v31, %v1146_v33  ;;  %v1295_v56 = vcombine.high %v1244_v37, %v1258_v48  ;;  %v1078_v34 = vld [vmem:[#allocation3] ss:$8 sm:$0xf] }
  0xcd   :  { %v1153_v40 = vld [vmem:[#allocation3 + $0x189] ss:$8 sm:$0x70]  ;;  %v1294_v59 = vcombine.low %v1244_v37, %v1258_v48  ;;  %v1297_v4 = vcombine.high %v7306_v51, %v7309_v52  ;;  %v1296_v19 = vcombine.low %v7306_v51, %v7309_v52  ;;  %v1079_v35 = vld [vmem:[#allocation3] ss:$8 sm:$0x70] }
  0xce   :  { %v1154_v42 = vor.u32 %v1153_v40, %v1152_v29  ;;  %v1156_v44 = vld [vmem:[#allocation3 + $0x1c1] ss:$8 sm:$0xf]  ;;  %v1272_v55 = vrot.slane %v1234_v47, %v6769_v18  ;;  %v1279_v62 = vrot.slane %v1235_v49, %v6769_v18  ;;  %v1322_v63 = vrot.slane %v1295_v56, %v6769_v18  ;;  %v1082_v29 = vld [vmem:[#allocation3 + $0x38] ss:$8 sm:$0xf] }
  0xcf   :  { %v1157_v45 = vld [vmem:[#allocation3 + $0x1c1] ss:$8 sm:$0x70]  ;;  %v1308_v3 = vrot.slane %v1294_v59, %v6769_v18  ;;  %v1329_v16 = vrot.slane %v1297_v4, %v6769_v18  ;;  %v1083_v40 = vld [vmem:[#allocation3 + $0x38] ss:$8 sm:$0x70]  ;;  %v1315_v51 = vrot.slane %v1296_v19, %v6769_v18 }
  0xd0   :  { %v1158_v50 = vor.u32 %v1157_v45, %v1156_v44  ;;  %v1160_v14 = vld [vmem:[#allocation3 + $0x1f9] ss:$8 sm:$0xf]  ;;  %v1236_v54 = vcombine.low %v1150_v28, %v1154_v42  ;;  %v1237_v61 = vcombine.high %v1150_v28, %v1154_v42  ;;  %v1086_v42 = vld [vmem:[#allocation3 + $0x70] ss:$8 sm:$0xf] }
  0xd1   :  { %v1161_v43 = vld [vmem:[#allocation3 + $0x1f9] ss:$8 sm:$0x70]  ;;  %v1087_v44 = vld [vmem:[#allocation3 + $0x70] ss:$8 sm:$0x70] }
  0xd2   :  { %v1162_v53 = vor.u32 %v1161_v43, %v1160_v14  ;;  %v1117_v57 = vld [vmem:[#allocation2 + $0x1] ss:$8 sm:$0xf]  ;;  %v1286_v6 = vrot.slane %v1236_v54, %v6769_v18  ;;  %v1293_v1 = vrot.slane %v1237_v61, %v6769_v18  ;;  %v1091_v14 = vld [vmem:[#allocation3 + $0xa8] ss:$8 sm:$0x70] }
  0xd3   :  { %v1118_v58 = vld [vmem:[#allocation2 + $0x1] ss:$8 sm:$0x70]  ;;  %v1094_v54 = vld [vmem:[#allocation3 + $0xe0] ss:$8 sm:$0xf] }
  0xd4   :  { %v7312_v39 = vor.u32 %v1118_v58, %v1117_v57  ;;  %v1120_v46 = vld [vmem:[#allocation2 + $0x39] ss:$8 sm:$0xf]  ;;  %v1365_v0 = vcombine.low %v1158_v50, %v1162_v53  ;;  %v1366_v5 = vcombine.high %v1158_v50, %v1162_v53  ;;  %v1299_v7 = vcombine.high %v1272_v55, %v1286_v6  ;;  %v1090_v50 = vld [vmem:[#allocation3 + $0xa8] ss:$8 sm:$0xf] }
  0xd5   :  { %v1121_v60 = vld [vmem:[#allocation2 + $0x39] ss:$8 sm:$0x70]  ;;  %v1298_v11 = vcombine.low %v1272_v55, %v1286_v6  ;;  %v1301_v15 = vcombine.high %v1279_v62, %v1293_v1  ;;  %v1300_v13 = vcombine.low %v1279_v62, %v1293_v1  ;;  %v1095_v55 = vld [vmem:[#allocation3 + $0xe0] ss:$8 sm:$0x70]  ;;  %v7348_v1 = vor.u32 %v1079_v35, %v1078_v34 }
  0xd6   :  { %v7317_v2 = vor.u32 %v1121_v60, %v1120_v46  ;;  %v1373_v8 = vrot.slane %v1365_v0, %v6769_v18  ;;  %v1380_v17 = vrot.slane %v1366_v5, %v6769_v18  ;;  %v1350_v22 = vrot.slane %v1299_v7, %v6769_v18  ;;  %v1098_v56 = vld [vmem:[#allocation3 + $0x118] ss:$8 sm:$0xf] }
  0xd7   :  { %v1336_v23 = vrot.slane %v1298_v11, %v6769_v18  ;;  %v1357_v10 = vrot.slane %v1301_v15, %v6769_v18  ;;  %v1343_v52 = vrot.slane %v1300_v13, %v6769_v18  ;;  %v1099_v57 = vld [vmem:[#allocation3 + $0x118] ss:$8 sm:$0x70]  ;;  %v7353_v11 = vor.u32 %v1087_v44, %v1086_v42 }
  0xd8   :  { %v1165_v12 = vcombine.low %v7312_v39, %v7317_v2  ;;  %v1381_v9 = vcombine.high %v1373_v8, %v1373_v8  ;;  %v1389_v24 = vrot.slane %v1373_v8, %v6769_v18  ;;  %v1382_v26 = vcombine.high %v1380_v17, %v1380_v17  ;;  %v1102_v60 = vld [vmem:[#allocation3 + $0x150] ss:$8 sm:$0xf] }
  0xd9   :  { %v1362_v27 = vcombine.low %v1322_v63, %v1350_v22  ;;  %v1358_v30 = vcombine.low %v1308_v3, %v1336_v23  ;;  %v1363_v31 = vcombine.high %v1322_v63, %v1350_v22  ;;  %v1359_v41 = vcombine.high %v1308_v3, %v1336_v23  ;;  %v1103_v61 = vld [vmem:[#allocation3 + $0x150] ss:$8 sm:$0x70] }
  0xda   :  { %v1173_v25 = vrot.slane %v1165_v12, %v6769_v18  ;;  %v1403_v21 = vrot.slane %v1381_v9, %v6769_v18  ;;  %v1411_v32 = vcombine.high %v1389_v24, %v1389_v24  ;;  %v1364_v28 = vcombine.low %v1329_v16, %v1357_v10  ;;  %v1106_v62 = vld [vmem:[#allocation3 + $0x188] ss:$8 sm:$0xf] }
  0xdb   :  { %v6192_v37 = vpack.c.bf16 %v1389_v24, %v1358_v30  ;;  %v1410_v48 = vrot.slane %v1382_v26, %v6769_v18  ;;  %v1396_v53 = vrot.slane %v1380_v17, %v6769_v18  ;;  %v1166_v46 = vcombine.high %v7312_v39, %v7317_v2  ;;  %v1107_v6 = vld [vmem:[#allocation3 + $0x188] ss:$8 sm:$0x70] }
  0xdc   :  { %v1181_v20 = vcombine.high %v1173_v25, %v1173_v25  ;;  %v7337_v33 = vrot.slane %v1173_v25, %v6769_v18  ;;  %v6190_v36 = vpack.c.bf16 %v1403_v21, %v1362_v27  ;;  %v1413_v38 = vcombine.high %v1403_v21, %v1403_v21  ;;  %v1110_v4 = vld [vmem:[#allocation3 + $0x1c0] ss:$8 sm:$0xf] }
  0xdd   :  { %v6196_v45 = vpack.c.bf16 %v1411_v32, %v1359_v41  ;;  %v6198_v59 = vpack.c.bf16 %v1410_v48, %v1364_v28  ;;  %v1360_v63 = vcombine.low %v1315_v51, %v1343_v52  ;;  %v1361_v0 = vcombine.high %v1315_v51, %v1343_v52  ;;  %v1111_v5 = vld [vmem:[#allocation3 + $0x1c0] ss:$8 sm:$0x70] }
  0xde   :  { %v1203_v47 = vrot.slane %v1181_v20, %v6769_v18  ;;  %v1211_v49 = vcombine.high %v7337_v33, %v7337_v33  ;;  %6191 = vmatprep.subr.bf16.mxu0 %v6190_v36  ;;  %v6194_v43 = vpack.c.bf16 %v1413_v38, %v1363_v31  ;;  %v1412_v3 = vcombine.high %v1396_v53, %v1396_v53  ;;  %v1114_v39 = vld [vmem:[#allocation3 + $0x1f8] ss:$8 sm:$0xf] }
  0xdf   :  { %6193 = vmatpush1.bf16.xpose.msra.mxu0 %v6192_v37  ;;  %v1180_v7 = vrot.slane %v1166_v46, %v6769_v18  ;;  %v7351_v8 = vor.u32 %v1083_v40, %v1082_v29  ;;  %v1115_v2 = vld [vmem:[#allocation3 + $0x1f8] ss:$8 sm:$0x70]  ;;  %v6200_v12 = vpack.c.bf16 %v1396_v53, %v1360_v63  ;;  %v6382_v15 = vmov 0.0|0.0  }
  0xe0   :  { %1497 = vmatprep.mubr.f32.mxu0 %v1203_v47  ;;  %v1213_v58 = vcombine.high %v1203_v47, %v1203_v47  ;;  %6195 = vmatprep.subr.bf16.mxu1 %v6194_v43  ;;  %v6203_v16 = vpack.c.bf16 %v1412_v3, %v1361_v0  ;;  %v7356_v17 = vor.u32 %v1091_v14, %v1090_v50  ;;  %v1072_v24 = vld [vmem:[#allocation2] ss:$8 sm:$0xf]  ;;  %v6384_v50 = vmov 0.0  }
  0xe1   :  { %6197 = vmatpush1.bf16.xpose.msra.mxu1 %v6196_v45  ;;  %6199 = vmatprep.subr.bf16.mxu0 %v6198_v59  ;;  %v1182_v19 = vcombine.high %v1180_v7, %v1180_v7  ;;  %v7359_v22 = vrot.slane %v1180_v7, %v6769_v18  ;;  %v7361_v9 = vor.u32 %v1095_v55, %v1094_v54  ;;  %v1073_v25 = vld [vmem:[#allocation2] ss:$8 sm:$0x70] }
  0xe2   :  { %1567 = vmatprep.mubr.f32.mxu1 %v1213_v58  ;;  %6202 = vmatprep.subr.bf16.mxu1 %v6382_v15  ;;  %v7363_v23 = vor.u32 %v1099_v57, %v1098_v56  ;;  %v7365_v10 = vor.u32 %v1103_v61, %v1102_v60  ;;  %v7367_v26 = vor.u32 %v1107_v6, %v1106_v62  ;;  %v1075_v21 = vld [vmem:[#allocation2 + $0x38] ss:$8 sm:$0xf] }
  0xe3   :  { %v7369_v13 = vor.u32 %v1111_v5, %v1110_v4  ;;  %v7371_v27 = vor.u32 %v1115_v2, %v1114_v39  ;;  %v1076_v30 = vld [vmem:[#allocation2 + $0x38] ss:$8 sm:$0x70]  ;;  %v1210_v31 = vrot.slane %v1182_v19, %v6769_v18  ;;  %v1212_v41 = vcombine.high %v7359_v22, %v7359_v22 }
  0xe4   :  { %v1780_v32 = vcombine.low %v7348_v1, %v7351_v8  ;;  %v1782_v20 = vcombine.low %v7353_v11, %v7356_v17  ;;  %v1784_v35 = vcombine.low %v7361_v9, %v7363_v23  ;;  %v1786_v36 = vcombine.low %v7365_v10, %v7367_v26 }
  0xe5   :  { %v1915_v37 = vcombine.low %v7369_v13, %v7371_v27  ;;  %v7393_v38 = vor.u32 %v1073_v25, %v1072_v24  ;;  %v7397_v40 = vor.u32 %v1076_v30, %v1075_v21  ;;  %v1781_v47 = vcombine.high %v7348_v1, %v7351_v8  ;;  %v2273_v24 = vld [vmem:[#allocation3 + $0x3a] ss:$8 sm:$0xf] }
  0xe6   :  { %1498 = vmatmul.mubr.f32.vlgmr.msra.gmra.mrb[0].mxu0 %v7337_v33  ;;  %v1794_v28 = vrot.slane %v1780_v32, %v6769_v18  ;;  %v1808_v29 = vrot.slane %v1782_v20, %v6769_v18  ;;  %v1822_v42 = vrot.slane %v1784_v35, %v6769_v18  ;;  %v1836_v44 = vrot.slane %v1786_v36, %v6769_v18  ;;  %v2274_v25 = vld [vmem:[#allocation3 + $0x3a] ss:$8 sm:$0x70] }
  0xe7   :  { %6201 = vmatpush1.bf16.xpose.msra.mxu0 %v6200_v12  ;;  %1637 = vmatprep.mubr.f32.mxu0 %v1210_v31  ;;  %v1923_v45 = vrot.slane %v1915_v37, %v6769_v18  ;;  %v1783_v56 = vcombine.high %v7353_v11, %v7356_v17  ;;  %v1785_v62 = vcombine.high %v7361_v9, %v7363_v23  ;;  %v2270_v17 = vld [vmem:[#allocation3 + $0x2] ss:$8 sm:$0x70] }
  0xe8   :  { %1568 = vmatmul.mubr.f32.vlgmr.msra.gmra.mrb[0].mxu1 %v1211_v49  ;;  %v1845_v48 = vcombine.high %v1794_v28, %v1808_v29  ;;  %v1844_v33 = vcombine.low %v1794_v28, %v1808_v29  ;;  %v1715_v49 = vcombine.low %v7393_v38, %v7397_v40  ;;  %v1849_v14 = vcombine.high %v1822_v42, %v1836_v44  ;;  %v2277_v30 = vld [vmem:[#allocation3 + $0x72] ss:$8 sm:$0xf] }
  0xe9   :  { %6205 = vmatpush3.bf16.xpose.msk.msra.mxu1 %vm7383_vm2, %v6203_v16  ;;  %6138 = vmatprep.mubr.msk.f32.mxu1 %vm6383_vm3, %v6384_v50  ;;  %v1931_v43 = vcombine.high %v1923_v45, %v1923_v45  ;;  %v1848_v51 = vcombine.low %v1822_v42, %v1836_v44  ;;  %v1939_v52 = vrot.slane %v1923_v45, %v6769_v18  ;;  %v2269_v16 = vld [vmem:[#allocation3 + $0x2] ss:$8 sm:$0xf] }
  0xea   :  { %v1872_v53 = vrot.slane %v1845_v48, %v6769_v18  ;;  %v1858_v54 = vrot.slane %v1844_v33, %v6769_v18  ;;  %v1723_v55 = vrot.slane %v1715_v49, %v6769_v18  ;;  %v1900_v57 = vrot.slane %v1849_v14, %v6769_v18  ;;  %v2278_v31 = vld [vmem:[#allocation3 + $0x72] ss:$8 sm:$0x70] }
  0xeb   :  { %v1953_v58 = vrot.slane %v1931_v43, %v6769_v18  ;;  %v1886_v59 = vrot.slane %v1848_v51, %v6769_v18  ;;  %v1961_v46 = vcombine.high %v1939_v52, %v1939_v52  ;;  %v1787_v6 = vcombine.high %v7365_v10, %v7367_v26  ;;  %v2281_v35 = vld [vmem:[#allocation3 + $0xaa] ss:$8 sm:$0xf] }
  0xec   :  { %v1731_v60 = vcombine.high %v1723_v55, %v1723_v55  ;;  %v7423_v61 = vrot.slane %v1723_v55, %v6769_v18  ;;  %v1912_v63 = vcombine.low %v1872_v53, %v1900_v57  ;;  %v1913_v3 = vcombine.high %v1872_v53, %v1900_v57  ;;  %v2285_v28 = vld [vmem:[#allocation3 + $0xe2] ss:$8 sm:$0xf] }
  0xed   :  { %v1908_v0 = vcombine.low %v1858_v54, %v1886_v59  ;;  %v1963_v1 = vcombine.high %v1953_v58, %v1953_v58  ;;  %v1909_v4 = vcombine.high %v1858_v54, %v1886_v59  ;;  %v1801_v7 = vrot.slane %v1781_v47, %v6769_v18  ;;  %v2286_v29 = vld [vmem:[#allocation3 + $0xe2] ss:$8 sm:$0x70] }
  0xee   :  { %1638 = vmatmul.mubr.f32.vlgmr.msra.gmra.mrb[2].mxu0 %v7359_v22  ;;  %v1753_v5 = vrot.slane %v1731_v60, %v6769_v18  ;;  %v1815_v8 = vrot.slane %v1783_v56, %v6769_v18  ;;  %v6206_v11 = vpack.c.bf16 %v1953_v58, %v1912_v63  ;;  %v1829_v12 = vrot.slane %v1785_v62, %v6769_v18  ;;  %v2289_v42 = vld [vmem:[#allocation3 + $0x11a] ss:$8 sm:$0xf] }
  0xef   :  { %v6208_v39 = vpack.c.bf16 %v1939_v52, %v1908_v0  ;;  %v6210_v2 = vpack.c.bf16 %v1963_v1, %v1913_v3  ;;  %v6212_v19 = vpack.c.bf16 %v1961_v46, %v1909_v4  ;;  %v1843_v22 = vrot.slane %v1787_v6, %v6769_v18  ;;  %v2290_v44 = vld [vmem:[#allocation3 + $0x11a] ss:$8 sm:$0x70] }
  0xf0   :  { %6139 = vmatmul.mubr.msk.f32.vlgmr.msra.gmra.mrb[2].mxu1 %vm1426_vm1, %v1212_v41  ;;  %2046 = vmatprep.mubr.f32.mxu0 %v1753_v5  ;;  %v1847_v9 = vcombine.high %v1801_v7, %v1815_v8  ;;  %v1916_v23 = vcombine.high %v7369_v13, %v7371_v27  ;;  %v1763_v10 = vcombine.high %v1753_v5, %v1753_v5  ;;  %v2282_v13 = vld [vmem:[#allocation3 + $0xaa] ss:$8 sm:$0x70] }
  0xf1   :  { %6207 = vmatprep.subr.bf16.mxu0 %v6206_v11  ;;  %6211 = vmatprep.subr.bf16.mxu1 %v6210_v2  ;;  %v1846_v26 = vcombine.low %v1801_v7, %v1815_v8  ;;  %v1761_v21 = vcombine.high %v7423_v61, %v7423_v61  ;;  %v1851_v41 = vcombine.high %v1829_v12, %v1843_v22  ;;  %v2293_v49 = vld [vmem:[#allocation3 + $0x152] ss:$8 sm:$0xf] }
  0xf2   :  { %6209 = vmatpush1.bf16.xpose.msra.mxu0 %v6208_v39  ;;  %6213 = vmatpush1.bf16.xpose.msra.mxu1 %v6212_v19  ;;  %v1879_v32 = vrot.slane %v1847_v9, %v6769_v18  ;;  %v1930_v20 = vrot.slane %v1916_v23, %v6769_v18  ;;  %v1850_v27 = vcombine.low %v1829_v12, %v1843_v22  ;;  %v2294_v14 = vld [vmem:[#allocation3 + $0x152] ss:$8 sm:$0x70] }
  0xf3   :  { %2116 = vmatprep.mubr.f32.mxu1 %v1763_v10  ;;  %v1865_v36 = vrot.slane %v1846_v26, %v6769_v18  ;;  %6218 = vmatprep.subr.bf16.mxu1 %v6382_v15  ;;  %v1716_v37 = vcombine.high %v7393_v38, %v7397_v40  ;;  %v1907_v45 = vrot.slane %v1851_v41, %v6769_v18  ;;  %v2297_v40 = vld [vmem:[#allocation3 + $0x18a] ss:$8 sm:$0xf] }
  0xf4   :  { %v1932_v47 = vcombine.high %v1930_v20, %v1930_v20  ;;  %v1946_v48 = vrot.slane %v1930_v20, %v6769_v18  ;;  %v7448_v33 = vor.u32 %v2270_v17, %v2269_v16  ;;  %v1893_v43 = vrot.slane %v1850_v27, %v6769_v18  ;;  %v2298_v53 = vld [vmem:[#allocation3 + $0x18a] ss:$8 sm:$0x70] }
  0xf5   :  { %v1730_v51 = vrot.slane %v1716_v37, %v6769_v18  ;;  %v7452_v52 = vor.u32 %v2274_v25, %v2273_v24  ;;  %v7454_v38 = vor.u32 %v2278_v31, %v2277_v30  ;;  %v1914_v54 = vcombine.low %v1879_v32, %v1907_v45  ;;  %v2301_v58 = vld [vmem:[#allocation3 + $0x1c2] ss:$8 sm:$0xf] }
  0xf6   :  { %v1960_v55 = vrot.slane %v1932_v47, %v6769_v18  ;;  %v1962_v56 = vcombine.high %v1946_v48, %v1946_v48  ;;  %v7457_v57 = vor.u32 %v2282_v13, %v2281_v35  ;;  %v2302_v59 = vld [vmem:[#allocation3 + $0x1c2] ss:$8 sm:$0x70]  ;;  %v1910_v46 = vcombine.low %v1865_v36, %v1893_v43 }
  0xf7   :  { %v1911_v60 = vcombine.high %v1865_v36, %v1893_v43  ;;  %v1732_v62 = vcombine.high %v1730_v51, %v1730_v51  ;;  %v1746_v6 = vrot.slane %v1730_v51, %v6769_v18  ;;  %v2305_v63 = vld [vmem:[#allocation3 + $0x1fa] ss:$8 sm:$0xf]  ;;  %v7460_v1 = vor.u32 %v2286_v29, %v2285_v28 }
  0xf8   :  { %v2306_v0 = vld [vmem:[#allocation3 + $0x1fa] ss:$8 sm:$0x70]  ;;  %v6214_v3 = vpack.c.bf16 %v1960_v55, %v1914_v54  ;;  %v7462_v4 = vor.u32 %v2290_v44, %v2289_v42  ;;  %v7464_v5 = vor.u32 %v2294_v14, %v2293_v49  ;;  %v6216_v7 = vpack.c.bf16 %v1946_v48, %v1910_v46 }
  0xf9   :  { %2047 = vmatmul.mubr.f32.vlgmr.msra.gmra.mrb[4].mxu0 %v7423_v61  ;;  %2117 = vmatmul.mubr.f32.vlgmr.msra.gmra.mrb[4].mxu1 %v1761_v21  ;;  %v6219_v8 = vpack.c.bf16 %v1962_v56, %v1911_v60  ;;  %v1760_v11 = vrot.slane %v1732_v62, %v6769_v18  ;;  %v2262_v39 = vld [vmem:[#allocation2 + $0x2] ss:$8 sm:$0xf]  ;;  %v1762_v12 = vcombine.high %v1746_v6, %v1746_v6 }
  0xfa   :  { %v2263_v2 = vld [vmem:[#allocation2 + $0x2] ss:$8 sm:$0x70]  ;;  %6215 = vmatprep.subr.bf16.mxu0 %v6214_v3  ;;  %v2299_v16 = vor.u32 %v2298_v53, %v2297_v40  ;;  %v7468_v17 = vor.u32 %v2302_v59, %v2301_v58  ;;  %v7470_v19 = vor.u32 %v2306_v0, %v2305_v63  ;;  %v2375_v61 = vcombine.low %v7448_v33, %v7452_v52  ;;  %v2865_v3 = vld [vmem:[#allocation3 + $0x3] ss:$8 sm:$0xf] }
  0xfb   :  { %v2265_v22 = vld [vmem:[#allocation2 + $0x3a] ss:$8 sm:$0xf]  ;;  %6217 = vmatpush1.bf16.xpose.msra.mxu0 %v6216_v7  ;;  %6221 = vmatpush3.bf16.xpose.msk.msra.mxu1 %vm7383_vm2, %v6219_v8  ;;  %v2377_v23 = vcombine.low %v7454_v38, %v7457_v57  ;;  %v2379_v24 = vcombine.low %v7460_v1, %v7462_v4  ;;  %v7485_v26 = vor.u32 %v2263_v2, %v2262_v39  ;;  %v2870_v39 = vld [vmem:[#allocation3 + $0x3b] ss:$8 sm:$0x70] }
  0xfc   :  { %v2266_v9 = vld [vmem:[#allocation2 + $0x3a] ss:$8 sm:$0x70]  ;;  %2186 = vmatprep.mubr.f32.mxu0 %v1760_v11  ;;  %v2381_v25 = vcombine.low %v7464_v5, %v2299_v16  ;;  %v2510_v10 = vcombine.low %v7468_v17, %v7470_v19  ;;  %6145 = vmatprep.mubr.msk.f32.mxu1 %vm6383_vm3, %v6384_v50  ;;  %v2389_v21 = vrot.slane %v2375_v61, %v6769_v18  ;;  %v2869_v11 = vld [vmem:[#allocation3 + $0x3b] ss:$8 sm:$0xf] }
  0xfd   :  { %v2403_v30 = vrot.slane %v2377_v23, %v6769_v18  ;;  %v2417_v31 = vrot.slane %v2379_v24, %v6769_v18  ;;  %v7490_v41 = vor.u32 %v2266_v9, %v2265_v22  ;;  %v2376_v35 = vcombine.high %v7448_v33, %v7452_v52  ;;  %v2873_v22 = vld [vmem:[#allocation3 + $0x73] ss:$8 sm:$0xf] }
  0xfe   :  { %v2431_v32 = vrot.slane %v2381_v25, %v6769_v18  ;;  %v2518_v20 = vrot.slane %v2510_v10, %v6769_v18  ;;  %v2378_v13 = vcombine.high %v7454_v38, %v7457_v57  ;;  %v2380_v28 = vcombine.high %v7460_v1, %v7462_v4  ;;  %v2866_v1 = vld [vmem:[#allocation3 + $0x3] ss:$8 sm:$0x70] }
  0xff   :  { %v2440_v27 = vcombine.high %v2389_v21, %v2403_v30  ;;  %v2439_v36 = vcombine.low %v2389_v21, %v2403_v30  ;;  %v2310_v37 = vcombine.low %v7485_v26, %v7490_v41  ;;  %v2382_v49 = vcombine.high %v7464_v5, %v2299_v16  ;;  %v2874_v9 = vld [vmem:[#allocation3 + $0x73] ss:$8 sm:$0x70] }
 0x100   :  { %v2444_v29 = vcombine.high %v2417_v31, %v2431_v32  ;;  %v2526_v42 = vcombine.high %v2518_v20, %v2518_v20  ;;  %v2443_v44 = vcombine.low %v2417_v31, %v2431_v32  ;;  %v2534_v45 = vrot.slane %v2518_v20, %v6769_v18  ;;  %v2877_v25 = vld [vmem:[#allocation3 + $0xab] ss:$8 sm:$0xf] }
 0x101   :  { %v2467_v47 = vrot.slane %v2440_v27, %v6769_v18  ;;  %v2453_v48 = vrot.slane %v2439_v36, %v6769_v18  ;;  %v2318_v33 = vrot.slane %v2310_v37, %v6769_v18  ;;  %v2396_v53 = vrot.slane %v2376_v35, %v6769_v18  ;;  %v2882_v10 = vld [vmem:[#allocation3 + $0xe3] ss:$8 sm:$0x70] }
 0x102   :  { %2187 = vmatmul.mubr.f32.vlgmr.msra.gmra.mrb[6].mxu0 %v1746_v6  ;;  %v2495_v14 = vrot.slane %v2444_v29, %v6769_v18  ;;  %v2548_v43 = vrot.slane %v2526_v42, %v6769_v18  ;;  %v2481_v51 = vrot.slane %v2443_v44, %v6769_v18  ;;  %6146 = vmatmul.mubr.msk.f32.vlgmr.msra.gmra.mrb[6].mxu1 %vm1426_vm1, %v1762_v12  ;;  %v2885_v32 = vld [vmem:[#allocation3 + $0x11b] ss:$8 sm:$0xf] }
 0x103   :  { %v2556_v52 = vcombine.high %v2534_v45, %v2534_v45  ;;  %v2326_v38 = vcombine.high %v2318_v33, %v2318_v33  ;;  %v7512_v40 = vrot.slane %v2318_v33, %v6769_v18  ;;  %v2410_v46 = vrot.slane %v2378_v13, %v6769_v18  ;;  %v2886_v20 = vld [vmem:[#allocation3 + $0x11b] ss:$8 sm:$0x70] }
 0x104   :  { %v2507_v54 = vcombine.low %v2467_v47, %v2495_v14  ;;  %v2503_v55 = vcombine.low %v2453_v48, %v2481_v51  ;;  %v2508_v56 = vcombine.high %v2467_v47, %v2495_v14  ;;  %v2558_v57 = vcombine.high %v2548_v43, %v2548_v43  ;;  %v2889_v37 = vld [vmem:[#allocation3 + $0x153] ss:$8 sm:$0xf] }
 0x105   :  { %v2504_v58 = vcombine.high %v2453_v48, %v2481_v51  ;;  %v2348_v59 = vrot.slane %v2326_v38, %v6769_v18  ;;  %v2424_v60 = vrot.slane %v2380_v28, %v6769_v18  ;;  %v2438_v0 = vrot.slane %v2382_v49, %v6769_v18  ;;  %v2890_v28 = vld [vmem:[#allocation3 + $0x153] ss:$8 sm:$0x70] }
 0x106   :  { %v6222_v62 = vpack.c.bf16 %v2548_v43, %v2507_v54  ;;  %v6224_v6 = vpack.c.bf16 %v2534_v45, %v2503_v55  ;;  %v6226_v63 = vpack.c.bf16 %v2558_v57, %v2508_v56  ;;  %v2442_v7 = vcombine.high %v2396_v53, %v2410_v46  ;;  %v2893_v47 = vld [vmem:[#allocation3 + $0x18b] ss:$8 sm:$0xf] }
 0x107   :  { %v6228_v4 = vpack.c.bf16 %v2556_v52, %v2504_v58  ;;  %2641 = vmatprep.mubr.f32.mxu0 %v2348_v59  ;;  %v2358_v5 = vcombine.high %v2348_v59, %v2348_v59  ;;  %v2511_v8 = vcombine.high %v7468_v17, %v7470_v19  ;;  %v2446_v2 = vcombine.high %v2424_v60, %v2438_v0  ;;  %v2878_v17 = vld [vmem:[#allocation3 + $0xab] ss:$8 sm:$0x70] }
 0x108   :  { %6223 = vmatprep.subr.bf16.mxu0 %v6222_v62  ;;  %6227 = vmatprep.subr.bf16.mxu1 %v6226_v63  ;;  %v2356_v12 = vcombine.high %v7512_v40, %v7512_v40  ;;  %v2441_v16 = vcombine.low %v2396_v53, %v2410_v46  ;;  %v2474_v61 = vrot.slane %v2442_v7, %v6769_v18  ;;  %v2881_v19 = vld [vmem:[#allocation3 + $0xe3] ss:$8 sm:$0xf] }
 0x109   :  { %6225 = vmatpush1.bf16.xpose.msra.mxu0 %v6224_v6  ;;  %6229 = vmatpush1.bf16.xpose.msra.mxu1 %v6228_v4  ;;  %v2525_v23 = vrot.slane %v2511_v8, %v6769_v18  ;;  %v2445_v24 = vcombine.low %v2424_v60, %v2438_v0  ;;  %v2502_v21 = vrot.slane %v2446_v2, %v6769_v18  ;;  %v2897_v14 = vld [vmem:[#allocation3 + $0x1c3] ss:$8 sm:$0xf] }
 0x10a   :  { %2711 = vmatprep.mubr.f32.mxu1 %v2358_v5  ;;  %v2460_v30 = vrot.slane %v2441_v16, %v6769_v18  ;;  %6234 = vmatprep.subr.bf16.mxu1 %v6382_v15  ;;  %v2311_v31 = vcombine.high %v7485_v26, %v7490_v41  ;;  %v7532_v36 = vor.u32 %v2866_v1, %v2865_v3  ;;  %v2894_v26 = vld [vmem:[#allocation3 + $0x18b] ss:$8 sm:$0x70] }
 0x10b   :  { %v2527_v35 = vcombine.high %v2525_v23, %v2525_v23  ;;  %v2488_v13 = vrot.slane %v2445_v24, %v6769_v18  ;;  %v2541_v27 = vrot.slane %v2525_v23, %v6769_v18  ;;  %v2509_v29 = vcombine.low %v2474_v61, %v2502_v21  ;;  %v2898_v43 = vld [vmem:[#allocation3 + $0x1c3] ss:$8 sm:$0x70] }
 0x10c   :  { %v2325_v42 = vrot.slane %v2311_v31, %v6769_v18  ;;  %v7535_v44 = vor.u32 %v2870_v39, %v2869_v11  ;;  %v7537_v45 = vor.u32 %v2874_v9, %v2873_v22  ;;  %v2879_v38 = vor.u32 %v2878_v17, %v2877_v25  ;;  %v2901_v54 = vld [vmem:[#allocation3 + $0x1fb] ss:$8 sm:$0xf] }
 0x10d   :  { %v2555_v41 = vrot.slane %v2527_v35, %v6769_v18  ;;  %v2505_v48 = vcombine.low %v2460_v30, %v2488_v13  ;;  %v2506_v33 = vcombine.high %v2460_v30, %v2488_v13  ;;  %v2557_v49 = vcombine.high %v2541_v27, %v2541_v27  ;;  %v2902_v55 = vld [vmem:[#allocation3 + $0x1fb] ss:$8 sm:$0x70] }
 0x10e   :  { %v2327_v51 = vcombine.high %v2325_v42, %v2325_v42  ;;  %v2341_v52 = vrot.slane %v2325_v42, %v6769_v18  ;;  %v2883_v53 = vor.u32 %v2882_v10, %v2881_v19  ;;  %v2887_v59 = vor.u32 %v2886_v20, %v2885_v32  ;;  %v2858_v46 = vld [vmem:[#allocation2 + $0x3] ss:$8 sm:$0xf] }
 0x10f   :  { %v6230_v56 = vpack.c.bf16 %v2555_v41, %v2509_v29  ;;  %v6232_v57 = vpack.c.bf16 %v2541_v27, %v2505_v48  ;;  %v6235_v58 = vpack.c.bf16 %v2557_v49, %v2506_v33  ;;  %v2859_v60 = vld [vmem:[#allocation2 + $0x3] ss:$8 sm:$0x70]  ;;  %v2891_v63 = vor.u32 %v2890_v28, %v2889_v37 }
 0x110   :  { %2642 = vmatmul.mubr.f32.vlgmr.msra.gmra.mrb[8].mxu0 %v7512_v40  ;;  %2712 = vmatmul.mubr.f32.vlgmr.msra.gmra.mrb[8].mxu1 %v2356_v12  ;;  %v2355_v62 = vrot.slane %v2327_v51, %v6769_v18  ;;  %v2357_v6 = vcombine.high %v2341_v52, %v2341_v52  ;;  %v2861_v0 = vld [vmem:[#allocation2 + $0x3b] ss:$8 sm:$0xf]  ;;  %v2895_v1 = vor.u32 %v2894_v26, %v2893_v47 }
 0x111   :  { %v2862_v3 = vld [vmem:[#allocation2 + $0x3b] ss:$8 sm:$0x70]  ;;  %6231 = vmatprep.subr.bf16.mxu0 %v6230_v56  ;;  %6237 = vmatpush3.bf16.xpose.msk.msra.mxu1 %vm7383_vm2, %v6235_v58  ;;  %v7545_v4 = vor.u32 %v2898_v43, %v2897_v14  ;;  %v7547_v5 = vor.u32 %v2902_v55, %v2901_v54  ;;  %v2971_v40 = vcombine.low %v7532_v36, %v7535_v44  ;;  %v3462_v58 = vld [vmem:[#allocation3 + $0x4] ss:$8 sm:$0x70] }
 0x112   :  { %6233 = vmatpush1.bf16.xpose.msra.mxu0 %v6232_v57  ;;  %2781 = vmatprep.mubr.f32.mxu0 %v2355_v62  ;;  %v2973_v7 = vcombine.low %v7537_v45, %v2879_v38  ;;  %v2975_v8 = vcombine.low %v2883_v53, %v2887_v59  ;;  %v2977_v11 = vcombine.low %v2891_v63, %v2895_v1  ;;  %v3461_v57 = vld [vmem:[#allocation3 + $0x4] ss:$8 sm:$0xf] }
 0x113   :  { %v3106_v39 = vcombine.low %v7545_v4, %v7547_v5  ;;  %6152 = vmatprep.mubr.msk.f32.mxu1 %vm6383_vm3, %v6384_v50  ;;  %v7556_v2 = vor.u32 %v2859_v60, %v2858_v46  ;;  %v7558_v12 = vor.u32 %v2862_v3, %v2861_v0  ;;  %v2985_v16 = vrot.slane %v2971_v40, %v6769_v18  ;;  %v3469_v40 = vld [vmem:[#allocation3 + $0x74] ss:$8 sm:$0xf] }
 0x114   :  { %v2999_v22 = vrot.slane %v2973_v7, %v6769_v18  ;;  %v3013_v9 = vrot.slane %v2975_v8, %v6769_v18  ;;  %v2972_v61 = vcombine.high %v7532_v36, %v7535_v44  ;;  %v3027_v23 = vrot.slane %v2977_v11, %v6769_v18  ;;  %v3473_v11 = vld [vmem:[#allocation3 + $0xac] ss:$8 sm:$0xf] }
 0x115   :  { %v3114_v24 = vrot.slane %v3106_v39, %v6769_v18  ;;  %v2906_v25 = vcombine.low %v7556_v2, %v7558_v12  ;;  %v2974_v17 = vcombine.high %v7537_v45, %v2879_v38  ;;  %v2976_v21 = vcombine.high %v2883_v53, %v2887_v59  ;;  %v3474_v39 = vld [vmem:[#allocation3 + $0xac] ss:$8 sm:$0x70] }
 0x116   :  { %v3036_v19 = vcombine.high %v2985_v16, %v2999_v22  ;;  %v3035_v10 = vcombine.low %v2985_v16, %v2999_v22  ;;  %v2978_v30 = vcombine.high %v2891_v63, %v2895_v1  ;;  %v3040_v31 = vcombine.high %v3013_v9, %v3027_v23  ;;  %v3466_v63 = vld [vmem:[#allocation3 + $0x3c] ss:$8 sm:$0x70] }
 0x117   :  { %v3122_v32 = vcombine.high %v3114_v24, %v3114_v24  ;;  %v3039_v20 = vcombine.low %v3013_v9, %v3027_v23  ;;  %v3130_v35 = vrot.slane %v3114_v24, %v6769_v18  ;;  %v2914_v36 = vrot.slane %v2906_v25, %v6769_v18  ;;  %v3477_v16 = vld [vmem:[#allocation3 + $0xe4] ss:$8 sm:$0xf] }
 0x118   :  { %v3063_v13 = vrot.slane %v3036_v19, %v6769_v18  ;;  %v3049_v27 = vrot.slane %v3035_v10, %v6769_v18  ;;  %6153 = vmatmul.mubr.msk.f32.vlgmr.msra.gmra.mrb[10].mxu1 %vm1426_vm1, %v2357_v6  ;;  %v2992_v37 = vrot.slane %v2972_v61, %v6769_v18  ;;  %v3091_v28 = vrot.slane %v3040_v31, %v6769_v18  ;;  %v3465_v6 = vld [vmem:[#allocation3 + $0x3c] ss:$8 sm:$0xf] }
 0x119   :  { %2782 = vmatmul.mubr.f32.vlgmr.msra.gmra.mrb[10].mxu0 %v2341_v52  ;;  %v3144_v29 = vrot.slane %v3122_v32, %v6769_v18  ;;  %v3077_v42 = vrot.slane %v3039_v20, %v6769_v18  ;;  %v3152_v44 = vcombine.high %v3130_v35, %v3130_v35  ;;  %v2922_v45 = vcombine.high %v2914_v36, %v2914_v36  ;;  %v3478_v22 = vld [vmem:[#allocation3 + $0xe4] ss:$8 sm:$0x70] }
 0x11a   :  { %v7580_v47 = vrot.slane %v2914_v36, %v6769_v18  ;;  %v3006_v26 = vrot.slane %v2974_v17, %v6769_v18  ;;  %v3020_v41 = vrot.slane %v2976_v21, %v6769_v18  ;;  %v3103_v48 = vcombine.low %v3063_v13, %v3091_v28  ;;  %v3481_v24 = vld [vmem:[#allocation3 + $0x11c] ss:$8 sm:$0xf] }
 0x11b   :  { %v3099_v33 = vcombine.low %v3049_v27, %v3077_v42  ;;  %v3104_v49 = vcombine.high %v3063_v13, %v3091_v28  ;;  %v3154_v14 = vcombine.high %v3144_v29, %v3144_v29  ;;  %v3100_v43 = vcombine.high %v3049_v27, %v3077_v42  ;;  %v3482_v25 = vld [vmem:[#allocation3 + $0x11c] ss:$8 sm:$0x70] }
 0x11c   :  { %v2944_v51 = vrot.slane %v2922_v45, %v6769_v18  ;;  %v3034_v52 = vrot.slane %v2978_v30, %v6769_v18  ;;  %v3038_v38 = vcombine.high %v2992_v37, %v3006_v26  ;;  %v6238_v53 = vpack.c.bf16 %v3144_v29, %v3103_v48  ;;  %v3486_v21 = vld [vmem:[#allocation3 + $0x154] ss:$8 sm:$0x70] }
 0x11d   :  { %v6240_v54 = vpack.c.bf16 %v3130_v35, %v3099_v33  ;;  %v6242_v55 = vpack.c.bf16 %v3154_v14, %v3104_v49  ;;  %v3107_v56 = vcombine.high %v7545_v4, %v7547_v5  ;;  %v6244_v59 = vpack.c.bf16 %v3152_v44, %v3100_v43  ;;  %v3470_v4 = vld [vmem:[#allocation3 + $0x74] ss:$8 sm:$0x70] }
 0x11e   :  { %3237 = vmatprep.mubr.f32.mxu0 %v2944_v51  ;;  %v2954_v46 = vcombine.high %v2944_v51, %v2944_v51  ;;  %v3042_v60 = vcombine.high %v3020_v41, %v3034_v52  ;;  %v3070_v62 = vrot.slane %v3038_v38, %v6769_v18  ;;  %6239 = vmatprep.subr.bf16.mxu0 %v6238_v53  ;;  %v3489_v35 = vld [vmem:[#allocation3 + $0x18c] ss:$8 sm:$0xf] }
 0x11f   :  { %6243 = vmatprep.subr.bf16.mxu1 %v6242_v55  ;;  %v3121_v0 = vrot.slane %v3107_v56, %v6769_v18  ;;  %v2952_v3 = vcombine.high %v7580_v47, %v7580_v47  ;;  %v3037_v1 = vcombine.low %v2992_v37, %v3006_v26  ;;  %6241 = vmatpush1.bf16.xpose.msra.mxu0 %v6240_v54  ;;  %v3490_v13 = vld [vmem:[#allocation3 + $0x18c] ss:$8 sm:$0x70] }
 0x120   :  { %6245 = vmatpush1.bf16.xpose.msra.mxu1 %v6244_v59  ;;  %v3098_v5 = vrot.slane %v3042_v60, %v6769_v18  ;;  %v3041_v7 = vcombine.low %v3020_v41, %v3034_v52  ;;  %v2907_v8 = vcombine.high %v7556_v2, %v7558_v12  ;;  %3307 = vmatprep.mubr.f32.mxu1 %v2954_v46  ;;  %v3485_v12 = vld [vmem:[#allocation3 + $0x154] ss:$8 sm:$0xf] }
 0x121   :  { %v3123_v9 = vcombine.high %v3121_v0, %v3121_v0  ;;  %v3056_v61 = vrot.slane %v3037_v1, %v6769_v18  ;;  %v3137_v23 = vrot.slane %v3121_v0, %v6769_v18  ;;  %6250 = vmatprep.subr.bf16.mxu1 %v6382_v15  ;;  %v7600_v2 = vor.u32 %v3462_v58, %v3461_v57  ;;  %v3493_v29 = vld [vmem:[#allocation3 + $0x1c4] ss:$8 sm:$0xf] }
 0x122   :  { %v3105_v17 = vcombine.low %v3070_v62, %v3098_v5  ;;  %v3084_v19 = vrot.slane %v3041_v7, %v6769_v18  ;;  %v2921_v10 = vrot.slane %v2907_v8, %v6769_v18  ;;  %v7603_v32 = vor.u32 %v3466_v63, %v3465_v6  ;;  %v3494_v42 = vld [vmem:[#allocation3 + $0x1c4] ss:$8 sm:$0x70] }
 0x123   :  { %v3151_v30 = vrot.slane %v3123_v9, %v6769_v18  ;;  %v3153_v31 = vcombine.high %v3137_v23, %v3137_v23  ;;  %v7605_v20 = vor.u32 %v3470_v4, %v3469_v40  ;;  %v3475_v45 = vor.u32 %v3474_v39, %v3473_v11  ;;  %v3497_v48 = vld [vmem:[#allocation3 + $0x1fc] ss:$8 sm:$0xf] }
 0x124   :  { %v3101_v27 = vcombine.low %v3056_v61, %v3084_v19  ;;  %v3102_v36 = vcombine.high %v3056_v61, %v3084_v19  ;;  %v2923_v37 = vcombine.high %v2921_v10, %v2921_v10  ;;  %v2937_v28 = vrot.slane %v2921_v10, %v6769_v18  ;;  %v3498_v33 = vld [vmem:[#allocation3 + $0x1fc] ss:$8 sm:$0x70] }
 0x125   :  { %v6246_v44 = vpack.c.bf16 %v3151_v30, %v3105_v17  ;;  %v3479_v26 = vor.u32 %v3478_v22, %v3477_v16  ;;  %v3483_v41 = vor.u32 %v3482_v25, %v3481_v24  ;;  %v3454_v52 = vld [vmem:[#allocation2 + $0x4] ss:$8 sm:$0xf]  ;;  %v3487_v53 = vor.u32 %v3486_v21, %v3485_v12 }
 0x126   :  { %v6248_v49 = vpack.c.bf16 %v3137_v23, %v3101_v27  ;;  %v6251_v14 = vpack.c.bf16 %v3153_v31, %v3102_v36  ;;  %v2951_v43 = vrot.slane %v2923_v37, %v6769_v18  ;;  %v2953_v51 = vcombine.high %v2937_v28, %v2937_v28  ;;  %v3455_v38 = vld [vmem:[#allocation2 + $0x4] ss:$8 sm:$0x70]  ;;  %3238 = vmatmul.mubr.f32.vlgmr.msra.gmra.mrb[12].mxu0 %v7580_v47 }
 0x127   :  { %6247 = vmatprep.subr.bf16.mxu0 %v6246_v44  ;;  %v3491_v54 = vor.u32 %v3490_v13, %v3489_v35  ;;  %v7610_v55 = vor.u32 %v3494_v42, %v3493_v29  ;;  %v3457_v56 = vld [vmem:[#allocation2 + $0x3c] ss:$8 sm:$0xf]  ;;  %3308 = vmatmul.mubr.f32.vlgmr.msra.gmra.mrb[12].mxu1 %v2952_v3  ;;  %v7612_v58 = vor.u32 %v3498_v33, %v3497_v48 }
 0x128   :  { %v3458_v57 = vld [vmem:[#allocation2 + $0x3c] ss:$8 sm:$0x70]  ;;  %6249 = vmatpush1.bf16.xpose.msra.mxu0 %v6248_v49  ;;  %v3567_v59 = vcombine.low %v7600_v2, %v7603_v32  ;;  %v3569_v46 = vcombine.low %v7605_v20, %v3475_v45  ;;  %6253 = vmatpush3.bf16.xpose.msk.msra.mxu1 %vm7383_vm2, %v6251_v14  ;;  %v3571_v47 = vcombine.low %v3479_v26, %v3483_v41  ;;  %v4057_v14 = vld [vmem:[#allocation3 + $0x5] ss:$8 sm:$0xf] }
 0x129   :  { %3377 = vmatprep.mubr.f32.mxu0 %v2951_v43  ;;  %v3573_v60 = vcombine.low %v3487_v53, %v3491_v54  ;;  %v7619_v62 = vor.u32 %v3455_v38, %v3454_v52  ;;  %v3702_v0 = vcombine.low %v7610_v55, %v7612_v58  ;;  %6159 = vmatprep.mubr.msk.f32.mxu1 %vm6383_vm3, %v6384_v50  ;;  %v4058_v43 = vld [vmem:[#allocation3 + $0x5] ss:$8 sm:$0x70] }
 0x12a   :  { %v3581_v6 = vrot.slane %v3567_v59, %v6769_v18  ;;  %v3595_v63 = vrot.slane %v3569_v46, %v6769_v18  ;;  %v7627_v3 = vor.u32 %v3458_v57, %v3457_v56  ;;  %v3609_v1 = vrot.slane %v3571_v47, %v6769_v18  ;;  %v4062_v56 = vld [vmem:[#allocation3 + $0x3d] ss:$8 sm:$0x70] }
 0x12b   :  { %v3623_v40 = vrot.slane %v3573_v60, %v6769_v18  ;;  %v3568_v4 = vcombine.high %v7600_v2, %v7603_v32  ;;  %v3570_v5 = vcombine.high %v7605_v20, %v3475_v45  ;;  %v3710_v8 = vrot.slane %v3702_v0, %v6769_v18  ;;  %v4065_v57 = vld [vmem:[#allocation3 + $0x75] ss:$8 sm:$0xf] }
 0x12c   :  { %v3632_v7 = vcombine.high %v3581_v6, %v3595_v63  ;;  %v3631_v11 = vcombine.low %v3581_v6, %v3595_v63  ;;  %v3502_v39 = vcombine.low %v7619_v62, %v7627_v3  ;;  %v3572_v9 = vcombine.high %v3479_v26, %v3483_v41  ;;  %v4066_v59 = vld [vmem:[#allocation3 + $0x75] ss:$8 sm:$0x70] }
 0x12d   :  { %v3636_v16 = vcombine.high %v3609_v1, %v3623_v40  ;;  %v3635_v22 = vcombine.low %v3609_v1, %v3623_v40  ;;  %v3574_v61 = vcombine.high %v3487_v53, %v3491_v54  ;;  %v3718_v24 = vcombine.high %v3710_v8, %v3710_v8  ;;  %v4061_v54 = vld [vmem:[#allocation3 + $0x3d] ss:$8 sm:$0xf] }
 0x12e   :  { %v3659_v23 = vrot.slane %v3632_v7, %v6769_v18  ;;  %v3645_v25 = vrot.slane %v3631_v11, %v6769_v18  ;;  %v3726_v17 = vrot.slane %v3710_v8, %v6769_v18  ;;  %v3510_v2 = vrot.slane %v3502_v39, %v6769_v18  ;;  %v4070_v60 = vld [vmem:[#allocation3 + $0xad] ss:$8 sm:$0x70] }
 0x12f   :  { %3378 = vmatmul.mubr.f32.vlgmr.msra.gmra.mrb[14].mxu0 %v2937_v28  ;;  %v3687_v19 = vrot.slane %v3636_v16, %v6769_v18  ;;  %v3673_v10 = vrot.slane %v3635_v22, %v6769_v18  ;;  %v3588_v12 = vrot.slane %v3568_v4, %v6769_v18  ;;  %v3740_v21 = vrot.slane %v3718_v24, %v6769_v18  ;;  %v4073_v1 = vld [vmem:[#allocation3 + $0xe5] ss:$8 sm:$0xf] }
 0x130   :  { %6160 = vmatmul.mubr.msk.f32.vlgmr.msra.gmra.mrb[14].mxu1 %vm1426_vm1, %v2953_v51  ;;  %v3748_v30 = vcombine.high %v3726_v17, %v3726_v17  ;;  %v3602_v31 = vrot.slane %v3570_v5, %v6769_v18  ;;  %v3616_v32 = vrot.slane %v3572_v9, %v6769_v18  ;;  %v3518_v37 = vcombine.high %v3510_v2, %v3510_v2  ;;  %v4074_v40 = vld [vmem:[#allocation3 + $0xe5] ss:$8 sm:$0x70] }
 0x131   :  { %v3699_v20 = vcombine.low %v3659_v23, %v3687_v19  ;;  %v3695_v35 = vcombine.low %v3645_v25, %v3673_v10  ;;  %v3700_v13 = vcombine.high %v3659_v23, %v3687_v19  ;;  %v3696_v27 = vcombine.high %v3645_v25, %v3673_v10  ;;  %v4077_v4 = vld [vmem:[#allocation3 + $0x11d] ss:$8 sm:$0xf] }
 0x132   :  { %v3750_v36 = vcombine.high %v3740_v21, %v3740_v21  ;;  %v7649_v28 = vrot.slane %v3510_v2, %v6769_v18  ;;  %v3630_v29 = vrot.slane %v3574_v61, %v6769_v18  ;;  %v3634_v26 = vcombine.high %v3588_v12, %v3602_v31  ;;  %v4078_v5 = vld [vmem:[#allocation3 + $0x11d] ss:$8 sm:$0x70] }
 0x133   :  { %v6254_v42 = vpack.c.bf16 %v3740_v21, %v3699_v20  ;;  %v6256_v44 = vpack.c.bf16 %v3726_v17, %v3695_v35  ;;  %v6260_v45 = vpack.c.bf16 %v3748_v30, %v3696_v27  ;;  %v3540_v48 = vrot.slane %v3518_v37, %v6769_v18  ;;  %v4081_v39 = vld [vmem:[#allocation3 + $0x155] ss:$8 sm:$0xf] }
 0x134   :  { %v6258_v41 = vpack.c.bf16 %v3750_v36, %v3700_v13  ;;  %v3638_v33 = vcombine.high %v3616_v32, %v3630_v29  ;;  %v3703_v49 = vcombine.high %v7610_v55, %v7612_v58  ;;  %v3666_v51 = vrot.slane %v3634_v26, %v6769_v18  ;;  %v4069_v58 = vld [vmem:[#allocation3 + $0xad] ss:$8 sm:$0xf] }
 0x135   :  { %6255 = vmatprep.subr.bf16.mxu0 %v6254_v42  ;;  %v3548_v52 = vcombine.high %v7649_v28, %v7649_v28  ;;  %v3633_v38 = vcombine.low %v3588_v12, %v3602_v31  ;;  %v3637_v53 = vcombine.low %v3616_v32, %v3630_v29  ;;  %v3550_v46 = vcombine.high %v3540_v48, %v3540_v48  ;;  %v4082_v16 = vld [vmem:[#allocation3 + $0x155] ss:$8 sm:$0x70] }
 0x136   :  { %6257 = vmatpush1.bf16.xpose.msra.mxu0 %v6256_v44  ;;  %6259 = vmatprep.subr.bf16.mxu1 %v6258_v41  ;;  %v3694_v47 = vrot.slane %v3638_v33, %v6769_v18  ;;  %v3717_v55 = vrot.slane %v3703_v49, %v6769_v18  ;;  %v3503_v0 = vcombine.high %v7619_v62, %v7627_v3  ;;  %v4085_v62 = vld [vmem:[#allocation3 + $0x18d] ss:$8 sm:$0xf] }
 0x137   :  { %6261 = vmatpush1.bf16.xpose.msra.mxu1 %v6260_v45  ;;  %3833 = vmatprep.mubr.f32.mxu0 %v3540_v48  ;;  %v3652_v6 = vrot.slane %v3633_v38, %v6769_v18  ;;  %v3680_v63 = vrot.slane %v3637_v53, %v6769_v18  ;;  %v7667_v23 = vor.u32 %v4058_v43, %v4057_v14  ;;  %v4086_v3 = vld [vmem:[#allocation3 + $0x18d] ss:$8 sm:$0x70] }
 0x138   :  { %3903 = vmatprep.mubr.f32.mxu1 %v3550_v46  ;;  %v3701_v7 = vcombine.low %v3666_v51, %v3694_v47  ;;  %v3719_v8 = vcombine.high %v3717_v55, %v3717_v55  ;;  %v3733_v11 = vrot.slane %v3717_v55, %v6769_v18  ;;  %6266 = vmatprep.subr.bf16.mxu1 %v6382_v15  ;;  %v4089_v10 = vld [vmem:[#allocation3 + $0x1c5] ss:$8 sm:$0xf] }
 0x139   :  { %v3697_v22 = vcombine.low %v3652_v6, %v3680_v63  ;;  %v3698_v9 = vcombine.high %v3652_v6, %v3680_v63  ;;  %v3517_v61 = vrot.slane %v3503_v0, %v6769_v18  ;;  %v7670_v17 = vor.u32 %v4062_v56, %v4061_v54  ;;  %v4090_v2 = vld [vmem:[#allocation3 + $0x1c5] ss:$8 sm:$0x70] }
 0x13a   :  { %v3747_v24 = vrot.slane %v3719_v8, %v6769_v18  ;;  %v3749_v25 = vcombine.high %v3733_v11, %v3733_v11  ;;  %v7672_v19 = vor.u32 %v4066_v59, %v4065_v57  ;;  %v7675_v31 = vor.u32 %v4070_v60, %v4069_v58  ;;  %v4093_v32 = vld [vmem:[#allocation3 + $0x1fd] ss:$8 sm:$0xf] }
 0x13b   :  { %v6264_v12 = vpack.c.bf16 %v3733_v11, %v3697_v22  ;;  %v3519_v21 = vcombine.high %v3517_v61, %v3517_v61  ;;  %v3533_v30 = vrot.slane %v3517_v61, %v6769_v18  ;;  %v4094_v20 = vld [vmem:[#allocation3 + $0x1fd] ss:$8 sm:$0x70]  ;;  %v7677_v27 = vor.u32 %v4074_v40, %v4073_v1 }
 0x13c   :  { %v6262_v35 = vpack.c.bf16 %v3747_v24, %v3701_v7  ;;  %v6267_v13 = vpack.c.bf16 %v3749_v25, %v3698_v9  ;;  %v7679_v36 = vor.u32 %v4078_v5, %v4077_v4  ;;  %v4083_v42 = vor.u32 %v4082_v16, %v4081_v39  ;;  %v4050_v45 = vld [vmem:[#allocation2 + $0x5] ss:$8 sm:$0xf] }
 0x13d   :  { %3834 = vmatmul.mubr.f32.vlgmr.msra.gmra.mrb[16].mxu0 %v7649_v28  ;;  %v3547_v37 = vrot.slane %v3519_v21, %v6769_v18  ;;  %v3549_v29 = vcombine.high %v3533_v30, %v3533_v30  ;;  %v4087_v44 = vor.u32 %v4086_v3, %v4085_v62  ;;  %v4051_v26 = vld [vmem:[#allocation2 + $0x5] ss:$8 sm:$0x70]  ;;  %v7683_v41 = vor.u32 %v4090_v2, %v4089_v10 }
 0x13e   :  { %6263 = vmatprep.subr.bf16.mxu0 %v6262_v35  ;;  %3904 = vmatmul.mubr.f32.vlgmr.msra.gmra.mrb[16].mxu1 %v3548_v52  ;;  %v7685_v48 = vor.u32 %v4094_v20, %v4093_v32  ;;  %v4163_v33 = vcombine.low %v7667_v23, %v7670_v17  ;;  %v4053_v49 = vld [vmem:[#allocation2 + $0x3d] ss:$8 sm:$0xf]  ;;  %v4165_v28 = vcombine.low %v7672_v19, %v7675_v31  ;;  %v4653_v35 = vld [vmem:[#allocation3 + $0x6] ss:$8 sm:$0xf] }
 0x13f   :  { %v4054_v14 = vld [vmem:[#allocation2 + $0x3d] ss:$8 sm:$0x70]  ;;  %6265 = vmatpush1.bf16.xpose.msra.mxu0 %v6264_v12  ;;  %6269 = vmatpush3.bf16.xpose.msk.msra.mxu1 %vm7383_vm2, %v6267_v13  ;;  %v4167_v43 = vcombine.low %v7677_v27, %v7679_v36  ;;  %v4169_v51 = vcombine.low %v4083_v42, %v4087_v44  ;;  %v7700_v53 = vor.u32 %v4051_v26, %v4050_v45  ;;  %v4654_v13 = vld [vmem:[#allocation3 + $0x6] ss:$8 sm:$0x70] }
 0x140   :  { %3973 = vmatprep.mubr.f32.mxu0 %v3547_v37  ;;  %v4177_v52 = vrot.slane %v4163_v33, %v6769_v18  ;;  %v4298_v38 = vcombine.low %v7683_v41, %v7685_v48  ;;  %6166 = vmatprep.mubr.msk.f32.mxu1 %vm6383_vm3, %v6384_v50  ;;  %v4191_v54 = vrot.slane %v4165_v28, %v6769_v18  ;;  %v4665_v28 = vld [vmem:[#allocation3 + $0xae] ss:$8 sm:$0xf] }
 0x141   :  { %v4205_v56 = vrot.slane %v4167_v43, %v6769_v18  ;;  %v4219_v57 = vrot.slane %v4169_v51, %v6769_v18  ;;  %v7705_v59 = vor.u32 %v4054_v14, %v4053_v49  ;;  %v4164_v47 = vcombine.high %v7667_v23, %v7670_v17  ;;  %v4661_v49 = vld [vmem:[#allocation3 + $0x76] ss:$8 sm:$0xf] }
 0x142   :  { %v4306_v46 = vrot.slane %v4298_v38, %v6769_v18  ;;  %v4166_v55 = vcombine.high %v7672_v19, %v7675_v31  ;;  %v4168_v58 = vcombine.high %v7677_v27, %v7679_v36  ;;  %v4228_v60 = vcombine.high %v4177_v52, %v4191_v54  ;;  %v4662_v14 = vld [vmem:[#allocation3 + $0x76] ss:$8 sm:$0x70] }
 0x143   :  { %v4232_v6 = vcombine.high %v4205_v56, %v4219_v57  ;;  %v4227_v63 = vcombine.low %v4177_v52, %v4191_v54  ;;  %v4231_v0 = vcombine.low %v4205_v56, %v4219_v57  ;;  %v4098_v4 = vcombine.low %v7700_v53, %v7705_v59  ;;  %v4666_v43 = vld [vmem:[#allocation3 + $0xae] ss:$8 sm:$0x70] }
 0x144   :  { %v4314_v1 = vcombine.high %v4306_v46, %v4306_v46  ;;  %v4322_v40 = vrot.slane %v4306_v46, %v6769_v18  ;;  %v4170_v5 = vcombine.high %v4083_v42, %v4087_v44  ;;  %v4255_v7 = vrot.slane %v4228_v60, %v6769_v18  ;;  %v4657_v42 = vld [vmem:[#allocation3 + $0x3e] ss:$8 sm:$0xf] }
 0x145   :  { %v4283_v8 = vrot.slane %v4232_v6, %v6769_v18  ;;  %v4241_v11 = vrot.slane %v4227_v63, %v6769_v18  ;;  %v4269_v39 = vrot.slane %v4231_v0, %v6769_v18  ;;  %v4106_v9 = vrot.slane %v4098_v4, %v6769_v18  ;;  %v4658_v44 = vld [vmem:[#allocation3 + $0x3e] ss:$8 sm:$0x70] }
 0x146   :  { %3974 = vmatmul.mubr.f32.vlgmr.msra.gmra.mrb[18].mxu0 %v3533_v30  ;;  %v4336_v16 = vrot.slane %v4314_v1, %v6769_v18  ;;  %6167 = vmatmul.mubr.msk.f32.vlgmr.msra.gmra.mrb[18].mxu1 %vm1426_vm1, %v3549_v29  ;;  %v4344_v22 = vcombine.high %v4322_v40, %v4322_v40  ;;  %v4184_v19 = vrot.slane %v4164_v47, %v6769_v18  ;;  %v4669_v52 = vld [vmem:[#allocation3 + $0xe6] ss:$8 sm:$0xf] }
 0x147   :  { %v4295_v61 = vcombine.low %v4255_v7, %v4283_v8  ;;  %v4291_v23 = vcombine.low %v4241_v11, %v4269_v39  ;;  %v4296_v62 = vcombine.high %v4255_v7, %v4283_v8  ;;  %v4292_v3 = vcombine.high %v4241_v11, %v4269_v39  ;;  %v4670_v38 = vld [vmem:[#allocation3 + $0xe6] ss:$8 sm:$0x70] }
 0x148   :  { %v4346_v24 = vcombine.high %v4336_v16, %v4336_v16  ;;  %v4114_v25 = vcombine.high %v4106_v9, %v4106_v9  ;;  %v7725_v17 = vrot.slane %v4106_v9, %v6769_v18  ;;  %v4198_v21 = vrot.slane %v4166_v55, %v6769_v18  ;;  %v4673_v46 = vld [vmem:[#allocation3 + $0x11e] ss:$8 sm:$0xf] }
 0x149   :  { %v6270_v10 = vpack.c.bf16 %v4336_v16, %v4295_v61  ;;  %v6272_v2 = vpack.c.bf16 %v4322_v40, %v4291_v23  ;;  %v6276_v12 = vpack.c.bf16 %v4344_v22, %v4292_v3  ;;  %v4212_v32 = vrot.slane %v4168_v58, %v6769_v18  ;;  %v4674_v47 = vld [vmem:[#allocation3 + $0x11e] ss:$8 sm:$0x70] }
 0x14a   :  { %v6274_v30 = vpack.c.bf16 %v4346_v24, %v4296_v62  ;;  %v4136_v31 = vrot.slane %v4114_v25, %v6769_v18  ;;  %v4226_v20 = vrot.slane %v4170_v5, %v6769_v18  ;;  %v4230_v27 = vcombine.high %v4184_v19, %v4198_v21  ;;  %v4677_v63 = vld [vmem:[#allocation3 + $0x156] ss:$8 sm:$0xf] }
 0x14b   :  { %6271 = vmatprep.subr.bf16.mxu0 %v6270_v10  ;;  %v4299_v36 = vcombine.high %v7683_v41, %v7685_v48  ;;  %v4144_v37 = vcombine.high %v7725_v17, %v7725_v17  ;;  %v4229_v29 = vcombine.low %v4184_v19, %v4198_v21  ;;  %v4099_v57 = vcombine.high %v7700_v53, %v7705_v59  ;;  %v4678_v0 = vld [vmem:[#allocation3 + $0x156] ss:$8 sm:$0x70] }
 0x14c   :  { %6273 = vmatpush1.bf16.xpose.msra.mxu0 %v6272_v2  ;;  %6275 = vmatprep.subr.bf16.mxu1 %v6274_v30  ;;  %v4146_v45 = vcombine.high %v4136_v31, %v4136_v31  ;;  %v4234_v26 = vcombine.high %v4212_v32, %v4226_v20  ;;  %v4233_v33 = vcombine.low %v4212_v32, %v4226_v20  ;;  %v4681_v7 = vld [vmem:[#allocation3 + $0x18e] ss:$8 sm:$0xf] }
 0x14d   :  { %6277 = vmatpush1.bf16.xpose.msra.mxu1 %v6276_v12  ;;  %4429 = vmatprep.mubr.f32.mxu0 %v4136_v31  ;;  %v4262_v51 = vrot.slane %v4230_v27, %v6769_v18  ;;  %v4313_v41 = vrot.slane %v4299_v36, %v6769_v18  ;;  %v4248_v48 = vrot.slane %v4229_v29, %v6769_v18  ;;  %v4682_v8 = vld [vmem:[#allocation3 + $0x18e] ss:$8 sm:$0x70] }
 0x14e   :  { %4499 = vmatprep.mubr.f32.mxu1 %v4146_v45  ;;  %v4290_v54 = vrot.slane %v4234_v26, %v6769_v18  ;;  %v4276_v56 = vrot.slane %v4233_v33, %v6769_v18  ;;  %6282 = vmatprep.subr.bf16.mxu1 %v6382_v15  ;;  %v7745_v60 = vor.u32 %v4654_v13, %v4653_v35  ;;  %v4685_v16 = vld [vmem:[#allocation3 + $0x1c6] ss:$8 sm:$0xf] }
 0x14f   :  { %v4315_v55 = vcombine.high %v4313_v41, %v4313_v41  ;;  %v4329_v58 = vrot.slane %v4313_v41, %v6769_v18  ;;  %v7747_v6 = vor.u32 %v4658_v44, %v4657_v42  ;;  %v4113_v5 = vrot.slane %v4099_v57, %v6769_v18  ;;  %v4686_v22 = vld [vmem:[#allocation3 + $0x1c6] ss:$8 sm:$0x70] }
 0x150   :  { %v4297_v1 = vcombine.low %v4262_v51, %v4290_v54  ;;  %v4293_v40 = vcombine.low %v4248_v48, %v4276_v56  ;;  %v4294_v4 = vcombine.high %v4248_v48, %v4276_v56  ;;  %v7751_v11 = vor.u32 %v4662_v14, %v4661_v49  ;;  %v4689_v3 = vld [vmem:[#allocation3 + $0x1fe] ss:$8 sm:$0xf] }
 0x151   :  { %v4343_v53 = vrot.slane %v4315_v55, %v6769_v18  ;;  %v4345_v59 = vcombine.high %v4329_v58, %v4329_v58  ;;  %v7753_v39 = vor.u32 %v4666_v43, %v4665_v28  ;;  %v4115_v61 = vcombine.high %v4113_v5, %v4113_v5  ;;  %v4690_v24 = vld [vmem:[#allocation3 + $0x1fe] ss:$8 sm:$0x70] }
 0x152   :  { %v6280_v9 = vpack.c.bf16 %v4329_v58, %v4293_v40  ;;  %v4129_v23 = vrot.slane %v4113_v5, %v6769_v18  ;;  %v4671_v62 = vor.u32 %v4670_v38, %v4669_v52  ;;  %v4675_v10 = vor.u32 %v4674_v47, %v4673_v46  ;;  %v4646_v12 = vld [vmem:[#allocation2 + $0x6] ss:$8 sm:$0xf] }
 0x153   :  { %4430 = vmatmul.mubr.f32.vlgmr.msra.gmra.mrb[20].mxu0 %v7725_v17  ;;  %v6278_v25 = vpack.c.bf16 %v4343_v53, %v4297_v1  ;;  %v6283_v19 = vpack.c.bf16 %v4345_v59, %v4294_v4  ;;  %v4679_v2 = vor.u32 %v4678_v0, %v4677_v63  ;;  %v4647_v21 = vld [vmem:[#allocation2 + $0x6] ss:$8 sm:$0x70]  ;;  %v4143_v30 = vrot.slane %v4115_v61, %v6769_v18 }
 0x154   :  { %4500 = vmatmul.mubr.f32.vlgmr.msra.gmra.mrb[20].mxu1 %v4144_v37  ;;  %v4145_v31 = vcombine.high %v4129_v23, %v4129_v23  ;;  %v4683_v32 = vor.u32 %v4682_v8, %v4681_v7  ;;  %v7758_v20 = vor.u32 %v4686_v22, %v4685_v16  ;;  %v4649_v35 = vld [vmem:[#allocation2 + $0x3e] ss:$8 sm:$0xf]  ;;  %v7762_v17 = vor.u32 %v4690_v24, %v4689_v3 }
 0x155   :  { %v4650_v13 = vld [vmem:[#allocation2 + $0x3e] ss:$8 sm:$0x70]  ;;  %6279 = vmatprep.subr.bf16.mxu0 %v6278_v25  ;;  %6285 = vmatpush3.bf16.xpose.msk.msra.mxu1 %vm7383_vm2, %v6283_v19  ;;  %v4759_v27 = vcombine.low %v7745_v60, %v7747_v6  ;;  %v4761_v36 = vcombine.low %v7751_v11, %v7753_v39  ;;  %v4763_v37 = vcombine.low %v4671_v62, %v4675_v10 }
 0x156   :  { %6281 = vmatpush1.bf16.xpose.msra.mxu0 %v6280_v9  ;;  %4569 = vmatprep.mubr.f32.mxu0 %v4143_v30  ;;  %v4765_v29 = vcombine.low %v4679_v2, %v4683_v32  ;;  %v7768_v42 = vor.u32 %v4647_v21, %v4646_v12  ;;  %v4894_v26 = vcombine.low %v7758_v20, %v7762_v17 }
 0x157   :  { %v4773_v44 = vrot.slane %v4759_v27, %v6769_v18  ;;  %v4787_v45 = vrot.slane %v4761_v36, %v6769_v18  ;;  %6173 = vmatprep.mubr.msk.f32.mxu1 %vm6383_vm3, %v6384_v50  ;;  %v7776_v33 = vor.u32 %v4650_v13, %v4649_v35  ;;  %v4801_v49 = vrot.slane %v4763_v37, %v6769_v18  ;;  %v5254_v35 = vld [vmem:[#allocation3 + $0x3f] ss:$8 sm:$0x70] }
 0x158   :  { %v4815_v14 = vrot.slane %v4765_v29, %v6769_v18  ;;  %v4760_v28 = vcombine.high %v7745_v60, %v7747_v6  ;;  %v4762_v43 = vcombine.high %v7751_v11, %v7753_v39  ;;  %v4902_v41 = vrot.slane %v4894_v26, %v6769_v18  ;;  %v5257_v13 = vld [vmem:[#allocation3 + $0x77] ss:$8 sm:$0xf] }
 0x159   :  { %v4824_v51 = vcombine.high %v4773_v44, %v4787_v45  ;;  %v4823_v48 = vcombine.low %v4773_v44, %v4787_v45  ;;  %v4694_v52 = vcombine.low %v7768_v42, %v7776_v33  ;;  %v4764_v56 = vcombine.high %v4671_v62, %v4675_v10  ;;  %v5249_v10 = vld [vmem:[#allocation3 + $0x7] ss:$8 sm:$0xf] }
 0x15a   :  { %v4828_v38 = vcombine.high %v4801_v49, %v4815_v14  ;;  %v4827_v54 = vcombine.low %v4801_v49, %v4815_v14  ;;  %v4766_v57 = vcombine.high %v4679_v2, %v4683_v32  ;;  %v4910_v47 = vcombine.high %v4902_v41, %v4902_v41  ;;  %v5250_v2 = vld [vmem:[#allocation3 + $0x7] ss:$8 sm:$0x70] }
 0x15b   :  { %v4851_v46 = vrot.slane %v4824_v51, %v6769_v18  ;;  %v4837_v55 = vrot.slane %v4823_v48, %v6769_v18  ;;  %v4918_v58 = vrot.slane %v4902_v41, %v6769_v18  ;;  %v4702_v63 = vrot.slane %v4694_v52, %v6769_v18  ;;  %v5253_v32 = vld [vmem:[#allocation3 + $0x3f] ss:$8 sm:$0xf] }
 0x15c   :  { %v4879_v60 = vrot.slane %v4828_v38, %v6769_v18  ;;  %v4865_v6 = vrot.slane %v4827_v54, %v6769_v18  ;;  %6174 = vmatmul.mubr.msk.f32.vlgmr.msra.gmra.mrb[22].mxu1 %vm1426_vm1, %v4145_v31  ;;  %v4780_v0 = vrot.slane %v4760_v28, %v6769_v18  ;;  %v4932_v1 = vrot.slane %v4910_v47, %v6769_v18  ;;  %v5258_v27 = vld [vmem:[#allocation3 + $0x77] ss:$8 sm:$0x70] }
 0x15d   :  { %4570 = vmatmul.mubr.f32.vlgmr.msra.gmra.mrb[22].mxu0 %v4129_v23  ;;  %v4940_v40 = vcombine.high %v4918_v58, %v4918_v58  ;;  %v4794_v4 = vrot.slane %v4762_v43, %v6769_v18  ;;  %v4808_v5 = vrot.slane %v4764_v56, %v6769_v18  ;;  %v4710_v39 = vcombine.high %v4702_v63, %v4702_v63  ;;  %v5262_v29 = vld [vmem:[#allocation3 + $0xaf] ss:$8 sm:$0x70] }
 0x15e   :  { %v4891_v7 = vcombine.low %v4851_v46, %v4879_v60  ;;  %v4887_v8 = vcombine.low %v4837_v55, %v4865_v6  ;;  %v4892_v53 = vcombine.high %v4851_v46, %v4879_v60  ;;  %v4888_v59 = vcombine.high %v4837_v55, %v4865_v6  ;;  %v5265_v49 = vld [vmem:[#allocation3 + $0xe7] ss:$8 sm:$0xf] }
 0x15f   :  { %v4942_v11 = vcombine.high %v4932_v1, %v4932_v1  ;;  %v7799_v16 = vrot.slane %v4702_v63, %v6769_v18  ;;  %v4822_v22 = vrot.slane %v4766_v57, %v6769_v18  ;;  %v4826_v62 = vcombine.high %v4780_v0, %v4794_v4  ;;  %v5266_v14 = vld [vmem:[#allocation3 + $0xe7] ss:$8 sm:$0x70] }
 0x160   :  { %v6286_v9 = vpack.c.bf16 %v4932_v1, %v4891_v7  ;;  %v6288_v61 = vpack.c.bf16 %v4918_v58, %v4887_v8  ;;  %v6292_v23 = vpack.c.bf16 %v4940_v40, %v4888_v59  ;;  %v4732_v24 = vrot.slane %v4710_v39, %v6769_v18  ;;  %v5269_v28 = vld [vmem:[#allocation3 + $0x11f] ss:$8 sm:$0xf] }
 0x161   :  { %v6290_v3 = vpack.c.bf16 %v4942_v11, %v4892_v53  ;;  %v4830_v25 = vcombine.high %v4808_v5, %v4822_v22  ;;  %v4895_v19 = vcombine.high %v7758_v20, %v7762_v17  ;;  %v4858_v12 = vrot.slane %v4826_v62, %v6769_v18  ;;  %v5261_v17 = vld [vmem:[#allocation3 + $0xaf] ss:$8 sm:$0xf] }
 0x162   :  { %6287 = vmatprep.subr.bf16.mxu0 %v6286_v9  ;;  %v4740_v21 = vcombine.high %v7799_v16, %v7799_v16  ;;  %v4825_v30 = vcombine.low %v4780_v0, %v4794_v4  ;;  %v4829_v31 = vcombine.low %v4808_v5, %v4822_v22  ;;  %v4742_v36 = vcombine.high %v4732_v24, %v4732_v24  ;;  %v5270_v43 = vld [vmem:[#allocation3 + $0x11f] ss:$8 sm:$0x70] }
 0x163   :  { %6289 = vmatpush1.bf16.xpose.msra.mxu0 %v6288_v61  ;;  %6291 = vmatprep.subr.bf16.mxu1 %v6290_v3  ;;  %v4886_v37 = vrot.slane %v4830_v25, %v6769_v18  ;;  %v4909_v20 = vrot.slane %v4895_v19, %v6769_v18  ;;  %v4695_v26 = vcombine.high %v7768_v42, %v7776_v33  ;;  %v5273_v52 = vld [vmem:[#allocation3 + $0x157] ss:$8 sm:$0xf] }
 0x164   :  { %6293 = vmatpush1.bf16.xpose.msra.mxu1 %v6292_v23  ;;  %5025 = vmatprep.mubr.f32.mxu0 %v4732_v24  ;;  %v4844_v44 = vrot.slane %v4825_v30, %v6769_v18  ;;  %v4872_v45 = vrot.slane %v4829_v31, %v6769_v18  ;;  %v5274_v38 = vld [vmem:[#allocation3 + $0x157] ss:$8 sm:$0x70]  ;;  %v7817_v46 = vor.u32 %v5250_v2, %v5249_v10 }
 0x165   :  { %5095 = vmatprep.mubr.f32.mxu1 %v4742_v36  ;;  %v4893_v51 = vcombine.low %v4858_v12, %v4886_v37  ;;  %v4911_v41 = vcombine.high %v4909_v20, %v4909_v20  ;;  %v4925_v48 = vrot.slane %v4909_v20, %v6769_v18  ;;  %6298 = vmatprep.subr.bf16.mxu1 %v6382_v15  ;;  %v5277_v42 = vld [vmem:[#allocation3 + $0x18f] ss:$8 sm:$0xf] }
 0x166   :  { %v4889_v54 = vcombine.low %v4844_v44, %v4872_v45  ;;  %v4890_v56 = vcombine.high %v4844_v44, %v4872_v45  ;;  %v4709_v57 = vrot.slane %v4695_v26, %v6769_v18  ;;  %v5278_v33 = vld [vmem:[#allocation3 + $0x18f] ss:$8 sm:$0x70]  ;;  %v7820_v58 = vor.u32 %v5254_v35, %v5253_v32 }
 0x167   :  { %v4939_v47 = vrot.slane %v4911_v41, %v6769_v18  ;;  %v4941_v55 = vcombine.high %v4925_v48, %v4925_v48  ;;  %v7822_v60 = vor.u32 %v5258_v27, %v5257_v13  ;;  %v5281_v6 = vld [vmem:[#allocation3 + $0x1c7] ss:$8 sm:$0xf]  ;;  %v7825_v4 = vor.u32 %v5262_v29, %v5261_v17 }
 0x168   :  { %v5282_v63 = vld [vmem:[#allocation3 + $0x1c7] ss:$8 sm:$0x70]  ;;  %v6296_v0 = vpack.c.bf16 %v4925_v48, %v4889_v54  ;;  %v4711_v1 = vcombine.high %v4709_v57, %v4709_v57  ;;  %v4725_v40 = vrot.slane %v4709_v57, %v6769_v18  ;;  %v7827_v59 = vor.u32 %v5266_v14, %v5265_v49 }
 0x169   :  { %v5285_v5 = vld [vmem:[#allocation3 + $0x1ff] ss:$8 sm:$0xf]  ;;  %v6294_v8 = vpack.c.bf16 %v4939_v47, %v4893_v51  ;;  %v6299_v53 = vpack.c.bf16 %v4941_v55, %v4890_v56  ;;  %v7829_v11 = vor.u32 %v5270_v43, %v5269_v28  ;;  %v5275_v9 = vor.u32 %v5274_v38, %v5273_v52 }
 0x16a   :  { %v5286_v7 = vld [vmem:[#allocation3 + $0x1ff] ss:$8 sm:$0x70]  ;;  %5026 = vmatmul.mubr.f32.vlgmr.msra.gmra.mrb[24].mxu0 %v7799_v16  ;;  %v4739_v39 = vrot.slane %v4711_v1, %v6769_v18  ;;  %v4741_v22 = vcombine.high %v4725_v40, %v4725_v40  ;;  %v5279_v61 = vor.u32 %v5278_v33, %v5277_v42  ;;  %v7833_v3 = vor.u32 %v5282_v63, %v5281_v6 }
 0x16b   :  { %v5242_v23 = vld [vmem:[#allocation2 + $0x7] ss:$8 sm:$0xf]  ;;  %6295 = vmatprep.subr.bf16.mxu0 %v6294_v8  ;;  %5096 = vmatmul.mubr.f32.vlgmr.msra.gmra.mrb[24].mxu1 %v4740_v21  ;;  %v7835_v24 = vor.u32 %v5286_v7, %v5285_v5  ;;  %v5355_v25 = vcombine.low %v7817_v46, %v7820_v58  ;;  %v5357_v16 = vcombine.low %v7822_v60, %v7825_v4 }
 0x16c   :  { %v5243_v62 = vld [vmem:[#allocation2 + $0x7] ss:$8 sm:$0x70]  ;;  %6297 = vmatpush1.bf16.xpose.msra.mxu0 %v6296_v0  ;;  %6301 = vmatpush3.bf16.xpose.msk.msra.mxu1 %vm7383_vm2, %v6299_v53  ;;  %v5359_v2 = vcombine.low %v7827_v59, %v7829_v11  ;;  %v5361_v12 = vcombine.low %v5275_v9, %v5279_v61  ;;  %v5356_v37 = vcombine.high %v7817_v46, %v7820_v58 }
 0x16d   :  { %v5245_v19 = vld [vmem:[#allocation2 + $0x3f] ss:$8 sm:$0xf]  ;;  %5165 = vmatprep.mubr.f32.mxu0 %v4739_v39  ;;  %v5369_v21 = vrot.slane %v5355_v25, %v6769_v18  ;;  %v5490_v30 = vcombine.low %v7833_v3, %v7835_v24  ;;  %6180 = vmatprep.mubr.msk.f32.mxu1 %vm6383_vm3, %v6384_v50  ;;  %v7850_v31 = vor.u32 %v5243_v62, %v5242_v23 }
 0x16e   :  { %v5246_v10 = vld [vmem:[#allocation2 + $0x3f] ss:$8 sm:$0x70]  ;;  %v5383_v32 = vrot.slane %v5357_v16, %v6769_v18  ;;  %v5397_v35 = vrot.slane %v5359_v2, %v6769_v18  ;;  %v5411_v13 = vrot.slane %v5361_v12, %v6769_v18  ;;  %v5358_v20 = vcombine.high %v7822_v60, %v7825_v4 }
 0x16f   :  { %v7855_v27 = vor.u32 %v5246_v10, %v5245_v19  ;;  %v5498_v36 = vrot.slane %v5490_v30, %v6769_v18  ;;  %v5360_v17 = vcombine.high %v7827_v59, %v7829_v11  ;;  %v5362_v43 = vcombine.high %v5275_v9, %v5279_v61 }
 0x170   :  { %v5420_v29 = vcombine.high %v5369_v21, %v5383_v32  ;;  %v5424_v44 = vcombine.high %v5397_v35, %v5411_v13  ;;  %v5419_v45 = vcombine.low %v5369_v21, %v5383_v32  ;;  %v5423_v26 = vcombine.low %v5397_v35, %v5411_v13 }
 0x171   :  { %v5506_v49 = vcombine.high %v5498_v36, %v5498_v36  ;;  %v5514_v14 = vrot.slane %v5498_v36, %v6769_v18  ;;  %v5290_v28 = vcombine.low %v7850_v31, %v7855_v27  ;;  %v5376_v58 = vrot.slane %v5356_v37, %v6769_v18 }
 0x172   :  { %v5447_v51 = vrot.slane %v5420_v29, %v6769_v18  ;;  %v5475_v41 = vrot.slane %v5424_v44, %v6769_v18  ;;  %v5433_v48 = vrot.slane %v5419_v45, %v6769_v18  ;;  %v5461_v52 = vrot.slane %v5423_v26, %v6769_v18 }
 0x173   :  { %5166 = vmatmul.mubr.f32.vlgmr.msra.gmra.mrb[26].mxu0 %v4725_v40  ;;  %v5528_v38 = vrot.slane %v5506_v49, %v6769_v18  ;;  %6181 = vmatmul.mubr.msk.f32.vlgmr.msra.gmra.mrb[26].mxu1 %vm1426_vm1, %v4741_v22  ;;  %v5536_v54 = vcombine.high %v5514_v14, %v5514_v14  ;;  %v5298_v56 = vrot.slane %v5290_v28, %v6769_v18 }
 0x174   :  { %v5487_v57 = vcombine.low %v5447_v51, %v5475_v41  ;;  %v5483_v46 = vcombine.low %v5433_v48, %v5461_v52  ;;  %v5488_v42 = vcombine.high %v5447_v51, %v5475_v41  ;;  %v5484_v33 = vcombine.high %v5433_v48, %v5461_v52 }
 0x175   :  { %v5538_v47 = vcombine.high %v5528_v38, %v5528_v38  ;;  %v5306_v55 = vcombine.high %v5298_v56, %v5298_v56  ;;  %v5390_v0 = vrot.slane %v5358_v20, %v6769_v18  ;;  %v5404_v4 = vrot.slane %v5360_v17, %v6769_v18 }
 0x176   :  { %v6302_v60 = vpack.c.bf16 %v5528_v38, %v5487_v57  ;;  %v6304_v6 = vpack.c.bf16 %v5514_v14, %v5483_v46  ;;  %v6308_v63 = vpack.c.bf16 %v5536_v54, %v5484_v33  ;;  %v5418_v5 = vrot.slane %v5362_v43, %v6769_v18 }
 0x177   :  { %v6306_v1 = vpack.c.bf16 %v5538_v47, %v5488_v42  ;;  %v5328_v40 = vrot.slane %v5306_v55, %v6769_v18  ;;  %v5314_v7 = vrot.slane %v5298_v56, %v6769_v18  ;;  %v5422_v8 = vcombine.high %v5376_v58, %v5390_v0 }
 0x178   :  { %6303 = vmatprep.subr.bf16.mxu0 %v6302_v60  ;;  %v5491_v53 = vcombine.high %v7833_v3, %v7835_v24  ;;  %v5421_v59 = vcombine.low %v5376_v58, %v5390_v0  ;;  %v5426_v39 = vcombine.high %v5404_v4, %v5418_v5  ;;  %v5425_v22 = vcombine.low %v5404_v4, %v5418_v5 }
 0x179   :  { %6305 = vmatpush1.bf16.xpose.msra.mxu0 %v6304_v6  ;;  %6307 = vmatprep.subr.bf16.mxu1 %v6306_v1  ;;  %v5338_v11 = vcombine.high %v5328_v40, %v5328_v40  ;;  %v5454_v9 = vrot.slane %v5422_v8, %v6769_v18  ;;  %v5291_v3 = vcombine.high %v7850_v31, %v7855_v27 }
 0x17a   :  { %6309 = vmatpush1.bf16.xpose.msra.mxu1 %v6308_v63  ;;  %5621 = vmatprep.mubr.f32.mxu0 %v5328_v40  ;;  %v5505_v61 = vrot.slane %v5491_v53, %v6769_v18  ;;  %v5440_v23 = vrot.slane %v5421_v59, %v6769_v18  ;;  %v5482_v62 = vrot.slane %v5426_v39, %v6769_v18 }
 0x17b   :  { %5691 = vmatprep.mubr.f32.mxu1 %v5338_v11  ;;  %v5468_v25 = vrot.slane %v5425_v22, %v6769_v18  ;;  %6314 = vmatprep.subr.bf16.mxu1 %v6382_v15  ;;  %v5336_v19 = vcombine.high %v5314_v7, %v5314_v7  ;;  %v5305_v21 = vrot.slane %v5291_v3, %v6769_v18 }
 0x17c   :  { %v5507_v24 = vcombine.high %v5505_v61, %v5505_v61  ;;  %v5521_v10 = vrot.slane %v5505_v61, %v6769_v18  ;;  %v5489_v16 = vcombine.low %v5454_v9, %v5482_v62 }
 0x17d   :  { %v5485_v2 = vcombine.low %v5440_v23, %v5468_v25  ;;  %v5486_v12 = vcombine.high %v5440_v23, %v5468_v25  ;;  %v5307_v13 = vcombine.high %v5305_v21, %v5305_v21  ;;  %v5321_v27 = vrot.slane %v5305_v21, %v6769_v18 }
 0x17e   :  { %v5535_v30 = vrot.slane %v5507_v24, %v6769_v18  ;;  %v5537_v32 = vcombine.high %v5521_v10, %v5521_v10 }
 0x17f   :  { %v6312_v35 = vpack.c.bf16 %v5521_v10, %v5485_v2  ;;  %v5335_v31 = vrot.slane %v5307_v13, %v6769_v18  ;;  %v5337_v37 = vcombine.high %v5321_v27, %v5321_v27 }
 0x180   :  { %5622 = vmatmul.mubr.f32.vlgmr.msra.gmra.mrb[28].mxu0 %v5314_v7  ;;  %v6310_v36 = vpack.c.bf16 %v5535_v30, %v5489_v16  ;;  %v6315_v15 = vpack.c.bf16 %v5537_v32, %v5486_v12 }
 0x181   :  { %5692 = vmatmul.mubr.f32.vlgmr.msra.gmra.mrb[28].mxu1 %v5336_v19  ;;  %5761 = vmatprep.mubr.f32.mxu0 %v5335_v31 }
 0x182   :  { %6311 = vmatprep.subr.bf16.mxu0 %v6310_v36  ;;  %6317 = vmatpush3.bf16.xpose.msk.msra.mxu1 %vm7383_vm2, %v6315_v15 }
 0x183   :  { %6313 = vmatpush1.bf16.xpose.msra.mxu0 %v6312_v35  ;;  %6187 = vmatprep.mubr.msk.f32.mxu1 %vm6383_vm3, %v6384_v50 }
 0x189   :  { %6188 = vmatmul.mubr.msk.f32.vlgmr.msra.gmra.mrb[30].mxu1 %vm1426_vm1, %v5337_v37 }
 0x18a   :  { %5762 = vmatmul.mubr.f32.vlgmr.msra.gmra.mrb[30].mxu0 %v5321_v27 }
 0x1b9   :  { %v1499_v20 = vpop.f32.mrb[0].mxu0 }
 0x1ba   :  { %v1501_v17 = vpop.f32.mrb[1].mxu0 }
 0x1bb   :  { %v1569_v29 = vpop.f32.mrb[0].mxu1 }
 0x1bc   :  { %v1570_v44 = vadd.f32 %v1569_v29, %v1499_v20  ;;  %v1571_v45 = vpop.f32.mrb[1].mxu1 }
 0x1c1   :  { %v1639_v26 = vpop.f32.mrb[2].mxu0 }
 0x1c2   :  { %v1640_v18 = vadd.f32 %v1639_v26, %v1570_v44  ;;  %v1641_v49 = vpop.f32.mrb[3].mxu0 }
 0x1c3   :  { %v1709_v14 = vpop.f32.mrb[2].mxu1 }
 0x1c4   :  { %v1710_v34 = vadd.f32 %v1709_v14, %v1640_v18  ;;  %v6140_v28 = vpop.f32.mrb[3].mxu1 }
 0x1cc   :  { %v2048_v43 = vpop.f32.mrb[4].mxu0  ;;  %v2118_v51 = vpop.f32.mrb[4].mxu1 }
 0x1cd   :  { %v2049_v41 = vadd.f32 %v2048_v43, %v1710_v34  ;;  %v2050_v48 = vpop.f32.mrb[5].mxu0  ;;  %v2120_v50 = vpop.f32.mrb[5].mxu1 }
 0x1cf   :  { %v2119_v52 = vadd.f32 %v2118_v51, %v2049_v41 }
 0x1d5   :  { %v2188_v38 = vpop.f32.mrb[6].mxu0  ;;  %v2258_v54 = vpop.f32.mrb[6].mxu1 }
 0x1d6   :  { %v2189_v56 = vadd.f32 %v2188_v38, %v2119_v52  ;;  %v2190_v57 = vpop.f32.mrb[7].mxu0  ;;  %v6147_v46 = vpop.f32.mrb[7].mxu1 }
 0x1d8   :  { %v2259_v42 = vadd.f32 %v2258_v54, %v2189_v56 }
 0x1e3   :  { %v2643_v33 = vpop.f32.mrb[8].mxu0  ;;  %v2713_v47 = vpop.f32.mrb[8].mxu1 }
 0x1e4   :  { %v2645_v55 = vpop.f32.mrb[9].mxu0  ;;  %v2714_v58 = vadd.f32 %v2713_v47, %v2643_v33  ;;  %v2715_v60 = vpop.f32.mrb[9].mxu1 }
 0x1eb   :  { %v2853_v6 = vpop.f32.mrb[10].mxu1 }
 0x1ec   :  { %v2783_v63 = vpop.f32.mrb[10].mxu0  ;;  %v6154_v0 = vpop.f32.mrb[11].mxu1 }
 0x1ed   :  { %v2784_v1 = vadd.f32 %v2783_v63, %v2714_v58  ;;  %v2785_v40 = vpop.f32.mrb[11].mxu0  ;;  %v6108_v0 = vld [vmem:[%s7918_s3] ss:$0 sm:$0xff] }
 0x1ef   :  { %v2854_v4 = vadd.f32 %v2853_v6, %v2784_v1 }
 0x1f1   :  { %v2857_v5 = vadd.f32 %v2854_v4, %v2259_v42 }
 0x1f9   :  { %v3239_v7 = vpop.f32.mrb[12].mxu0 }
 0x1fa   :  { %v3241_v8 = vpop.f32.mrb[13].mxu0  ;;  %v3309_v53 = vpop.f32.mrb[12].mxu1 }
 0x1fb   :  { %v3310_v59 = vadd.f32 %v3309_v53, %v3239_v7  ;;  %v3311_v11 = vpop.f32.mrb[13].mxu1 }
 0x202   :  { %v3379_v39 = vpop.f32.mrb[14].mxu0 }
 0x203   :  { %v3380_v22 = vadd.f32 %v3379_v39, %v3310_v59  ;;  %v3381_v9 = vpop.f32.mrb[15].mxu0  ;;  %v3449_v61 = vpop.f32.mrb[14].mxu1 }
 0x204   :  { %v6161_v23 = vpop.f32.mrb[15].mxu1 }
 0x205   :  { %v3450_v62 = vadd.f32 %v3449_v61, %v3380_v22 }
 0x207   :  { %v3453_v25 = vadd.f32 %v3450_v62, %v2857_v5 }
 0x210   :  { %v3835_v3 = vpop.f32.mrb[16].mxu0 }
 0x211   :  { %v3837_v24 = vpop.f32.mrb[17].mxu0  ;;  %v3905_v19 = vpop.f32.mrb[16].mxu1 }
 0x212   :  { %v3906_v10 = vadd.f32 %v3905_v19, %v3835_v3  ;;  %v3907_v16 = vpop.f32.mrb[17].mxu1 }
 0x219   :  { %v3975_v2 = vpop.f32.mrb[18].mxu0  ;;  %v4045_v12 = vpop.f32.mrb[18].mxu1 }
 0x21a   :  { %v3976_v21 = vadd.f32 %v3975_v2, %v3906_v10  ;;  %v3977_v30 = vpop.f32.mrb[19].mxu0  ;;  %v6168_v32 = vpop.f32.mrb[19].mxu1 }
 0x21c   :  { %v4046_v35 = vadd.f32 %v4045_v12, %v3976_v21 }
 0x21e   :  { %v4049_v13 = vadd.f32 %v4046_v35, %v3453_v25 }
 0x226   :  { %v4431_v36 = vpop.f32.mrb[20].mxu0 }
 0x227   :  { %v4433_v15 = vpop.f32.mrb[21].mxu0  ;;  %v4501_v31 = vpop.f32.mrb[20].mxu1 }
 0x228   :  { %v4502_v27 = vadd.f32 %v4501_v31, %v4431_v36  ;;  %v4503_v37 = vpop.f32.mrb[21].mxu1 }
 0x22f   :  { %v4641_v20 = vpop.f32.mrb[22].mxu1 }
 0x230   :  { %v4571_v17 = vpop.f32.mrb[22].mxu0  ;;  %v6175_v29 = vpop.f32.mrb[23].mxu1 }
 0x231   :  { %v4572_v44 = vadd.f32 %v4571_v17, %v4502_v27  ;;  %v4573_v45 = vpop.f32.mrb[23].mxu0 }
 0x233   :  { %v4642_v26 = vadd.f32 %v4641_v20, %v4572_v44 }
 0x235   :  { %v4645_v18 = vadd.f32 %v4642_v26, %v4049_v13 }
 0x23d   :  { %v5027_v49 = vpop.f32.mrb[24].mxu0 }
 0x23e   :  { %v5029_v14 = vpop.f32.mrb[25].mxu0  ;;  %v5097_v34 = vpop.f32.mrb[24].mxu1 }
 0x23f   :  { %v5098_v28 = vadd.f32 %v5097_v34, %v5027_v49  ;;  %v5099_v43 = vpop.f32.mrb[25].mxu1 }
 0x246   :  { %v5167_v51 = vpop.f32.mrb[26].mxu0  ;;  %v5237_v41 = vpop.f32.mrb[26].mxu1 }
 0x247   :  { %v5168_v48 = vadd.f32 %v5167_v51, %v5098_v28  ;;  %v5169_v50 = vpop.f32.mrb[27].mxu0  ;;  %v6182_v52 = vpop.f32.mrb[27].mxu1 }
 0x249   :  { %v5238_v38 = vadd.f32 %v5237_v41, %v5168_v48 }
 0x24b   :  { %v5241_v54 = vadd.f32 %v5238_v38, %v4645_v18 }
 0x253   :  { %v5623_v56 = vpop.f32.mrb[28].mxu0 }
 0x254   :  { %v5625_v57 = vpop.f32.mrb[29].mxu0  ;;  %v5693_v46 = vpop.f32.mrb[28].mxu1 }
 0x255   :  { %v5694_v42 = vadd.f32 %v5693_v46, %v5623_v56  ;;  %v5695_v33 = vpop.f32.mrb[29].mxu1 }
 0x25c   :  { %v5833_v47 = vpop.f32.mrb[30].mxu1 }
 0x25d   :  { %v5763_v55 = vpop.f32.mrb[30].mxu0  ;;  %v6189_v58 = vpop.f32.mrb[31].mxu1 }
 0x25e   :  { %v5764_v60 = vadd.f32 %v5763_v55, %v5694_v42  ;;  %v5765_v6 = vpop.f32.mrb[31].mxu0 }
 0x260   :  { %v5834_v63 = vadd.f32 %v5833_v47, %v5764_v60 }
 0x262   :  { %v5837_v1 = vadd.f32 %v5834_v63, %v5241_v54 }
 0x264   :  { %v5845_v40 = vadd.f32 %v6108_v0, %v5837_v1 }
 0x266   :  { %5847 = vst.msk [vmem:[#allocation10] sm:$0x3] %vm5846_vm4, %v5845_v40 }
 0x267   :  { %6360 = shalt.err (!%p6357_p0)
}
 0x268   :  { %s6361_s21 = scalar_lea.hbm %s7920_s5, 32 }
 0x269   :  { %p6362_p1 = scmp.ne.s32.totalorder %s7920_s5, %s6361_s21  ;;  %p6365_p2 = scmp.lt.u32.totalorder %s6361_s21, %s7920_s5 }
 0x26b   :  { %p6367_p3 = pnand %p6365_p2, %p6362_p1 }
 0x26d   :  { %6370 = shalt.err (!%p6367_p3)
}
 0x26e   :  { %5857 = dma.vmem_to_hbm [thread:$0]  %s5855_s17, 32, %s7920_s5, [#allocation6]  }
 0x26f   :  { %6377 = dma.done.wait [#allocation6], 32  }
 0x270   :  { %6378 = vsyncadd [#allocation6], 4294967264 }
 0x271   :  { %5861 = vsyncpa [#allocation6], 1 }
 0x272   :  { %5862 = vsyncpa [#allocation7], 1 }
 0x273   :  { %5863 = vsyncpa [#allocation9], 1 }
 0x274   :  { %5864 = vsyncmov [#allocation4] }
 0x277   :  { %s5865_s28 = vpop.sfrf %5864 }
 0x278   :  { %p6109_p4 = scmp.ne.s32.totalorder %s5865_s28, 0 }
 0x27a   :  { %5869 = shalt.err (%p6109_p4)  }

</bundles_post_ra>
